<compile_context>
chip_gen: v7x
topology: tpu7x:2x2x1
jax: 0.10.0
libtpu: 0.0.40
codegen_flags: <defaults>
</compile_context>

<pallas_src>
import functools
import math

import jax
import jax.numpy as jnp
from jax import lax
from jax.experimental import pallas as pl
from jax.experimental.pallas import tpu as pltpu


# -----------------------------------------------------------------------------
# NF4 codebook == flute.nf_utils.get_values_pivots(num_bits=4, symmetric=False)
# (asymmetric NormalFloat-4 table, normalized to [-1, 1]).
# -----------------------------------------------------------------------------
_NF4_VALUES_F64 = [
    -1.0,
    -0.6961928009986877,
    -0.5250730514526367,
    -0.39491748809814453,
    -0.28444138169288635,
    -0.18477343022823334,
    -0.09105003625154495,
    0.0,
    0.07958029955625534,
    0.16093020141124725,
    0.24611230194568634,
    0.33791524171829224,
    0.44070982933044434,
    0.5626170039176941,
    0.7229568362236023,
    1.0,
]


def _nf_values_pivots():
    """(values, pivots) as Python floats, rounded through bf16 like the module."""
    v = jnp.asarray(_NF4_VALUES_F64, dtype=jnp.float32)
    v = v.astype(jnp.bfloat16).astype(jnp.float32)       # module stores a bf16 table
    p = (v[1:] + v[:-1]) * 0.5                           # pivots = midpoints
    p = p.astype(jnp.bfloat16).astype(jnp.float32)
    return [float(x) for x in v.tolist()], [float(x) for x in p.tolist()]


def _round_up(x, m):
    return (x + m - 1) // m * m


def _tpu_vmem_and_cores():
    """(physical VMEM bytes per core, tensorcores per chip) with safe fallbacks."""
    vmem = 64 << 20        # conservative fallback = v7x per-core VMEM
    cores = 1
    try:
        info = pltpu.get_tpu_info()
        vmem = int(getattr(info, "vmem_capacity_bytes", vmem))
        for name in ("tensorcores_per_chip", "num_cores_per_chip", "cores_per_chip"):
            c = getattr(info, name, None)
            if c:
                cores = int(c)
                break
    except Exception:
        pass
    if cores == 1:
        try:
            if "v7" in jax.devices()[0].device_kind.lower():
                cores = 2
        except Exception:
            pass
    return vmem, max(1, cores)


def _vmem_usage_bytes(bm, bn, bk, Kg, K, isz_x, isz_w, isz_s, isz_out, isz_c, cached):
    u = 2 * bm * bk * isz_x          # activation tile (double-buffered)
    u += 2 * bk * bn * isz_w         # weight tile (double-buffered)
    u += 2 * Kg * bn * isz_s         # grouped-scales panel
    u += 2 * bm * bn * isz_out       # output tile
    u += bm * bn * 4                 # f32 accumulator
    if cached:
        u += K * bn * isz_c          # dequantized-weight cache == (nk, bk, bn)
    return u


# -----------------------------------------------------------------------------
# Shared dequant: w (ng, g, bn) f32, s (ng, bn) f32 -> fake-quantized weights.
# -----------------------------------------------------------------------------
def _nf4_dequant(w, s, values, pivots, use_scaled_pivots):
    if use_scaled_pivots:
        # s = absmax >= 0, so (w / s > piv) <=> (w > piv * s): removes the
        # per-element divide (15 small (ng, bn) muls instead).  Flag-gated:
        # exact pivot ties can flip bins vs. the divide-based reference.
        q = jnp.full(w.shape, values[0], jnp.float32)
        for t, piv in enumerate(pivots):
            q = jnp.where(w > piv * s[:, None, :], values[t + 1], q)
    else:
        safe_s = jnp.where(s == 0.0, 1.0, s)                    # guard zero groups
        xn = w / safe_s[:, None, :]                             # normalize to [-1, 1]
        q = jnp.full(xn.shape, values[0], jnp.float32)
        for t, piv in enumerate(pivots):                        # 15-select NF4 lookup
            q = jnp.where(xn > piv, values[t + 1], q)
    return q * s[:, None, :]                                    # rescale


# -----------------------------------------------------------------------------
# Weight-stationary kernel (ni > 1): dequantize once per N tile, cache in VMEM.
#   x_ref : (bm, bk)     activation tile
#   w_ref : (bk, bn)     K-major weight tile (only read when i == 0)
#   s_ref : (Kg, bn)     per-group scales panel for the whole N tile (resident)
#   o_ref : (bm, bn)     output tile
#   acc   : (bm, bn) f32 accumulator
#   qw    : (nk, bk, bn) cached dequantized weight panel for the current N tile
# -----------------------------------------------------------------------------
def _qlinear_cached_kernel(x_ref, w_ref, s_ref, o_ref, acc_ref, qw_ref, *,
                           values, pivots, group_size, use_scaled_pivots):
    i = pl.program_id(1)                       # M-block index
    k = pl.program_id(2)                       # K-block index
    nk = pl.num_programs(2)

    bk, bn = w_ref.shape
    ng = bk // group_size                      # weight groups per K tile

    # Dequantize this (bk, bn) weight slice only for the first M block; every
    # other M block of this N tile reuses the cached result.
    @pl.when(i == 0)
    def _dequant():
        w = w_ref[...].astype(jnp.float32).reshape(ng, group_size, bn)
        row0 = pl.multiple_of(k * ng, ng)
        s = s_ref[pl.ds(row0, ng), :].astype(jnp.float32)            # (ng, bn)
        qw = _nf4_dequant(w, s, values, pivots, use_scaled_pivots).reshape(bk, bn)
        qw_ref[k] = qw.astype(qw_ref.dtype)

    @pl.when(k == 0)
    def _zero():
        acc_ref[...] = jnp.zeros_like(acc_ref)

    # (bm, bk) @ (bk, bn) -> (bm, bn); weight already K-major, no transpose.
    acc_ref[...] += lax.dot_general(
        x_ref[...], qw_ref[k],
        dimension_numbers=(((1,), (0,)), ((), ())),
        preferred_element_type=jnp.float32,
    )

    @pl.when(k == nk - 1)
    def _store():
        o_ref[...] = acc_ref[...].astype(o_ref.dtype)


# -----------------------------------------------------------------------------
# Cache-free kernel (ni == 1, decode / small M, or cache does not fit VMEM).
# -----------------------------------------------------------------------------
def _qlinear_nocache_kernel(x_ref, w_ref, s_ref, o_ref, acc_ref, *,
                            values, pivots, group_size, use_scaled_pivots):
    k = pl.program_id(2)
    nk = pl.num_programs(2)

    bk, bn = w_ref.shape
    ng = bk // group_size

    @pl.when(k == 0)
    def _zero():
        acc_ref[...] = jnp.zeros_like(acc_ref)

    w = w_ref[...].astype(jnp.float32).reshape(ng, group_size, bn)
    row0 = pl.multiple_of(k * ng, ng)
    s = s_ref[pl.ds(row0, ng), :].astype(jnp.float32)                # (ng, bn)
    qw = _nf4_dequant(w, s, values, pivots, use_scaled_pivots).reshape(bk, bn)

    acc_ref[...] += lax.dot_general(
        x_ref[...], qw.astype(x_ref.dtype),
        dimension_numbers=(((1,), (0,)), ((), ())),
        preferred_element_type=jnp.float32,
    )

    @pl.when(k == nk - 1)
    def _store():
        o_ref[...] = acc_ref[...].astype(o_ref.dtype)


def learnable_quantized_linear(inp, weight, scales, *, group_size,
                               bm=None, bn=None, bk=None,
                               use_scaled_pivots=False,
                               weight_stationary=True):
    """Forward of LearnableQuantizedLinear (bias=None path)."""
    *lead, K = inp.shape
    N, K2 = weight.shape
    assert K == K2
    assert K % group_size == 0
    Kg = K // group_size
    assert scales.size == N * Kg

    # One-time layout prep (would live at module init in a real deployment):
    #   weight (N, K)     -> (K, N)   MXU-friendly, N on the lane dim.
    #   scales (N*Kg, 1)  -> (Kg, N)  grouped, matching the transposed weight.
    w_t = jnp.transpose(weight)                          # (K, N)
    s_t = jnp.transpose(scales.reshape(N, Kg))           # (Kg, N)

    M = 1
    for d in lead:
        M *= d
    x2 = inp.reshape(M, K)
    compute_dtype = x2.dtype        # bf16 in -> bf16 MXU operands; f32 in -> f32

    isz = lambda a: jnp.dtype(a.dtype).itemsize
    isz_x, isz_w, isz_s = isz(x2), isz(w_t), isz(s_t)
    isz_out = isz_x
    isz_c = jnp.dtype(compute_dtype).itemsize

    vmem_phys, cores = _tpu_vmem_and_cores()
    budget = max(24 << 20, int(vmem_phys * 0.70))        # leave headroom

    # ---- bk: multiple of group_size & 128 (or full K); prefer >= 8 groups/tile.
    if bk is None:
        cap = max(512, 8 * group_size)
        cands = [c for c in range(cap, 0, -1)
                 if c % group_size == 0 and c % 128 == 0 and K % c == 0]
        bk = cands[0] if cands else K

    # ---- bm: 16-aligned for bf16 (native (16,128) tiling), 8 for f32.
    if bm is None:
        align = 16 if jnp.dtype(compute_dtype) == jnp.dtype(jnp.bfloat16) else 8
        bm = min(_round_up(M, align), 256)
    Mp = _round_up(M, bm)
    ni = Mp // bm

    # ---- cache only pays off when there is M-reuse.
    use_cache = weight_stationary and ni > 1

    # ---- bn: largest-first under the VMEM budget; prefer >= 2 N tiles on
    #      multi-TensorCore chips so the "parallel" axis actually shards.
    def _usage(bn_, cached):
        return _vmem_usage_bytes(bm, bn_, bk, Kg, K,
                                 isz_x, isz_w, isz_s, isz_out, isz_c, cached)

    if bn is None:
        cands = [c for c in (1024, 512, 256, 128) if N % c == 0]
        if not cands:
            cands = [N]
        if cores >= 2:
            pref = [c for c in cands if N // c >= 2]
            if pref:
                cands = pref
        bn_sel = None
        for c in cands:                                   # largest-first
            if _usage(c, use_cache) <= budget:
                bn_sel = c
                break
        if bn_sel is None and use_cache:
            use_cache = False                             # drop cache, keep tiles
            for c in cands:
                if _usage(c, False) <= budget:
                    bn_sel = c
                    break
        bn = bn_sel if bn_sel is not None else cands[-1]
    else:
        if use_cache and _usage(bn, True) > budget:
            use_cache = False

    assert N % bn == 0 and (bn % 128 == 0 or bn == N)
    assert K % bk == 0 and bk % group_size == 0 and (bk % 128 == 0 or bk == K)
    assert bm % 8 == 0

    usage = _usage(bn, use_cache)
    vmem_limit = int(min(max(usage * 1.3 + (4 << 20), 32 << 20), vmem_phys * 0.98))

    # Pad M up to a multiple of bm (ragged leading dims / small decode batches).
    if Mp != M:
        x2 = jnp.pad(x2, ((0, Mp - M), (0, 0)))

    nj, nk = N // bn, K // bk
    values, pivots = _nf_values_pivots()

    common = dict(values=values, pivots=pivots, group_size=group_size,
                  use_scaled_pivots=use_scaled_pivots)

    x_spec = pl.BlockSpec((bm, bk), lambda j, i, k: (i, k))
    s_spec = pl.BlockSpec((Kg, bn), lambda j, i, k: (0, j))      # tiny resident panel
    out_spec = pl.BlockSpec((bm, bn), lambda j, i, k: (i, j))

    if use_cache:
        # Weight is only read at i == 0; for i > 0 pin the block index to the
        # LAST fetched tile (nk-1) so the i=0 -> i=1 transition is a true no-op
        # revisit (no spurious HBM DMA) and the tile stays resident across M.
        w_spec = pl.BlockSpec((bk, bn),
                              lambda j, i, k: (jnp.where(i == 0, k, nk - 1), j))
        kernel = functools.partial(_qlinear_cached_kernel, **common)
        scratch = [pltpu.VMEM((bm, bn), jnp.float32),            # f32 accumulator
                   pltpu.VMEM((nk, bk, bn), compute_dtype)]      # dequant cache
        # M reuses the i==0 dequant cache, K accumulates -> both sequential.
        dim_sem = ("parallel", "arbitrary", "arbitrary")
    else:
        w_spec = pl.BlockSpec((bk, bn), lambda j, i, k: (k, j))
        kernel = functools.partial(_qlinear_nocache_kernel, **common)
        scratch = [pltpu.VMEM((bm, bn), jnp.float32)]
        dim_sem = ("parallel", "parallel", "arbitrary")

    cost = pl.CostEstimate(
        flops=int(2 * Mp * N * K + 33 * N * K),                  # matmul + dequant
        transcendentals=0,
        # Activations are re-read once per N tile; weights/scales read once.
        bytes_accessed=int(nj * Mp * K * isz_x + K * N * isz_w
                           + Kg * N * isz_s + Mp * N * isz_out),
    )

    out = pl.pallas_call(
        kernel,
        out_shape=jax.ShapeDtypeStruct((Mp, N), inp.dtype),
        grid_spec=pltpu.PrefetchScalarGridSpec(
            num_scalar_prefetch=0,
            grid=(nj, ni, nk),                                   # N outer, K inner
            in_specs=[x_spec, w_spec, s_spec],
            out_specs=out_spec,
            scratch_shapes=scratch,
        ),
        compiler_params=pltpu.CompilerParams(
            dimension_semantics=dim_sem,
            vmem_limit_bytes=vmem_limit),
        cost_estimate=cost,
    )(x2, w_t, s_t)

    out = out[:M]
    return out.reshape(*lead, N)


if __name__ == "__main__":
    # Small, module-consistent shapes chosen so every kernel path is exercised:
    # (1) auto-tiled decode path (single M block -> cache-free kernel),
    # (2) forced small tiles (multiple M/N/K blocks -> weight-stationary cache),
    # (3) the division-free scaled-pivots dequant flag.
    B, S = 2, 9
    in_features, out_features, group_size = 256, 256, 64

    key = jax.random.PRNGKey(0)
    kw, kx = jax.random.split(key)

    # weight=None path: kaiming_uniform_(a=sqrt(5)) == U(-1/sqrt(fan_in), 1/sqrt(fan_in))
    bound = 1.0 / math.sqrt(in_features)
    weight = jax.random.uniform(kw, (out_features, in_features), jnp.float32,
                                minval=-bound, maxval=bound)
    # scales = max(|weight.view(-1, group_size)|, dim=1, keepdim=True)
    scales = jnp.max(jnp.abs(weight.reshape(-1, group_size)), axis=1, keepdims=True)
    inp = jax.random.normal(kx, (B, S, in_features), jnp.float32)

    # Pure-JAX reference (flute.nf_utils.manual_nf4 + F.linear semantics).
    values, pivots = _nf_values_pivots()
    v = jnp.asarray(values, jnp.float32)
    p = jnp.asarray(pivots, jnp.float32)
    wg = weight.reshape(-1, group_size)
    wn = wg / scales
    idx = jnp.sum((wn[..., None] > p).astype(jnp.int32), axis=-1)
    qw_ref = (v[idx] * scales).reshape(out_features, in_features)
    ref = jnp.einsum("bsk,nk->bsn", inp, qw_ref,
                     precision=jax.lax.Precision.HIGHEST)

    tol = dict(rtol=5e-3, atol=5e-3)   # MXU f32 matmul vs HIGHEST-precision einsum

    # 1) Auto-tiled path: M = 18 fits a single M block -> cache-free kernel.
    out1 = jax.block_until_ready(
        learnable_quantized_linear(inp, weight, scales, group_size=group_size))
    assert out1.shape == (B, S, out_features)
    assert jnp.allclose(out1, ref, **tol), float(jnp.max(jnp.abs(out1 - ref)))

    # 2) Forced small tiles: 3 M blocks, 2 N blocks, 2 K blocks -> cached kernel
    #    (dequant at i==0, reuse for i>0, K accumulation, ragged-M padding).
    out2 = jax.block_until_ready(
        learnable_quantized_linear(inp, weight, scales, group_size=group_size,
                                   bm=8, bn=128, bk=128))
    assert jnp.allclose(out2, ref, **tol), float(jnp.max(jnp.abs(out2 - ref)))

    # 3) Division-free dequant flag (per-group scaled pivots), checked against a
    #    reference that uses the identical comparison math.
    idx_sp = jnp.sum((wg[..., None] > p * scales[..., None]).astype(jnp.int32), axis=-1)
    qw_sp = (v[idx_sp] * scales).reshape(out_features, in_features)
    ref_sp = jnp.einsum("bsk,nk->bsn", inp, qw_sp,
                        precision=jax.lax.Precision.HIGHEST)
    out3 = jax.block_until_ready(
        learnable_quantized_linear(inp, weight, scales, group_size=group_size,
                                   use_scaled_pivots=True))
    assert jnp.allclose(out3, ref_sp, **tol), float(jnp.max(jnp.abs(out3 - ref_sp)))

    print("KERNEL_OK")
</pallas_src>

<mosaic_0001>
module attributes {stable_mosaic.version = 11 : i64} {
  func.func @_qlinear_nocache_kernel(%arg0: i32, %arg1: i32, %arg2: i32, %arg3: memref<24x256xf32, #tpu.memory_space<vmem>>, %arg4: memref<256x256xf32, #tpu.memory_space<vmem>>, %arg5: memref<4x256xf32, #tpu.memory_space<vmem>>, %arg6: memref<24x256xf32, #tpu.memory_space<vmem>>, %arg7: memref<24x256xf32, #tpu.memory_space<vmem>>) attributes {dimension_semantics = [#tpu.dimension_semantics<parallel>, #tpu.dimension_semantics<parallel>, #tpu.dimension_semantics<arbitrary>], iteration_bounds = array<i64: 1, 1, 1>, scalar_prefetch = 0 : i64, scratch_operands = 1 : i64, tpu.core_type = #tpu.core_type<tc>, window_params = [{transform_indices = @transform_0, window_bounds = array<i64: 24, 256>}, {transform_indices = @transform_1, window_bounds = array<i64: 256, 256>}, {transform_indices = @transform_2, window_bounds = array<i64: 4, 256>}, {transform_indices = @transform_3, window_bounds = array<i64: 24, 256>}]} {
    %c0_i32 = arith.constant 0 : i32
    %0 = arith.cmpi eq, %arg2, %c0_i32 : i32
    %1 = arith.extui %0 : i1 to i32
    %c0_i32_0 = arith.constant 0 : i32
    %2 = arith.cmpi ne, %1, %c0_i32_0 : i32
    scf.if %2 {
      %cst_44 = arith.constant 0.000000e+00 : f32
      %89 = vector.broadcast %cst_44 : f32 to vector<24x256xf32>
      %c0_45 = arith.constant 0 : index
      %c0_46 = arith.constant 0 : index
      %90 = vector.load %arg7[%c0_45, %c0_46] : memref<24x256xf32, #tpu.memory_space<vmem>>, vector<24x256xf32>
      tpu.vector_store %arg7[%c0_45, %c0_46], %89 {strides = array<i32>} : memref<24x256xf32, #tpu.memory_space<vmem>>, vector<24x256xf32>,
    } else {
    }
    %c0 = arith.constant 0 : index
    %c0_1 = arith.constant 0 : index
    %3 = vector.load %arg4[%c0, %c0_1] : memref<256x256xf32, #tpu.memory_space<vmem>>, vector<256x256xf32>
    %4 = vector.shape_cast %3 : vector<256x256xf32> to vector<4x64x256xf32>
    %c4_i32 = arith.constant 4 : i32
    %5 = arith.muli %arg2, %c4_i32 : i32
    %6 = tpu.assume_multiple %5, 4 : i32
    %7 = arith.index_cast %6 : i32 to index
    %c0_2 = arith.constant 0 : index
    %8 = vector.load %arg5[%7, %c0_2] : memref<4x256xf32, #tpu.memory_space<vmem>>, vector<4x256xf32>
    %cst = arith.constant 0.000000e+00 : f32
    %9 = vector.broadcast %cst : f32 to vector<4x256xf32>
    %10 = arith.cmpf oeq, %8, %9 : vector<4x256xf32>
    %cst_3 = arith.constant 1.000000e+00 : f32
    %11 = vector.broadcast %cst_3 : f32 to vector<4x256xf32>
    %12 = arith.select %10, %11, %8 : vector<4x256xi1>, vector<4x256xf32>
    %13 = vector.shape_cast %12 : vector<4x256xf32> to vector<4x1x256xf32>
    %14 = vector.broadcast %13 : vector<4x1x256xf32> to vector<4x64x256xf32>
    %15 = arith.divf %4, %14 : vector<4x64x256xf32>
    %cst_4 = arith.constant -1.000000e+00 : f32
    %16 = vector.broadcast %cst_4 : f32 to vector<4x64x256xf32>
    %cst_5 = arith.constant -0.84765625 : f32
    %17 = vector.broadcast %cst_5 : f32 to vector<4x64x256xf32>
    %18 = arith.cmpf ogt, %15, %17 : vector<4x64x256xf32>
    %cst_6 = arith.constant -0.6953125 : f32
    %19 = vector.broadcast %cst_6 : f32 to vector<4x64x256xf32>
    %20 = arith.select %18, %19, %16 : vector<4x64x256xi1>, vector<4x64x256xf32>
    %cst_7 = arith.constant -6.093750e-01 : f32
    %21 = vector.broadcast %cst_7 : f32 to vector<4x64x256xf32>
    %22 = arith.cmpf ogt, %15, %21 : vector<4x64x256xf32>
    %cst_8 = arith.constant -0.5234375 : f32
    %23 = vector.broadcast %cst_8 : f32 to vector<4x64x256xf32>
    %24 = arith.select %22, %23, %20 : vector<4x64x256xi1>, vector<4x64x256xf32>
    %cst_9 = arith.constant -0.458984375 : f32
    %25 = vector.broadcast %cst_9 : f32 to vector<4x64x256xf32>
    %26 = arith.cmpf ogt, %15, %25 : vector<4x64x256xf32>
    %cst_10 = arith.constant -0.39453125 : f32
    %27 = vector.broadcast %cst_10 : f32 to vector<4x64x256xf32>
    %28 = arith.select %26, %27, %24 : vector<4x64x256xi1>, vector<4x64x256xf32>
    %cst_11 = arith.constant -0.33984375 : f32
    %29 = vector.broadcast %cst_11 : f32 to vector<4x64x256xf32>
    %30 = arith.cmpf ogt, %15, %29 : vector<4x64x256xf32>
    %cst_12 = arith.constant -0.28515625 : f32
    %31 = vector.broadcast %cst_12 : f32 to vector<4x64x256xf32>
    %32 = arith.select %30, %31, %28 : vector<4x64x256xi1>, vector<4x64x256xf32>
    %cst_13 = arith.constant -2.343750e-01 : f32
    %33 = vector.broadcast %cst_13 : f32 to vector<4x64x256xf32>
    %34 = arith.cmpf ogt, %15, %33 : vector<4x64x256xf32>
    %cst_14 = arith.constant -0.184570313 : f32
    %35 = vector.broadcast %cst_14 : f32 to vector<4x64x256xf32>
    %36 = arith.select %34, %35, %32 : vector<4x64x256xi1>, vector<4x64x256xf32>
    %cst_15 = arith.constant -0.137695313 : f32
    %37 = vector.broadcast %cst_15 : f32 to vector<4x64x256xf32>
    %38 = arith.cmpf ogt, %15, %37 : vector<4x64x256xf32>
    %cst_16 = arith.constant -0.0908203125 : f32
    %39 = vector.broadcast %cst_16 : f32 to vector<4x64x256xf32>
    %40 = arith.select %38, %39, %36 : vector<4x64x256xi1>, vector<4x64x256xf32>
    %cst_17 = arith.constant -0.0454101563 : f32
    %41 = vector.broadcast %cst_17 : f32 to vector<4x64x256xf32>
    %42 = arith.cmpf ogt, %15, %41 : vector<4x64x256xf32>
    %cst_18 = arith.constant 0.000000e+00 : f32
    %43 = vector.broadcast %cst_18 : f32 to vector<4x64x256xf32>
    %44 = arith.select %42, %43, %40 : vector<4x64x256xi1>, vector<4x64x256xf32>
    %cst_19 = arith.constant 0.0397949219 : f32
    %45 = vector.broadcast %cst_19 : f32 to vector<4x64x256xf32>
    %46 = arith.cmpf ogt, %15, %45 : vector<4x64x256xf32>
    %cst_20 = arith.constant 0.0795898438 : f32
    %47 = vector.broadcast %cst_20 : f32 to vector<4x64x256xf32>
    %48 = arith.select %46, %47, %44 : vector<4x64x256xi1>, vector<4x64x256xf32>
    %cst_21 = arith.constant 0.120117188 : f32
    %49 = vector.broadcast %cst_21 : f32 to vector<4x64x256xf32>
    %50 = arith.cmpf ogt, %15, %49 : vector<4x64x256xf32>
    %cst_22 = arith.constant 0.161132813 : f32
    %51 = vector.broadcast %cst_22 : f32 to vector<4x64x256xf32>
    %52 = arith.select %50, %51, %48 : vector<4x64x256xi1>, vector<4x64x256xf32>
    %cst_23 = arith.constant 2.031250e-01 : f32
    %53 = vector.broadcast %cst_23 : f32 to vector<4x64x256xf32>
    %54 = arith.cmpf ogt, %15, %53 : vector<4x64x256xf32>
    %cst_24 = arith.constant 0.24609375 : f32
    %55 = vector.broadcast %cst_24 : f32 to vector<4x64x256xf32>
    %56 = arith.select %54, %55, %52 : vector<4x64x256xi1>, vector<4x64x256xf32>
    %cst_25 = arith.constant 0.29296875 : f32
    %57 = vector.broadcast %cst_25 : f32 to vector<4x64x256xf32>
    %58 = arith.cmpf ogt, %15, %57 : vector<4x64x256xf32>
    %cst_26 = arith.constant 0.337890625 : f32
    %59 = vector.broadcast %cst_26 : f32 to vector<4x64x256xf32>
    %60 = arith.select %58, %59, %56 : vector<4x64x256xi1>, vector<4x64x256xf32>
    %cst_27 = arith.constant 3.906250e-01 : f32
    %61 = vector.broadcast %cst_27 : f32 to vector<4x64x256xf32>
    %62 = arith.cmpf ogt, %15, %61 : vector<4x64x256xf32>
    %cst_28 = arith.constant 0.44140625 : f32
    %63 = vector.broadcast %cst_28 : f32 to vector<4x64x256xf32>
    %64 = arith.select %62, %63, %60 : vector<4x64x256xi1>, vector<4x64x256xf32>
    %cst_29 = arith.constant 5.000000e-01 : f32
    %65 = vector.broadcast %cst_29 : f32 to vector<4x64x256xf32>
    %66 = arith.cmpf ogt, %15, %65 : vector<4x64x256xf32>
    %cst_30 = arith.constant 5.625000e-01 : f32
    %67 = vector.broadcast %cst_30 : f32 to vector<4x64x256xf32>
    %68 = arith.select %66, %67, %64 : vector<4x64x256xi1>, vector<4x64x256xf32>
    %cst_31 = arith.constant 6.406250e-01 : f32
    %69 = vector.broadcast %cst_31 : f32 to vector<4x64x256xf32>
    %70 = arith.cmpf ogt, %15, %69 : vector<4x64x256xf32>
    %cst_32 = arith.constant 0.72265625 : f32
    %71 = vector.broadcast %cst_32 : f32 to vector<4x64x256xf32>
    %72 = arith.select %70, %71, %68 : vector<4x64x256xi1>, vector<4x64x256xf32>
    %cst_33 = arith.constant 8.593750e-01 : f32
    %73 = vector.broadcast %cst_33 : f32 to vector<4x64x256xf32>
    %74 = arith.cmpf ogt, %15, %73 : vector<4x64x256xf32>
    %cst_34 = arith.constant 1.000000e+00 : f32
    %75 = vector.broadcast %cst_34 : f32 to vector<4x64x256xf32>
    %76 = arith.select %74, %75, %72 : vector<4x64x256xi1>, vector<4x64x256xf32>
    %77 = vector.shape_cast %8 : vector<4x256xf32> to vector<4x1x256xf32>
    %78 = vector.broadcast %77 : vector<4x1x256xf32> to vector<4x64x256xf32>
    %79 = arith.mulf %76, %78 : vector<4x64x256xf32>
    %80 = vector.shape_cast %79 : vector<4x64x256xf32> to vector<256x256xf32>
    %c0_35 = arith.constant 0 : index
    %c0_36 = arith.constant 0 : index
    %81 = vector.load %arg7[%c0_35, %c0_36] : memref<24x256xf32, #tpu.memory_space<vmem>>, vector<24x256xf32>
    %c0_37 = arith.constant 0 : index
    %c0_38 = arith.constant 0 : index
    %82 = vector.load %arg3[%c0_37, %c0_38] : memref<24x256xf32, #tpu.memory_space<vmem>>, vector<24x256xf32>
    %cst_39 = arith.constant dense<0.000000e+00> : vector<24x256xf32>
    %83 = tpu.matmul %82, %80, %cst_39 {dimension_numbers = #tpu.dot_dimension_numbers<[1], [0], [0], [1], [0, 0, 1, 1], [], []>} : vector<24x256xf32>, vector<256x256xf32>, vector<24x256xf32> -> vector<24x256xf32>
    %84 = arith.addf %81, %83 : vector<24x256xf32>
    %c0_40 = arith.constant 0 : index
    %c0_41 = arith.constant 0 : index
    %85 = vector.load %arg7[%c0_40, %c0_41] : memref<24x256xf32, #tpu.memory_space<vmem>>, vector<24x256xf32>
    tpu.vector_store %arg7[%c0_40, %c0_41], %84 {strides = array<i32>} : memref<24x256xf32, #tpu.memory_space<vmem>>, vector<24x256xf32>,
    %c0_i32_42 = arith.constant 0 : i32
    %86 = arith.cmpi eq, %arg2, %c0_i32_42 : i32
    %87 = arith.extui %86 : i1 to i32
    %c0_i32_43 = arith.constant 0 : i32
    %88 = arith.cmpi ne, %87, %c0_i32_43 : i32
    scf.if %88 {
      %c0_44 = arith.constant 0 : index
      %c0_45 = arith.constant 0 : index
      %89 = vector.load %arg7[%c0_44, %c0_45] : memref<24x256xf32, #tpu.memory_space<vmem>>, vector<24x256xf32>
      %c0_46 = arith.constant 0 : index
      %c0_47 = arith.constant 0 : index
      %90 = vector.load %arg6[%c0_46, %c0_47] : memref<24x256xf32, #tpu.memory_space<vmem>>, vector<24x256xf32>
      tpu.vector_store %arg6[%c0_46, %c0_47], %89 {strides = array<i32>} : memref<24x256xf32, #tpu.memory_space<vmem>>, vector<24x256xf32>,
    } else {
    }
    return
  }
  func.func @transform_0(%arg0: i32, %arg1: i32, %arg2: i32) -> (i32, i32) {
    %c0_i32 = arith.constant 0 : i32
    return %arg1, %arg2 : i32, i32
  }
  func.func @transform_1(%arg0: i32, %arg1: i32, %arg2: i32) -> (i32, i32) {
    %c0_i32 = arith.constant 0 : i32
    return %arg2, %arg0 : i32, i32
  }
  func.func @transform_2(%arg0: i32, %arg1: i32, %arg2: i32) -> (i32, i32) {
    %c0_i32 = arith.constant 0 : i32
    %c0_i32_0 = arith.constant 0 : i32
    return %c0_i32, %arg0 : i32, i32
  }
  func.func @transform_3(%arg0: i32, %arg1: i32, %arg2: i32) -> (i32, i32) {
    %c0_i32 = arith.constant 0 : i32
    return %arg1, %arg0 : i32, i32
  }
}

</mosaic_0001>

<bundles_post_ra>
// kernel: tpu_custom_call.1
= control target key start
LH: loop header
LB: loop body
LE: loop exit
PB: predicated region body
PF: predicated region fallthrough
CT: control target
= control target key end

     0   :  { %8 = vsyncpa [#allocation4], 0  ;;  %s4139_s0 = inlined_call_operand.hbm [shape: f32[24,256], index: 0, kind: input, shape index: {}]   ;;  %s4140_s1 = inlined_call_operand.hbm [shape: f32[256,256], index: 1, kind: input, shape index: {}]   ;;  %s4141_s2 = inlined_call_operand.hbm [shape: f32[4,256], index: 2, kind: input, shape index: {}]   ;;  %s4142_s3 = inlined_call_operand.hbm [shape: f32[24,256], index: 3, kind: output, shape index: {}]  }
   0x1   :  { %9 = vsyncpa [#allocation7], 0 }
   0x2   :  { %10 = vsyncpa [#allocation5], 0  ;;  %s2679_s12 = smov [#allocation6]   ;;  %s2680_s14 = smov [#allocation3]  }
   0x3   :  { %s28_s13 = sshll.u32 %s2679_s12, 4  ;;  %s16_s15 = sshll.u32 %s2680_s14, 4  ;;  %s29_s13 = int_to_ptr.vmem [resolvable:$true] %s28_s13  ;;  %s2707_s15 = int_to_ptr.vmem [resolvable:$true] %s16_s15 }
   0x4   :  { %s2585_s18 = scalar_lea.hbm %s4140_s1, 8192 }
   0x5   :  { %p2586_p0 = scmp.ne.s32.totalorder %s4140_s1, %s2585_s18  ;;  %p2589_p1 = scmp.lt.u32.totalorder %s2585_s18, %s4140_s1 }
   0x7   :  { %p2591_p2 = pnand %p2589_p1, %p2586_p0 }
   0x9   :  { %2594 = shalt.err (!%p2591_p2)
}
   0xa   :  { %s2595_s23 = scalar_lea.vmem %s29_s13, 8192  ;;  %p2600_p4 = scmp.lt.s32.totalorder %s29_s13, %s29_s13 }
   0xb   :  { %p2596_p3 = scmp.ne.s32.totalorder %s29_s13, %s2595_s23  ;;  %p2601_p5 = scmp.lt.s32.totalorder %s2595_s23, %s2595_s23 }
   0xd   :  { %p2602_p6 = por %p2601_p5, %p2600_p4 }
   0xf   :  { %p2603_p7 = pnand %p2602_p6, %p2596_p3 }
  0x11   :  { %2606 = shalt.err (!%p2603_p7)
}
  0x12   :  { %s2681_s24 = smov 256   ;;  %s2682_s25 = smov 16  }
  0x13   :  { %34 = dma.hbm_to_vmem [thread:$0]  %s4140_s1, 8192, %s29_s13, [#allocation7], %s2681_s24, %s2681_s24, %s2682_s25  }
  0x14   :  { %s2607_s30 = scalar_lea.hbm %s4139_s0, 768 }
  0x15   :  { %p2608_p8 = scmp.ne.s32.totalorder %s4139_s0, %s2607_s30  ;;  %p2611_p9 = scmp.lt.u32.totalorder %s2607_s30, %s4139_s0 }
  0x17   :  { %p2613_p10 = pnand %p2611_p9, %p2608_p8 }
  0x19   :  { %2616 = shalt.err (!%p2613_p10)
}
  0x1a   :  { %s2617_s8 = scalar_lea.vmem %s2707_s15, 768  ;;  %p2622_p12 = scmp.lt.s32.totalorder %s2707_s15, %s2707_s15 }
  0x1b   :  { %p2618_p11 = scmp.ne.s32.totalorder %s2707_s15, %s2617_s8  ;;  %p2623_p13 = scmp.lt.s32.totalorder %s2617_s8, %s2617_s8 }
  0x1d   :  { %p2624_p0 = por %p2623_p13, %p2622_p12 }
  0x1f   :  { %p2625_p1 = pnand %p2624_p0, %p2618_p11 }
  0x21   :  { %2628 = shalt.err (!%p2625_p1)
}
  0x22   :  { %22 = dma.hbm_to_vmem [thread:$0]  %s4139_s0, 768, %s2707_s15, [#allocation4], %s2681_s24, %s2681_s24, %s2682_s25  }
  0x23   :  { %s2683_s10 = smov [#allocation8]   ;;  %s2629_s14 = scalar_lea.hbm %s4141_s2, 128 }
  0x24   :  { %s41_s11 = sshll.u32 %s2683_s10, 4  ;;  %p2630_p2 = scmp.ne.s32.totalorder %s4141_s2, %s2629_s14  ;;  %s42_s11 = int_to_ptr.vmem [resolvable:$true] %s41_s11 }
  0x25   :  { %p2633_p3 = scmp.lt.u32.totalorder %s2629_s14, %s4141_s2 }
  0x27   :  { %p2635_p4 = pnand %p2633_p3, %p2630_p2 }
  0x29   :  { %2638 = shalt.err (!%p2635_p4)
}
  0x2a   :  { %s2639_s20 = scalar_lea.vmem %s42_s11, 128  ;;  %p2644_p6 = scmp.lt.s32.totalorder %s42_s11, %s42_s11 }
  0x2b   :  { %p2640_p5 = scmp.ne.s32.totalorder %s42_s11, %s2639_s20  ;;  %p2645_p7 = scmp.lt.s32.totalorder %s2639_s20, %s2639_s20 }
  0x2d   :  { %p2646_p8 = por %p2645_p7, %p2644_p6 }
  0x2f   :  { %p2647_p9 = pnand %p2646_p8, %p2640_p5 }
  0x31   :  { %2650 = shalt.err (!%p2647_p9)
}
  0x32   :  { %44 = dma.hbm_to_vmem [thread:$0]  %s4141_s2, 128, %s42_s11, [#allocation7]  }
  0x33   :  { %2673 = dma.done.wait [#allocation4], 768  }
  0x34   :  { %2674 = vsyncadd [#allocation4], 4294966528 }
  0x35   :  { %2675 = dma.done.wait [#allocation7], 8320  }
  0x36   :  { %2676 = vsyncadd [#allocation7], 4294958976  ;;  %v141_v0 = vlaneseq  ;;  %v2684_v1 = vmov 1966171168   ;;  %v134_v6 = vld [vmem:[#allocation8] sm:$0xff]  ;;  %v65_v26 = vld [vmem:[#allocation6 + $0x8] sm:$0xff] }
  0x37   :  { %v139_v2 = vunpack.c.l.s4 %v2684_v1  ;;  %vm135_vm0 = vcmp.eq.f32.partialorder %v134_v6, 0.0  ;;  %v67_v27 = vld [vmem:[#allocation6 + $0x18] sm:$0xff]  ;;  %v64_v28 = vld [vmem:[#allocation6] sm:$0xff]  ;;  %v66_v29 = vld [vmem:[#allocation6 + $0x10] sm:$0xff]  ;;  %v2685_v47 = vmov -1.0   ;;  %s2686_s2 = smov [#allocation9]  }
  0x38   :  { %v142_v3 = vshrl.u32 %v141_v0, 7  ;;  %v136_v7 = vsel %vm135_vm0, 1.0, %v134_v6  ;;  %v69_v30 = vld [vmem:[#allocation6 + $0x28] sm:$0xff]  ;;  %v71_v32 = vld [vmem:[#allocation6 + $0x38] sm:$0xff]  ;;  %v68_v33 = vld [vmem:[#allocation6 + $0x20] sm:$0xff]  ;;  %s2450_s21 = sshll.u32 %s2686_s2, 4  ;;  %s2451_s21 = int_to_ptr.vmem [resolvable:$true] %s2450_s21 }
  0x39   :  { %v140_v4 = vunpack.c.0.s8 %v139_v2  ;;  %v70_v34 = vld [vmem:[#allocation6 + $0x30] sm:$0xff]  ;;  %s2651_s22 = scalar_lea.vmem %s2451_s21, 768  ;;  %p2656_p11 = scmp.lt.s32.totalorder %s2451_s21, %s2451_s21 }
  0x3a   :  { %v2759_v9 = vsub.s32 0, %v142_v3  ;;  %v2761_v10 = vsub.s32 1, %v142_v3  ;;  %p2652_p10 = scmp.ne.s32.totalorder %s2451_s21, %s2651_s22  ;;  %p2657_p12 = scmp.lt.s32.totalorder %s2651_s22, %s2651_s22 }
  0x3b   :  { %v2756_v5 = vsub.s32 %v140_v4, %v142_v3 }
  0x3c   :  { %p2658_p13 = por %p2657_p12, %p2656_p11 }
  0x3d   :  { %v144_v8 = vrot.slane %v136_v7, %v2756_v5  ;;  %v2770_v20 = vrot.slane %v134_v6, %v2756_v5 }
  0x3e   :  { %p2659_p0 = pnand %p2658_p13, %p2652_p10 }
  0x3f   :  { %v145_v11 = vcombine.high %v144_v8, %v144_v8  ;;  %v152_v12 = vrot.slane %v144_v8, %v2756_v5  ;;  %v2778_v25 = vrot.slane %v2770_v20, %v2756_v5  ;;  %v2202_v36 = vcombine.high %v2770_v20, %v2770_v20 }
  0x41   :  { %v165_v13 = vrot.slane %v152_v12, %v2759_v9  ;;  %v169_v14 = vrot.slane %v152_v12, %v2761_v10  ;;  %v159_v15 = vrot.slane %v145_v11, %v2756_v5  ;;  %v160_v16 = vcombine.high %v152_v12, %v152_v12 }
  0x42   :  { %v2788_v37 = vrot.slane %v2778_v25, %v2761_v10  ;;  %v2792_v38 = vrot.slane %v2778_v25, %v2759_v9 }
  0x43   :  { %2569 = vrcp.f32 %v165_v13  ;;  %v161_v17 = vcombine.high %v159_v15, %v159_v15  ;;  %v173_v18 = vrot.slane %v159_v15, %v2759_v9  ;;  %v177_v19 = vrot.slane %v159_v15, %v2761_v10 }
  0x44   :  { %2571 = vrcp.f32 %v169_v14  ;;  %v181_v21 = vrot.slane %v160_v16, %v2759_v9  ;;  %v185_v22 = vrot.slane %v160_v16, %v2761_v10 }
  0x45   :  { %v189_v23 = vrot.slane %v161_v17, %v2759_v9  ;;  %2573 = vrcp.f32 %v173_v18  ;;  %v193_v24 = vrot.slane %v161_v17, %v2761_v10 }
  0x46   :  { %2575 = vrcp.f32 %v177_v19 }
  0x47   :  { %2577 = vrcp.f32 %v181_v21 }
  0x48   :  { %2579 = vrcp.f32 %v185_v22 }
  0x49   :  { %2581 = vrcp.f32 %v189_v23 }
  0x4a   :  { %2583 = vrcp.f32 %v193_v24 }
  0x4d   :  { %v2780_v31 = vpop.eup %2569 }
  0x4e   :  { %v2782_v35 = vpop.eup %2571  ;;  %v2801_v41 = vmul.f32 %v2780_v31, %v64_v28  ;;  %v2804_v42 = vmul.f32 %v2780_v31, %v66_v29  ;;  %v2813_v45 = vmul.f32 %v2780_v31, %v68_v33  ;;  %v2816_v46 = vmul.f32 %v2780_v31, %v70_v34 }
  0x4f   :  { %v2795_v39 = vmul.f32 %v2782_v35, %v65_v26  ;;  %v2798_v40 = vmul.f32 %v2782_v35, %v67_v27  ;;  %v2807_v43 = vmul.f32 %v2782_v35, %v69_v30  ;;  %v2810_v44 = vmul.f32 %v2782_v35, %v71_v32  ;;  %v2826_v50 = vpop.eup %2573 }
  0x50   :  { %v2830_v53 = vpop.eup %2575  ;;  %vm274_vm11 = vcmp.gt.f32.partialorder %v2801_v41, -0.84765625  ;;  %vm276_vm12 = vcmp.gt.f32.partialorder %v2804_v42, -0.84765625  ;;  %vm402_vm15 = vcmp.gt.f32.partialorder %v2801_v41, -0.609375  ;;  %vm404_vm0 = vcmp.gt.f32.partialorder %v2804_v42, -0.609375 }
  0x51   :  { %vm275_vm1 = vcmp.gt.f32.partialorder %v2795_v39, -0.84765625  ;;  %vm277_vm2 = vcmp.gt.f32.partialorder %v2798_v40, -0.84765625  ;;  %vm403_vm3 = vcmp.gt.f32.partialorder %v2795_v39, -0.609375  ;;  %vm405_vm4 = vcmp.gt.f32.partialorder %v2798_v40, -0.609375  ;;  %v2836_v56 = vpop.eup %2577 }
  0x52   :  { %v339_v48 = vsel %vm275_vm1, -0.6953125, %v2685_v47  ;;  %v341_v49 = vsel %vm277_vm2, -0.6953125, %v2685_v47  ;;  %vm531_vm5 = vcmp.gt.f32.partialorder %v2795_v39, -0.45898438  ;;  %vm533_vm6 = vcmp.gt.f32.partialorder %v2798_v40, -0.45898438  ;;  %v2842_v59 = vpop.eup %2579 }
  0x53   :  { %v467_v51 = vsel %vm403_vm3, -0.5234375, %v339_v48  ;;  %v469_v52 = vsel %vm405_vm4, -0.5234375, %v341_v49  ;;  %vm659_vm7 = vcmp.gt.f32.partialorder %v2795_v39, -0.33984375  ;;  %vm661_vm8 = vcmp.gt.f32.partialorder %v2798_v40, -0.33984375  ;;  %v2846_v62 = vpop.eup %2581 }
  0x54   :  { %v595_v54 = vsel %vm531_vm5, -0.39453125, %v467_v51  ;;  %v597_v55 = vsel %vm533_vm6, -0.39453125, %v469_v52  ;;  %vm787_vm9 = vcmp.gt.f32.partialorder %v2795_v39, -0.234375  ;;  %vm789_vm10 = vcmp.gt.f32.partialorder %v2798_v40, -0.234375  ;;  %v2850_v1 = vpop.eup %2583 }
  0x55   :  { %v723_v57 = vsel %vm659_vm7, -0.28515625, %v595_v54  ;;  %v725_v58 = vsel %vm661_vm8, -0.28515625, %v597_v55  ;;  %vm915_vm13 = vcmp.gt.f32.partialorder %v2795_v39, -0.13769531  ;;  %vm917_vm14 = vcmp.gt.f32.partialorder %v2798_v40, -0.13769531 }
  0x56   :  { %v851_v60 = vsel %vm787_vm9, -0.18457031, %v723_v57  ;;  %v853_v61 = vsel %vm789_vm10, -0.18457031, %v725_v58  ;;  %vm1043_vm1 = vcmp.gt.f32.partialorder %v2795_v39, -0.045410156  ;;  %vm1045_vm2 = vcmp.gt.f32.partialorder %v2798_v40, -0.045410156 }
  0x57   :  { %v979_v63 = vsel %vm915_vm13, -0.09082031, %v851_v60  ;;  %v981_v0 = vsel %vm917_vm14, -0.09082031, %v853_v61  ;;  %vm1171_vm3 = vcmp.gt.f32.partialorder %v2795_v39, 0.039794922  ;;  %vm1173_vm4 = vcmp.gt.f32.partialorder %v2798_v40, 0.039794922 }
  0x58   :  { %v1107_v2 = vsel %vm1043_vm1, 0.0, %v979_v63  ;;  %v1109_v3 = vsel %vm1045_vm2, 0.0, %v981_v0  ;;  %vm1299_vm5 = vcmp.gt.f32.partialorder %v2795_v39, 0.12011719  ;;  %vm1301_vm6 = vcmp.gt.f32.partialorder %v2798_v40, 0.12011719 }
  0x59   :  { %v1235_v4 = vsel %vm1171_vm3, 0.079589844, %v1107_v2  ;;  %v1237_v6 = vsel %vm1173_vm4, 0.079589844, %v1109_v3  ;;  %vm1427_vm7 = vcmp.gt.f32.partialorder %v2795_v39, 0.203125  ;;  %vm1429_vm8 = vcmp.gt.f32.partialorder %v2798_v40, 0.203125 }
  0x5a   :  { %v1363_v7 = vsel %vm1299_vm5, 0.16113281, %v1235_v4  ;;  %v1365_v8 = vsel %vm1301_vm6, 0.16113281, %v1237_v6  ;;  %vm1555_vm9 = vcmp.gt.f32.partialorder %v2795_v39, 0.29296875  ;;  %vm1557_vm10 = vcmp.gt.f32.partialorder %v2798_v40, 0.29296875 }
  0x5b   :  { %v1491_v11 = vsel %vm1427_vm7, 0.24609375, %v1363_v7  ;;  %v1493_v12 = vsel %vm1429_vm8, 0.24609375, %v1365_v8  ;;  %vm1683_vm13 = vcmp.gt.f32.partialorder %v2795_v39, 0.390625  ;;  %vm1685_vm14 = vcmp.gt.f32.partialorder %v2798_v40, 0.390625 }
  0x5c   :  { %v1619_v13 = vsel %vm1555_vm9, 0.33789063, %v1491_v11  ;;  %v1621_v14 = vsel %vm1557_vm10, 0.33789063, %v1493_v12  ;;  %vm1811_vm1 = vcmp.gt.f32.partialorder %v2795_v39, 0.5  ;;  %vm1813_vm2 = vcmp.gt.f32.partialorder %v2798_v40, 0.5 }
  0x5d   :  { %v1747_v15 = vsel %vm1683_vm13, 0.44140625, %v1619_v13  ;;  %v1749_v16 = vsel %vm1685_vm14, 0.44140625, %v1621_v14  ;;  %vm1939_vm3 = vcmp.gt.f32.partialorder %v2795_v39, 0.640625  ;;  %vm1941_vm4 = vcmp.gt.f32.partialorder %v2798_v40, 0.640625 }
  0x5e   :  { %v1875_v17 = vsel %vm1811_vm1, 0.5625, %v1747_v15  ;;  %v1877_v18 = vsel %vm1813_vm2, 0.5625, %v1749_v16  ;;  %vm2067_vm5 = vcmp.gt.f32.partialorder %v2795_v39, 0.859375  ;;  %vm2069_vm6 = vcmp.gt.f32.partialorder %v2798_v40, 0.859375 }
  0x5f   :  { %v2003_v19 = vsel %vm1939_vm3, 0.72265625, %v1875_v17  ;;  %v2005_v21 = vsel %vm1941_vm4, 0.72265625, %v1877_v18  ;;  %v338_v22 = vsel %vm274_vm11, -0.6953125, %v2685_v47  ;;  %v340_v23 = vsel %vm276_vm12, -0.6953125, %v2685_v47 }
  0x60   :  { %v2131_v24 = vsel %vm2067_vm5, 1.0, %v2003_v19  ;;  %v2133_v26 = vsel %vm2069_vm6, 1.0, %v2005_v21  ;;  %v466_v27 = vsel %vm402_vm15, -0.5234375, %v338_v22  ;;  %v468_v28 = vsel %vm404_vm0, -0.5234375, %v340_v23 }
  0x61   :  { %v2260_v29 = vmul.f32 %v2788_v37, %v2131_v24  ;;  %v2262_v30 = vmul.f32 %v2788_v37, %v2133_v26  ;;  %vm530_vm7 = vcmp.gt.f32.partialorder %v2801_v41, -0.45898438  ;;  %vm532_vm11 = vcmp.gt.f32.partialorder %v2804_v42, -0.45898438 }
  0x62   :  { %v594_v32 = vsel %vm530_vm7, -0.39453125, %v466_v27  ;;  %v596_v33 = vsel %vm532_vm11, -0.39453125, %v468_v28  ;;  %vm658_vm12 = vcmp.gt.f32.partialorder %v2801_v41, -0.33984375  ;;  %vm660_vm8 = vcmp.gt.f32.partialorder %v2804_v42, -0.33984375 }
  0x63   :  { %v2465_v34 = vpack.c.bf16 %v2262_v30, %v2260_v29  ;;  %v722_v39 = vsel %vm658_vm12, -0.28515625, %v594_v32  ;;  %v724_v40 = vsel %vm660_vm8, -0.28515625, %v596_v33  ;;  %vm786_vm15 = vcmp.gt.f32.partialorder %v2801_v41, -0.234375 }
  0x64   :  { %vm788_vm0 = vcmp.gt.f32.partialorder %v2804_v42, -0.234375  ;;  %v850_v48 = vsel %vm786_vm15, -0.18457031, %v722_v39  ;;  %vm914_vm9 = vcmp.gt.f32.partialorder %v2801_v41, -0.13769531  ;;  %vm916_vm10 = vcmp.gt.f32.partialorder %v2804_v42, -0.13769531 }
  0x65   :  { %2529 = vmatprep.subr.bf16.mxu1 %v2465_v34  ;;  %v852_v49 = vsel %vm788_vm0, -0.18457031, %v724_v40  ;;  %v978_v51 = vsel %vm914_vm9, -0.09082031, %v850_v48  ;;  %vm1042_vm13 = vcmp.gt.f32.partialorder %v2801_v41, -0.045410156  ;;  %vm1044_vm14 = vcmp.gt.f32.partialorder %v2804_v42, -0.045410156  ;;  %2466 = vmatprep.subr.bf16.mxu0 %v2465_v34 }
  0x66   :  { %v980_v52 = vsel %vm916_vm10, -0.09082031, %v852_v49  ;;  %v1106_v54 = vsel %vm1042_vm13, 0.0, %v978_v51  ;;  %vm1170_vm1 = vcmp.gt.f32.partialorder %v2801_v41, 0.039794922  ;;  %vm1172_vm2 = vcmp.gt.f32.partialorder %v2804_v42, 0.039794922 }
  0x67   :  { %v1108_v55 = vsel %vm1044_vm14, 0.0, %v980_v52  ;;  %v1234_v57 = vsel %vm1170_vm1, 0.079589844, %v1106_v54  ;;  %vm1298_vm3 = vcmp.gt.f32.partialorder %v2801_v41, 0.12011719  ;;  %vm1300_vm4 = vcmp.gt.f32.partialorder %v2804_v42, 0.12011719 }
  0x68   :  { %v1236_v58 = vsel %vm1172_vm2, 0.079589844, %v1108_v55  ;;  %v1362_v60 = vsel %vm1298_vm3, 0.16113281, %v1234_v57  ;;  %vm1426_vm5 = vcmp.gt.f32.partialorder %v2801_v41, 0.203125  ;;  %vm1428_vm6 = vcmp.gt.f32.partialorder %v2804_v42, 0.203125 }
  0x69   :  { %v1364_v61 = vsel %vm1300_vm4, 0.16113281, %v1236_v58  ;;  %v1490_v63 = vsel %vm1426_vm5, 0.24609375, %v1362_v60  ;;  %vm1554_vm7 = vcmp.gt.f32.partialorder %v2801_v41, 0.29296875  ;;  %vm1556_vm11 = vcmp.gt.f32.partialorder %v2804_v42, 0.29296875 }
  0x6a   :  { %v1492_v0 = vsel %vm1428_vm6, 0.24609375, %v1364_v61  ;;  %v1618_v2 = vsel %vm1554_vm7, 0.33789063, %v1490_v63  ;;  %vm1682_vm12 = vcmp.gt.f32.partialorder %v2801_v41, 0.390625  ;;  %vm1684_vm8 = vcmp.gt.f32.partialorder %v2804_v42, 0.390625 }
  0x6b   :  { %v1620_v3 = vsel %vm1556_vm11, 0.33789063, %v1492_v0  ;;  %v1746_v4 = vsel %vm1682_vm12, 0.44140625, %v1618_v2  ;;  %vm1810_vm15 = vcmp.gt.f32.partialorder %v2801_v41, 0.5  ;;  %vm1812_vm0 = vcmp.gt.f32.partialorder %v2804_v42, 0.5 }
  0x6c   :  { %v1748_v6 = vsel %vm1684_vm8, 0.44140625, %v1620_v3  ;;  %v1874_v7 = vsel %vm1810_vm15, 0.5625, %v1746_v4  ;;  %vm1938_vm9 = vcmp.gt.f32.partialorder %v2801_v41, 0.640625  ;;  %vm1940_vm10 = vcmp.gt.f32.partialorder %v2804_v42, 0.640625 }
  0x6d   :  { %v1876_v8 = vsel %vm1812_vm0, 0.5625, %v1748_v6  ;;  %v2002_v11 = vsel %vm1938_vm9, 0.72265625, %v1874_v7  ;;  %vm2066_vm13 = vcmp.gt.f32.partialorder %v2801_v41, 0.859375  ;;  %vm2068_vm14 = vcmp.gt.f32.partialorder %v2804_v42, 0.859375 }
  0x6e   :  { %v2004_v12 = vsel %vm1940_vm10, 0.72265625, %v1876_v8  ;;  %v2130_v13 = vsel %vm2066_vm13, 1.0, %v2002_v11  ;;  %vm279_vm1 = vcmp.gt.f32.partialorder %v2807_v43, -0.84765625  ;;  %vm281_vm2 = vcmp.gt.f32.partialorder %v2810_v44, -0.84765625 }
  0x6f   :  { %v2132_v14 = vsel %vm2068_vm14, 1.0, %v2004_v12  ;;  %v2259_v15 = vmul.f32 %v2792_v38, %v2130_v13  ;;  %v343_v16 = vsel %vm279_vm1, -0.6953125, %v2685_v47  ;;  %v345_v17 = vsel %vm281_vm2, -0.6953125, %v2685_v47 }
  0x70   :  { %v2261_v18 = vmul.f32 %v2792_v38, %v2132_v14  ;;  %vm407_vm3 = vcmp.gt.f32.partialorder %v2807_v43, -0.609375  ;;  %vm409_vm4 = vcmp.gt.f32.partialorder %v2810_v44, -0.609375  ;;  %vm535_vm5 = vcmp.gt.f32.partialorder %v2807_v43, -0.45898438 }
  0x71   :  { %v471_v41 = vsel %vm407_vm3, -0.5234375, %v343_v16  ;;  %v473_v42 = vsel %vm409_vm4, -0.5234375, %v345_v17  ;;  %vm537_vm6 = vcmp.gt.f32.partialorder %v2810_v44, -0.45898438  ;;  %vm663_vm7 = vcmp.gt.f32.partialorder %v2807_v43, -0.33984375 }
  0x72   :  { %v2467_v19 = vpack.c.bf16 %v2261_v18, %v2259_v15  ;;  %v599_v21 = vsel %vm535_vm5, -0.39453125, %v471_v41  ;;  %v601_v22 = vsel %vm537_vm6, -0.39453125, %v473_v42  ;;  %vm665_vm11 = vcmp.gt.f32.partialorder %v2810_v44, -0.33984375 }
  0x73   :  { %v727_v23 = vsel %vm663_vm7, -0.28515625, %v599_v21  ;;  %v729_v24 = vsel %vm665_vm11, -0.28515625, %v601_v22  ;;  %vm791_vm12 = vcmp.gt.f32.partialorder %v2807_v43, -0.234375  ;;  %vm793_vm8 = vcmp.gt.f32.partialorder %v2810_v44, -0.234375 }
  0x74   :  { %2545 = vmatpush1.bf16.msra.mxu1 %v2467_v19  ;;  %2468 = vmatpush1.bf16.msra.mxu0 %v2467_v19  ;;  %v855_v26 = vsel %vm791_vm12, -0.18457031, %v727_v23  ;;  %v857_v27 = vsel %vm793_vm8, -0.18457031, %v729_v24  ;;  %vm919_vm15 = vcmp.gt.f32.partialorder %v2807_v43, -0.13769531  ;;  %vm921_vm0 = vcmp.gt.f32.partialorder %v2810_v44, -0.13769531 }
  0x75   :  { %v983_v28 = vsel %vm919_vm15, -0.09082031, %v855_v26  ;;  %v985_v29 = vsel %vm921_vm0, -0.09082031, %v857_v27  ;;  %vm1047_vm9 = vcmp.gt.f32.partialorder %v2807_v43, -0.045410156  ;;  %vm1049_vm10 = vcmp.gt.f32.partialorder %v2810_v44, -0.045410156 }
  0x76   :  { %v1111_v30 = vsel %vm1047_vm9, 0.0, %v983_v28  ;;  %v1113_v32 = vsel %vm1049_vm10, 0.0, %v985_v29  ;;  %vm1175_vm13 = vcmp.gt.f32.partialorder %v2807_v43, 0.039794922  ;;  %vm1177_vm14 = vcmp.gt.f32.partialorder %v2810_v44, 0.039794922  ;;  %v73_v28 = vld [vmem:[#allocation6 + $0x48] sm:$0xff] }
  0x77   :  { %v1239_v33 = vsel %vm1175_vm13, 0.079589844, %v1111_v30  ;;  %v1241_v34 = vsel %vm1177_vm14, 0.079589844, %v1113_v32  ;;  %vm1303_vm1 = vcmp.gt.f32.partialorder %v2807_v43, 0.12011719  ;;  %vm1305_vm2 = vcmp.gt.f32.partialorder %v2810_v44, 0.12011719  ;;  %v75_v32 = vld [vmem:[#allocation6 + $0x58] sm:$0xff] }
  0x78   :  { %v1367_v39 = vsel %vm1303_vm1, 0.16113281, %v1239_v33  ;;  %v1369_v40 = vsel %vm1305_vm2, 0.16113281, %v1241_v34  ;;  %vm1431_vm3 = vcmp.gt.f32.partialorder %v2807_v43, 0.203125  ;;  %vm1433_vm4 = vcmp.gt.f32.partialorder %v2810_v44, 0.203125  ;;  %v72_v33 = vld [vmem:[#allocation6 + $0x40] sm:$0xff] }
  0x79   :  { %v1495_v48 = vsel %vm1431_vm3, 0.24609375, %v1367_v39  ;;  %v1497_v49 = vsel %vm1433_vm4, 0.24609375, %v1369_v40  ;;  %vm1559_vm5 = vcmp.gt.f32.partialorder %v2807_v43, 0.29296875  ;;  %vm1561_vm6 = vcmp.gt.f32.partialorder %v2810_v44, 0.29296875 }
  0x7a   :  { %v1623_v51 = vsel %vm1559_vm5, 0.33789063, %v1495_v48  ;;  %v1625_v52 = vsel %vm1561_vm6, 0.33789063, %v1497_v49  ;;  %vm1687_vm7 = vcmp.gt.f32.partialorder %v2807_v43, 0.390625  ;;  %vm1689_vm11 = vcmp.gt.f32.partialorder %v2810_v44, 0.390625 }
  0x7b   :  { %v1751_v54 = vsel %vm1687_vm7, 0.44140625, %v1623_v51  ;;  %v1753_v55 = vsel %vm1689_vm11, 0.44140625, %v1625_v52  ;;  %vm1815_vm12 = vcmp.gt.f32.partialorder %v2807_v43, 0.5  ;;  %vm1817_vm8 = vcmp.gt.f32.partialorder %v2810_v44, 0.5 }
  0x7c   :  { %v1879_v57 = vsel %vm1815_vm12, 0.5625, %v1751_v54  ;;  %v1881_v58 = vsel %vm1817_vm8, 0.5625, %v1753_v55  ;;  %vm1943_vm15 = vcmp.gt.f32.partialorder %v2807_v43, 0.640625  ;;  %vm1945_vm0 = vcmp.gt.f32.partialorder %v2810_v44, 0.640625 }
  0x7d   :  { %v2007_v60 = vsel %vm1943_vm15, 0.72265625, %v1879_v57  ;;  %v2009_v61 = vsel %vm1945_vm0, 0.72265625, %v1881_v58  ;;  %vm2071_vm9 = vcmp.gt.f32.partialorder %v2807_v43, 0.859375  ;;  %vm2073_vm10 = vcmp.gt.f32.partialorder %v2810_v44, 0.859375 }
  0x7e   :  { %v2135_v63 = vsel %vm2071_vm9, 1.0, %v2007_v60  ;;  %v2137_v0 = vsel %vm2073_vm10, 1.0, %v2009_v61  ;;  %vm278_vm13 = vcmp.gt.f32.partialorder %v2813_v45, -0.84765625  ;;  %vm280_vm14 = vcmp.gt.f32.partialorder %v2816_v46, -0.84765625 }
  0x7f   :  { %v2264_v2 = vmul.f32 %v2788_v37, %v2135_v63  ;;  %v2266_v3 = vmul.f32 %v2788_v37, %v2137_v0  ;;  %v342_v4 = vsel %vm278_vm13, -0.6953125, %v2685_v47  ;;  %v344_v6 = vsel %vm280_vm14, -0.6953125, %v2685_v47 }
  0x80   :  { %vm406_vm1 = vcmp.gt.f32.partialorder %v2813_v45, -0.609375  ;;  %vm408_vm2 = vcmp.gt.f32.partialorder %v2816_v46, -0.609375  ;;  %vm534_vm3 = vcmp.gt.f32.partialorder %v2813_v45, -0.45898438  ;;  %vm536_vm4 = vcmp.gt.f32.partialorder %v2816_v46, -0.45898438 }
  0x81   :  { %v2469_v43 = vpack.c.bf16 %v2266_v3, %v2264_v2  ;;  %v470_v44 = vsel %vm406_vm1, -0.5234375, %v342_v4  ;;  %v472_v7 = vsel %vm408_vm2, -0.5234375, %v344_v6  ;;  %vm662_vm5 = vcmp.gt.f32.partialorder %v2813_v45, -0.33984375 }
  0x82   :  { %v598_v8 = vsel %vm534_vm3, -0.39453125, %v470_v44  ;;  %v600_v11 = vsel %vm536_vm4, -0.39453125, %v472_v7  ;;  %vm664_vm6 = vcmp.gt.f32.partialorder %v2816_v46, -0.33984375  ;;  %vm790_vm7 = vcmp.gt.f32.partialorder %v2813_v45, -0.234375 }
  0x83   :  { %2530 = vmatprep.subr.bf16.mxu1 %v2469_v43  ;;  %v726_v12 = vsel %vm662_vm5, -0.28515625, %v598_v8  ;;  %v728_v13 = vsel %vm664_vm6, -0.28515625, %v600_v11  ;;  %vm792_vm11 = vcmp.gt.f32.partialorder %v2816_v46, -0.234375  ;;  %vm918_vm12 = vcmp.gt.f32.partialorder %v2813_v45, -0.13769531  ;;  %2470 = vmatprep.subr.bf16.mxu0 %v2469_v43 }
  0x84   :  { %v854_v14 = vsel %vm790_vm7, -0.18457031, %v726_v12  ;;  %v856_v15 = vsel %vm792_vm11, -0.18457031, %v728_v13  ;;  %vm920_vm8 = vcmp.gt.f32.partialorder %v2816_v46, -0.13769531  ;;  %vm1046_vm15 = vcmp.gt.f32.partialorder %v2813_v45, -0.045410156 }
  0x85   :  { %v982_v16 = vsel %vm918_vm12, -0.09082031, %v854_v14  ;;  %v984_v17 = vsel %vm920_vm8, -0.09082031, %v856_v15  ;;  %vm1048_vm0 = vcmp.gt.f32.partialorder %v2816_v46, -0.045410156  ;;  %vm1174_vm9 = vcmp.gt.f32.partialorder %v2813_v45, 0.039794922 }
  0x86   :  { %v1110_v18 = vsel %vm1046_vm15, 0.0, %v982_v16  ;;  %v1112_v41 = vsel %vm1048_vm0, 0.0, %v984_v17  ;;  %vm1176_vm10 = vcmp.gt.f32.partialorder %v2816_v46, 0.039794922  ;;  %vm1302_vm13 = vcmp.gt.f32.partialorder %v2813_v45, 0.12011719 }
  0x87   :  { %v1238_v42 = vsel %vm1174_vm9, 0.079589844, %v1110_v18  ;;  %v1240_v19 = vsel %vm1176_vm10, 0.079589844, %v1112_v41  ;;  %vm1304_vm14 = vcmp.gt.f32.partialorder %v2816_v46, 0.12011719  ;;  %vm1430_vm1 = vcmp.gt.f32.partialorder %v2813_v45, 0.203125 }
  0x88   :  { %v1366_v21 = vsel %vm1302_vm13, 0.16113281, %v1238_v42  ;;  %v1368_v22 = vsel %vm1304_vm14, 0.16113281, %v1240_v19  ;;  %vm1432_vm2 = vcmp.gt.f32.partialorder %v2816_v46, 0.203125  ;;  %vm1558_vm3 = vcmp.gt.f32.partialorder %v2813_v45, 0.29296875  ;;  %v74_v19 = vld [vmem:[#allocation6 + $0x50] sm:$0xff] }
  0x89   :  { %v1494_v23 = vsel %vm1430_vm1, 0.24609375, %v1366_v21  ;;  %v1496_v24 = vsel %vm1432_vm2, 0.24609375, %v1368_v22  ;;  %vm1560_vm4 = vcmp.gt.f32.partialorder %v2816_v46, 0.29296875  ;;  %vm1686_vm5 = vcmp.gt.f32.partialorder %v2813_v45, 0.390625 }
  0x8a   :  { %v1622_v26 = vsel %vm1558_vm3, 0.33789063, %v1494_v23  ;;  %v1624_v27 = vsel %vm1560_vm4, 0.33789063, %v1496_v24  ;;  %vm1688_vm6 = vcmp.gt.f32.partialorder %v2816_v46, 0.390625  ;;  %vm1814_vm7 = vcmp.gt.f32.partialorder %v2813_v45, 0.5 }
  0x8b   :  { %v1750_v29 = vsel %vm1686_vm5, 0.44140625, %v1622_v26  ;;  %v1752_v30 = vsel %vm1688_vm6, 0.44140625, %v1624_v27  ;;  %vm1816_vm11 = vcmp.gt.f32.partialorder %v2816_v46, 0.5  ;;  %vm1942_vm12 = vcmp.gt.f32.partialorder %v2813_v45, 0.640625 }
  0x8c   :  { %v1878_v34 = vsel %vm1814_vm7, 0.5625, %v1750_v29  ;;  %v1880_v39 = vsel %vm1816_vm11, 0.5625, %v1752_v30  ;;  %vm1944_vm8 = vcmp.gt.f32.partialorder %v2816_v46, 0.640625  ;;  %vm2070_vm15 = vcmp.gt.f32.partialorder %v2813_v45, 0.859375 }
  0x8d   :  { %v2006_v40 = vsel %vm1942_vm12, 0.72265625, %v1878_v34  ;;  %v2008_v48 = vsel %vm1944_vm8, 0.72265625, %v1880_v39  ;;  %vm2072_vm0 = vcmp.gt.f32.partialorder %v2816_v46, 0.859375  ;;  %v2973_v49 = vmul.f32 %v2782_v35, %v73_v28 }
  0x8e   :  { %v2134_v51 = vsel %vm2070_vm15, 1.0, %v2006_v40  ;;  %v2136_v52 = vsel %vm2072_vm0, 1.0, %v2008_v48  ;;  %v2976_v54 = vmul.f32 %v2782_v35, %v75_v32  ;;  %v2979_v55 = vmul.f32 %v2780_v31, %v72_v33 }
  0x8f   :  { %v2263_v57 = vmul.f32 %v2792_v38, %v2134_v51  ;;  %v2265_v58 = vmul.f32 %v2792_v38, %v2136_v52  ;;  %vm283_vm9 = vcmp.gt.f32.partialorder %v2973_v49, -0.84765625  ;;  %vm411_vm10 = vcmp.gt.f32.partialorder %v2973_v49, -0.609375 }
  0x90   :  { %vm285_vm13 = vcmp.gt.f32.partialorder %v2976_v54, -0.84765625  ;;  %v347_v45 = vsel %vm283_vm9, -0.6953125, %v2685_v47  ;;  %vm413_vm14 = vcmp.gt.f32.partialorder %v2976_v54, -0.609375  ;;  %vm539_vm1 = vcmp.gt.f32.partialorder %v2973_v49, -0.45898438 }
  0x91   :  { %v2471_v46 = vpack.c.bf16 %v2265_v58, %v2263_v57  ;;  %v349_v60 = vsel %vm285_vm13, -0.6953125, %v2685_v47  ;;  %v475_v61 = vsel %vm411_vm10, -0.5234375, %v347_v45  ;;  %vm541_vm2 = vcmp.gt.f32.partialorder %v2976_v54, -0.45898438 }
  0x92   :  { %v477_v63 = vsel %vm413_vm14, -0.5234375, %v349_v60  ;;  %v603_v0 = vsel %vm539_vm1, -0.39453125, %v475_v61  ;;  %vm667_vm3 = vcmp.gt.f32.partialorder %v2973_v49, -0.33984375  ;;  %vm669_vm4 = vcmp.gt.f32.partialorder %v2976_v54, -0.33984375 }
  0x93   :  { %2546 = vmatpush1.bf16.msra.mxu1 %v2471_v46  ;;  %2472 = vmatpush1.bf16.msra.mxu0 %v2471_v46  ;;  %v605_v2 = vsel %vm541_vm2, -0.39453125, %v477_v63  ;;  %v731_v3 = vsel %vm667_vm3, -0.28515625, %v603_v0  ;;  %vm795_vm5 = vcmp.gt.f32.partialorder %v2973_v49, -0.234375  ;;  %vm797_vm6 = vcmp.gt.f32.partialorder %v2976_v54, -0.234375 }
  0x94   :  { %v733_v4 = vsel %vm669_vm4, -0.28515625, %v605_v2  ;;  %v859_v6 = vsel %vm795_vm5, -0.18457031, %v731_v3  ;;  %vm923_vm7 = vcmp.gt.f32.partialorder %v2973_v49, -0.13769531  ;;  %vm925_vm11 = vcmp.gt.f32.partialorder %v2976_v54, -0.13769531 }
  0x95   :  { %v861_v43 = vsel %vm797_vm6, -0.18457031, %v733_v4  ;;  %v987_v44 = vsel %vm923_vm7, -0.09082031, %v859_v6  ;;  %vm1051_vm12 = vcmp.gt.f32.partialorder %v2973_v49, -0.045410156  ;;  %vm1053_vm8 = vcmp.gt.f32.partialorder %v2976_v54, -0.045410156 }
  0x96   :  { %v989_v7 = vsel %vm925_vm11, -0.09082031, %v861_v43  ;;  %v1115_v8 = vsel %vm1051_vm12, 0.0, %v987_v44  ;;  %vm1179_vm15 = vcmp.gt.f32.partialorder %v2973_v49, 0.039794922  ;;  %vm1181_vm0 = vcmp.gt.f32.partialorder %v2976_v54, 0.039794922 }
  0x97   :  { %v1117_v11 = vsel %vm1053_vm8, 0.0, %v989_v7  ;;  %v1243_v12 = vsel %vm1179_vm15, 0.079589844, %v1115_v8  ;;  %vm1307_vm9 = vcmp.gt.f32.partialorder %v2973_v49, 0.12011719  ;;  %vm1309_vm10 = vcmp.gt.f32.partialorder %v2976_v54, 0.12011719  ;;  %v77_v8 = vld [vmem:[#allocation6 + $0x68] sm:$0xff] }
  0x98   :  { %v1245_v13 = vsel %vm1181_vm0, 0.079589844, %v1117_v11  ;;  %v1371_v14 = vsel %vm1307_vm9, 0.16113281, %v1243_v12  ;;  %vm1435_vm13 = vcmp.gt.f32.partialorder %v2973_v49, 0.203125  ;;  %vm1437_vm14 = vcmp.gt.f32.partialorder %v2976_v54, 0.203125  ;;  %v79_v11 = vld [vmem:[#allocation6 + $0x78] sm:$0xff] }
  0x99   :  { %v1373_v15 = vsel %vm1309_vm10, 0.16113281, %v1245_v13  ;;  %v1499_v16 = vsel %vm1435_vm13, 0.24609375, %v1371_v14  ;;  %vm1563_vm1 = vcmp.gt.f32.partialorder %v2973_v49, 0.29296875  ;;  %vm1565_vm2 = vcmp.gt.f32.partialorder %v2976_v54, 0.29296875  ;;  %v76_v14 = vld [vmem:[#allocation6 + $0x60] sm:$0xff] }
  0x9a   :  { %v1501_v17 = vsel %vm1437_vm14, 0.24609375, %v1373_v15  ;;  %v1627_v18 = vsel %vm1563_vm1, 0.33789063, %v1499_v16  ;;  %vm1691_vm3 = vcmp.gt.f32.partialorder %v2973_v49, 0.390625  ;;  %vm1693_vm4 = vcmp.gt.f32.partialorder %v2976_v54, 0.390625  ;;  %v78_v15 = vld [vmem:[#allocation6 + $0x70] sm:$0xff] }
  0x9b   :  { %v1629_v41 = vsel %vm1565_vm2, 0.33789063, %v1501_v17  ;;  %v1755_v42 = vsel %vm1691_vm3, 0.44140625, %v1627_v18  ;;  %vm1819_vm5 = vcmp.gt.f32.partialorder %v2973_v49, 0.5  ;;  %vm1821_vm6 = vcmp.gt.f32.partialorder %v2976_v54, 0.5 }
  0x9c   :  { %v1757_v21 = vsel %vm1693_vm4, 0.44140625, %v1629_v41  ;;  %v1883_v22 = vsel %vm1819_vm5, 0.5625, %v1755_v42  ;;  %vm1947_vm7 = vcmp.gt.f32.partialorder %v2973_v49, 0.640625  ;;  %vm1949_vm11 = vcmp.gt.f32.partialorder %v2976_v54, 0.640625 }
  0x9d   :  { %v1885_v23 = vsel %vm1821_vm6, 0.5625, %v1757_v21  ;;  %v2011_v24 = vsel %vm1947_vm7, 0.72265625, %v1883_v22  ;;  %vm2075_vm12 = vcmp.gt.f32.partialorder %v2973_v49, 0.859375  ;;  %vm2077_vm8 = vcmp.gt.f32.partialorder %v2976_v54, 0.859375 }
  0x9e   :  { %v2013_v26 = vsel %vm1949_vm11, 0.72265625, %v1885_v23  ;;  %v2139_v27 = vsel %vm2075_vm12, 1.0, %v2011_v24  ;;  %v3016_v28 = vmul.f32 %v2780_v31, %v74_v19  ;;  %vm282_vm15 = vcmp.gt.f32.partialorder %v2979_v55, -0.84765625 }
  0x9f   :  { %v2141_v29 = vsel %vm2077_vm8, 1.0, %v2013_v26  ;;  %v2268_v30 = vmul.f32 %v2788_v37, %v2139_v27  ;;  %v346_v32 = vsel %vm282_vm15, -0.6953125, %v2685_v47  ;;  %vm410_vm0 = vcmp.gt.f32.partialorder %v2979_v55, -0.609375 }
  0xa0   :  { %v2270_v33 = vmul.f32 %v2788_v37, %v2141_v29  ;;  %vm284_vm9 = vcmp.gt.f32.partialorder %v3016_v28, -0.84765625  ;;  %vm412_vm10 = vcmp.gt.f32.partialorder %v3016_v28, -0.609375  ;;  %v474_v34 = vsel %vm410_vm0, -0.5234375, %v346_v32 }
  0xa1   :  { %v348_v39 = vsel %vm284_vm9, -0.6953125, %v2685_v47  ;;  %vm538_vm13 = vcmp.gt.f32.partialorder %v2979_v55, -0.45898438  ;;  %vm540_vm14 = vcmp.gt.f32.partialorder %v3016_v28, -0.45898438  ;;  %vm666_vm1 = vcmp.gt.f32.partialorder %v2979_v55, -0.33984375 }
  0xa2   :  { %v2473_v40 = vpack.c.bf16 %v2270_v33, %v2268_v30  ;;  %v476_v48 = vsel %vm412_vm10, -0.5234375, %v348_v39  ;;  %v602_v49 = vsel %vm538_vm13, -0.39453125, %v474_v34  ;;  %vm668_vm2 = vcmp.gt.f32.partialorder %v3016_v28, -0.33984375 }
  0xa3   :  { %v604_v51 = vsel %vm540_vm14, -0.39453125, %v476_v48  ;;  %v730_v52 = vsel %vm666_vm1, -0.28515625, %v602_v49  ;;  %vm794_vm3 = vcmp.gt.f32.partialorder %v2979_v55, -0.234375  ;;  %vm796_vm4 = vcmp.gt.f32.partialorder %v3016_v28, -0.234375 }
  0xa4   :  { %2531 = vmatprep.subr.bf16.mxu1 %v2473_v40  ;;  %v732_v54 = vsel %vm668_vm2, -0.28515625, %v604_v51  ;;  %v858_v57 = vsel %vm794_vm3, -0.18457031, %v730_v52  ;;  %vm922_vm5 = vcmp.gt.f32.partialorder %v2979_v55, -0.13769531  ;;  %vm924_vm6 = vcmp.gt.f32.partialorder %v3016_v28, -0.13769531  ;;  %2474 = vmatprep.subr.bf16.mxu0 %v2473_v40 }
  0xa5   :  { %v860_v58 = vsel %vm796_vm4, -0.18457031, %v732_v54  ;;  %v986_v45 = vsel %vm922_vm5, -0.09082031, %v858_v57  ;;  %vm1050_vm7 = vcmp.gt.f32.partialorder %v2979_v55, -0.045410156  ;;  %vm1052_vm11 = vcmp.gt.f32.partialorder %v3016_v28, -0.045410156 }
  0xa6   :  { %v988_v46 = vsel %vm924_vm6, -0.09082031, %v860_v58  ;;  %v1114_v60 = vsel %vm1050_vm7, 0.0, %v986_v45  ;;  %vm1178_vm12 = vcmp.gt.f32.partialorder %v2979_v55, 0.039794922  ;;  %vm1180_vm8 = vcmp.gt.f32.partialorder %v3016_v28, 0.039794922 }
  0xa7   :  { %v1116_v61 = vsel %vm1052_vm11, 0.0, %v988_v46  ;;  %v1242_v63 = vsel %vm1178_vm12, 0.079589844, %v1114_v60  ;;  %vm1306_vm15 = vcmp.gt.f32.partialorder %v2979_v55, 0.12011719  ;;  %vm1308_vm0 = vcmp.gt.f32.partialorder %v3016_v28, 0.12011719 }
  0xa8   :  { %v1244_v0 = vsel %vm1180_vm8, 0.079589844, %v1116_v61  ;;  %v1370_v2 = vsel %vm1306_vm15, 0.16113281, %v1242_v63  ;;  %vm1434_vm9 = vcmp.gt.f32.partialorder %v2979_v55, 0.203125  ;;  %vm1436_vm10 = vcmp.gt.f32.partialorder %v3016_v28, 0.203125 }
  0xa9   :  { %v1372_v3 = vsel %vm1308_vm0, 0.16113281, %v1244_v0  ;;  %v1498_v4 = vsel %vm1434_vm9, 0.24609375, %v1370_v2  ;;  %vm1562_vm13 = vcmp.gt.f32.partialorder %v2979_v55, 0.29296875  ;;  %vm1564_vm14 = vcmp.gt.f32.partialorder %v3016_v28, 0.29296875 }
  0xaa   :  { %v1500_v6 = vsel %vm1436_vm10, 0.24609375, %v1372_v3  ;;  %v1626_v43 = vsel %vm1562_vm13, 0.33789063, %v1498_v4  ;;  %vm1690_vm1 = vcmp.gt.f32.partialorder %v2979_v55, 0.390625  ;;  %vm1692_vm2 = vcmp.gt.f32.partialorder %v3016_v28, 0.390625 }
  0xab   :  { %v1628_v44 = vsel %vm1564_vm14, 0.33789063, %v1500_v6  ;;  %v1754_v7 = vsel %vm1690_vm1, 0.44140625, %v1626_v43  ;;  %vm1818_vm3 = vcmp.gt.f32.partialorder %v2979_v55, 0.5  ;;  %vm1820_vm4 = vcmp.gt.f32.partialorder %v3016_v28, 0.5 }
  0xac   :  { %v1756_v12 = vsel %vm1692_vm2, 0.44140625, %v1628_v44  ;;  %v1882_v13 = vsel %vm1818_vm3, 0.5625, %v1754_v7  ;;  %vm1946_vm5 = vcmp.gt.f32.partialorder %v2979_v55, 0.640625  ;;  %vm1948_vm6 = vcmp.gt.f32.partialorder %v3016_v28, 0.640625 }
  0xad   :  { %v1884_v16 = vsel %vm1820_vm4, 0.5625, %v1756_v12  ;;  %v2010_v17 = vsel %vm1946_vm5, 0.72265625, %v1882_v13  ;;  %vm2074_vm7 = vcmp.gt.f32.partialorder %v2979_v55, 0.859375  ;;  %vm2076_vm11 = vcmp.gt.f32.partialorder %v3016_v28, 0.859375 }
  0xae   :  { %v2012_v18 = vsel %vm1948_vm6, 0.72265625, %v1884_v16  ;;  %v2138_v41 = vsel %vm2074_vm7, 1.0, %v2010_v17  ;;  %v3053_v42 = vmul.f32 %v2782_v35, %v77_v8  ;;  %v3056_v19 = vmul.f32 %v2782_v35, %v79_v11 }
  0xaf   :  { %v2140_v21 = vsel %vm2076_vm11, 1.0, %v2012_v18  ;;  %v2267_v22 = vmul.f32 %v2792_v38, %v2138_v41  ;;  %v3060_v23 = vmul.f32 %v2780_v31, %v76_v14  ;;  %v3063_v24 = vmul.f32 %v2780_v31, %v78_v15 }
  0xb0   :  { %v2269_v55 = vmul.f32 %v2792_v38, %v2140_v21  ;;  %vm287_vm12 = vcmp.gt.f32.partialorder %v3053_v42, -0.84765625  ;;  %vm289_vm8 = vcmp.gt.f32.partialorder %v3056_v19, -0.84765625  ;;  %vm415_vm15 = vcmp.gt.f32.partialorder %v3053_v42, -0.609375 }
  0xb1   :  { %v351_v35 = vsel %vm287_vm12, -0.6953125, %v2685_v47  ;;  %v353_v26 = vsel %vm289_vm8, -0.6953125, %v2685_v47  ;;  %vm417_vm0 = vcmp.gt.f32.partialorder %v3056_v19, -0.609375  ;;  %vm543_vm9 = vcmp.gt.f32.partialorder %v3053_v42, -0.45898438 }
  0xb2   :  { %v2475_v27 = vpack.c.bf16 %v2269_v55, %v2267_v22  ;;  %v479_v28 = vsel %vm415_vm15, -0.5234375, %v351_v35  ;;  %v481_v31 = vsel %vm417_vm0, -0.5234375, %v353_v26  ;;  %vm545_vm10 = vcmp.gt.f32.partialorder %v3056_v19, -0.45898438 }
  0xb3   :  { %v607_v29 = vsel %vm543_vm9, -0.39453125, %v479_v28  ;;  %v609_v30 = vsel %vm545_vm10, -0.39453125, %v481_v31  ;;  %vm671_vm13 = vcmp.gt.f32.partialorder %v3053_v42, -0.33984375  ;;  %vm673_vm14 = vcmp.gt.f32.partialorder %v3056_v19, -0.33984375 }
  0xb4   :  { %2547 = vmatpush1.bf16.msra.mxu1 %v2475_v27  ;;  %2476 = vmatpush1.bf16.msra.mxu0 %v2475_v27  ;;  %v735_v32 = vsel %vm671_vm13, -0.28515625, %v607_v29  ;;  %v737_v33 = vsel %vm673_vm14, -0.28515625, %v609_v30  ;;  %vm799_vm1 = vcmp.gt.f32.partialorder %v3053_v42, -0.234375  ;;  %vm801_vm2 = vcmp.gt.f32.partialorder %v3056_v19, -0.234375 }
  0xb5   :  { %v863_v34 = vsel %vm799_vm1, -0.18457031, %v735_v32  ;;  %v865_v39 = vsel %vm801_vm2, -0.18457031, %v737_v33  ;;  %vm927_vm3 = vcmp.gt.f32.partialorder %v3053_v42, -0.13769531  ;;  %vm929_vm4 = vcmp.gt.f32.partialorder %v3056_v19, -0.13769531  ;;  %v81_v33 = vld [vmem:[#allocation6 + $0x88] sm:$0xff] }
  0xb6   :  { %v991_v40 = vsel %vm927_vm3, -0.09082031, %v863_v34  ;;  %v993_v48 = vsel %vm929_vm4, -0.09082031, %v865_v39  ;;  %vm1055_vm5 = vcmp.gt.f32.partialorder %v3053_v42, -0.045410156  ;;  %vm1057_vm6 = vcmp.gt.f32.partialorder %v3056_v19, -0.045410156 }
  0xb7   :  { %v1119_v49 = vsel %vm1055_vm5, 0.0, %v991_v40  ;;  %v1121_v51 = vsel %vm1057_vm6, 0.0, %v993_v48  ;;  %vm1183_vm7 = vcmp.gt.f32.partialorder %v3053_v42, 0.039794922  ;;  %vm1185_vm11 = vcmp.gt.f32.partialorder %v3056_v19, 0.039794922  ;;  %v83_v40 = vld [vmem:[#allocation6 + $0x98] sm:$0xff] }
  0xb8   :  { %v1247_v52 = vsel %vm1183_vm7, 0.079589844, %v1119_v49  ;;  %v1249_v54 = vsel %vm1185_vm11, 0.079589844, %v1121_v51  ;;  %vm1311_vm12 = vcmp.gt.f32.partialorder %v3053_v42, 0.12011719  ;;  %vm1313_vm8 = vcmp.gt.f32.partialorder %v3056_v19, 0.12011719 }
  0xb9   :  { %v1375_v57 = vsel %vm1311_vm12, 0.16113281, %v1247_v52  ;;  %v1377_v58 = vsel %vm1313_vm8, 0.16113281, %v1249_v54  ;;  %vm1439_vm15 = vcmp.gt.f32.partialorder %v3053_v42, 0.203125  ;;  %vm1441_vm0 = vcmp.gt.f32.partialorder %v3056_v19, 0.203125 }
  0xba   :  { %v1503_v45 = vsel %vm1439_vm15, 0.24609375, %v1375_v57  ;;  %v1505_v46 = vsel %vm1441_vm0, 0.24609375, %v1377_v58  ;;  %vm1567_vm9 = vcmp.gt.f32.partialorder %v3053_v42, 0.29296875  ;;  %vm1569_vm10 = vcmp.gt.f32.partialorder %v3056_v19, 0.29296875 }
  0xbb   :  { %v1631_v60 = vsel %vm1567_vm9, 0.33789063, %v1503_v45  ;;  %v1633_v61 = vsel %vm1569_vm10, 0.33789063, %v1505_v46  ;;  %vm1695_vm13 = vcmp.gt.f32.partialorder %v3053_v42, 0.390625  ;;  %vm1697_vm14 = vcmp.gt.f32.partialorder %v3056_v19, 0.390625 }
  0xbc   :  { %v1759_v63 = vsel %vm1695_vm13, 0.44140625, %v1631_v60  ;;  %v1761_v0 = vsel %vm1697_vm14, 0.44140625, %v1633_v61  ;;  %vm1823_vm1 = vcmp.gt.f32.partialorder %v3053_v42, 0.5  ;;  %vm1825_vm2 = vcmp.gt.f32.partialorder %v3056_v19, 0.5 }
  0xbd   :  { %v1887_v2 = vsel %vm1823_vm1, 0.5625, %v1759_v63  ;;  %v1889_v3 = vsel %vm1825_vm2, 0.5625, %v1761_v0  ;;  %vm1951_vm3 = vcmp.gt.f32.partialorder %v3053_v42, 0.640625  ;;  %vm1953_vm4 = vcmp.gt.f32.partialorder %v3056_v19, 0.640625 }
  0xbe   :  { %v2015_v4 = vsel %vm1951_vm3, 0.72265625, %v1887_v2  ;;  %v2017_v6 = vsel %vm1953_vm4, 0.72265625, %v1889_v3  ;;  %vm2079_vm5 = vcmp.gt.f32.partialorder %v3053_v42, 0.859375  ;;  %vm2081_vm6 = vcmp.gt.f32.partialorder %v3056_v19, 0.859375 }
  0xbf   :  { %v2143_v43 = vsel %vm2079_vm5, 1.0, %v2015_v4  ;;  %v2145_v44 = vsel %vm2081_vm6, 1.0, %v2017_v6  ;;  %vm286_vm7 = vcmp.gt.f32.partialorder %v3060_v23, -0.84765625  ;;  %vm288_vm11 = vcmp.gt.f32.partialorder %v3063_v24, -0.84765625 }
  0xc0   :  { %v2272_v7 = vmul.f32 %v2788_v37, %v2143_v43  ;;  %v2274_v8 = vmul.f32 %v2788_v37, %v2145_v44  ;;  %v350_v11 = vsel %vm286_vm7, -0.6953125, %v2685_v47  ;;  %v352_v12 = vsel %vm288_vm11, -0.6953125, %v2685_v47 }
  0xc1   :  { %vm414_vm12 = vcmp.gt.f32.partialorder %v3060_v23, -0.609375  ;;  %vm416_vm8 = vcmp.gt.f32.partialorder %v3063_v24, -0.609375  ;;  %vm542_vm15 = vcmp.gt.f32.partialorder %v3060_v23, -0.45898438  ;;  %vm544_vm0 = vcmp.gt.f32.partialorder %v3063_v24, -0.45898438 }
  0xc2   :  { %v2477_v13 = vpack.c.bf16 %v2274_v8, %v2272_v7  ;;  %v478_v14 = vsel %vm414_vm12, -0.5234375, %v350_v11  ;;  %v480_v15 = vsel %vm416_vm8, -0.5234375, %v352_v12  ;;  %vm670_vm9 = vcmp.gt.f32.partialorder %v3060_v23, -0.33984375 }
  0xc3   :  { %v606_v16 = vsel %vm542_vm15, -0.39453125, %v478_v14  ;;  %v608_v17 = vsel %vm544_vm0, -0.39453125, %v480_v15  ;;  %vm672_vm10 = vcmp.gt.f32.partialorder %v3063_v24, -0.33984375  ;;  %vm798_vm13 = vcmp.gt.f32.partialorder %v3060_v23, -0.234375 }
  0xc4   :  { %2532 = vmatprep.subr.bf16.mxu1 %v2477_v13  ;;  %v734_v37 = vsel %vm670_vm9, -0.28515625, %v606_v16  ;;  %v736_v18 = vsel %vm672_vm10, -0.28515625, %v608_v17  ;;  %vm800_vm14 = vcmp.gt.f32.partialorder %v3063_v24, -0.234375  ;;  %vm926_vm1 = vcmp.gt.f32.partialorder %v3060_v23, -0.13769531  ;;  %2478 = vmatprep.subr.bf16.mxu0 %v2477_v13 }
  0xc5   :  { %v862_v41 = vsel %vm798_vm13, -0.18457031, %v734_v37  ;;  %v864_v42 = vsel %vm800_vm14, -0.18457031, %v736_v18  ;;  %vm928_vm2 = vcmp.gt.f32.partialorder %v3063_v24, -0.13769531  ;;  %vm1054_vm3 = vcmp.gt.f32.partialorder %v3060_v23, -0.045410156  ;;  %v80_v18 = vld [vmem:[#allocation6 + $0x80] sm:$0xff] }
  0xc6   :  { %v990_v19 = vsel %vm926_vm1, -0.09082031, %v862_v41  ;;  %v992_v21 = vsel %vm928_vm2, -0.09082031, %v864_v42  ;;  %vm1056_vm4 = vcmp.gt.f32.partialorder %v3063_v24, -0.045410156  ;;  %vm1182_vm5 = vcmp.gt.f32.partialorder %v3060_v23, 0.039794922 }
  0xc7   :  { %v1118_v22 = vsel %vm1054_vm3, 0.0, %v990_v19  ;;  %v1120_v55 = vsel %vm1056_vm4, 0.0, %v992_v21  ;;  %vm1184_vm6 = vcmp.gt.f32.partialorder %v3063_v24, 0.039794922  ;;  %vm1310_vm7 = vcmp.gt.f32.partialorder %v3060_v23, 0.12011719  ;;  %v82_v19 = vld [vmem:[#allocation6 + $0x90] sm:$0xff]  ;;  %v85_v21 = vld [vmem:[#allocation6 + $0xa8] sm:$0xff] }
  0xc8   :  { %v1246_v35 = vsel %vm1182_vm5, 0.079589844, %v1118_v22  ;;  %v1248_v26 = vsel %vm1184_vm6, 0.079589844, %v1120_v55  ;;  %vm1312_vm11 = vcmp.gt.f32.partialorder %v3063_v24, 0.12011719  ;;  %vm1438_vm12 = vcmp.gt.f32.partialorder %v3060_v23, 0.203125 }
  0xc9   :  { %v1374_v27 = vsel %vm1310_vm7, 0.16113281, %v1246_v35  ;;  %v1376_v28 = vsel %vm1312_vm11, 0.16113281, %v1248_v26  ;;  %vm1440_vm8 = vcmp.gt.f32.partialorder %v3063_v24, 0.203125  ;;  %vm1566_vm15 = vcmp.gt.f32.partialorder %v3060_v23, 0.29296875 }
  0xca   :  { %v1502_v31 = vsel %vm1438_vm12, 0.24609375, %v1374_v27  ;;  %v1504_v29 = vsel %vm1440_vm8, 0.24609375, %v1376_v28  ;;  %vm1568_vm0 = vcmp.gt.f32.partialorder %v3063_v24, 0.29296875  ;;  %vm1694_vm9 = vcmp.gt.f32.partialorder %v3060_v23, 0.390625 }
  0xcb   :  { %v1630_v30 = vsel %vm1566_vm15, 0.33789063, %v1502_v31  ;;  %v1632_v32 = vsel %vm1568_vm0, 0.33789063, %v1504_v29  ;;  %vm1696_vm10 = vcmp.gt.f32.partialorder %v3063_v24, 0.390625  ;;  %vm1822_vm13 = vcmp.gt.f32.partialorder %v3060_v23, 0.5 }
  0xcc   :  { %v1758_v34 = vsel %vm1694_vm9, 0.44140625, %v1630_v30  ;;  %v1760_v39 = vsel %vm1696_vm10, 0.44140625, %v1632_v32  ;;  %vm1824_vm14 = vcmp.gt.f32.partialorder %v3063_v24, 0.5  ;;  %vm1950_vm1 = vcmp.gt.f32.partialorder %v3060_v23, 0.640625 }
  0xcd   :  { %v1886_v48 = vsel %vm1822_vm13, 0.5625, %v1758_v34  ;;  %v1888_v49 = vsel %vm1824_vm14, 0.5625, %v1760_v39  ;;  %vm1952_vm2 = vcmp.gt.f32.partialorder %v3063_v24, 0.640625  ;;  %vm2078_vm3 = vcmp.gt.f32.partialorder %v3060_v23, 0.859375 }
  0xce   :  { %v2014_v51 = vsel %vm1950_vm1, 0.72265625, %v1886_v48  ;;  %v2016_v52 = vsel %vm1952_vm2, 0.72265625, %v1888_v49  ;;  %vm2080_vm4 = vcmp.gt.f32.partialorder %v3063_v24, 0.859375  ;;  %v3133_v54 = vmul.f32 %v2830_v53, %v81_v33 }
  0xcf   :  { %v2142_v57 = vsel %vm2078_vm3, 1.0, %v2014_v51  ;;  %v2144_v58 = vsel %vm2080_vm4, 1.0, %v2016_v52  ;;  %v3136_v45 = vmul.f32 %v2830_v53, %v83_v40  ;;  %v3142_v46 = vrot.slane %v2202_v36, %v2756_v5 }
  0xd0   :  { %v2271_v23 = vmul.f32 %v2792_v38, %v2142_v57  ;;  %v2273_v60 = vmul.f32 %v2792_v38, %v2144_v58  ;;  %vm291_vm5 = vcmp.gt.f32.partialorder %v3133_v54, -0.84765625  ;;  %vm419_vm6 = vcmp.gt.f32.partialorder %v3133_v54, -0.609375 }
  0xd1   :  { %vm293_vm7 = vcmp.gt.f32.partialorder %v3136_v45, -0.84765625  ;;  %v355_v24 = vsel %vm291_vm5, -0.6953125, %v2685_v47  ;;  %vm421_vm11 = vcmp.gt.f32.partialorder %v3136_v45, -0.609375  ;;  %vm547_vm12 = vcmp.gt.f32.partialorder %v3133_v54, -0.45898438 }
  0xd2   :  { %v2479_v61 = vpack.c.bf16 %v2273_v60, %v2271_v23  ;;  %v357_v5 = vsel %vm293_vm7, -0.6953125, %v2685_v47  ;;  %v483_v20 = vsel %vm419_vm6, -0.5234375, %v355_v24  ;;  %vm549_vm8 = vcmp.gt.f32.partialorder %v3136_v45, -0.45898438 }
  0xd3   :  { %v485_v36 = vsel %vm421_vm11, -0.5234375, %v357_v5  ;;  %v611_v38 = vsel %vm547_vm12, -0.39453125, %v483_v20  ;;  %vm675_vm15 = vcmp.gt.f32.partialorder %v3133_v54, -0.33984375  ;;  %vm677_vm0 = vcmp.gt.f32.partialorder %v3136_v45, -0.33984375 }
  0xd4   :  { %2548 = vmatpush1.bf16.msra.mxu1 %v2479_v61  ;;  %2480 = vmatpush1.bf16.msra.mxu0 %v2479_v61  ;;  %v613_v63 = vsel %vm549_vm8, -0.39453125, %v485_v36  ;;  %v739_v0 = vsel %vm675_vm15, -0.28515625, %v611_v38  ;;  %vm803_vm9 = vcmp.gt.f32.partialorder %v3133_v54, -0.234375  ;;  %vm805_vm10 = vcmp.gt.f32.partialorder %v3136_v45, -0.234375 }
  0xd5   :  { %v741_v2 = vsel %vm677_vm0, -0.28515625, %v613_v63  ;;  %v867_v3 = vsel %vm803_vm9, -0.18457031, %v739_v0  ;;  %vm931_vm13 = vcmp.gt.f32.partialorder %v3133_v54, -0.13769531  ;;  %vm933_vm14 = vcmp.gt.f32.partialorder %v3136_v45, -0.13769531 }
  0xd6   :  { %v869_v4 = vsel %vm805_vm10, -0.18457031, %v741_v2  ;;  %v995_v6 = vsel %vm931_vm13, -0.09082031, %v867_v3  ;;  %vm1059_vm1 = vcmp.gt.f32.partialorder %v3133_v54, -0.045410156  ;;  %vm1061_vm2 = vcmp.gt.f32.partialorder %v3136_v45, -0.045410156 }
  0xd7   :  { %v997_v43 = vsel %vm933_vm14, -0.09082031, %v869_v4  ;;  %v1123_v44 = vsel %vm1059_vm1, 0.0, %v995_v6  ;;  %vm1187_vm3 = vcmp.gt.f32.partialorder %v3133_v54, 0.039794922  ;;  %vm1189_vm4 = vcmp.gt.f32.partialorder %v3136_v45, 0.039794922 }
  0xd8   :  { %v1125_v7 = vsel %vm1061_vm2, 0.0, %v997_v43  ;;  %v1251_v8 = vsel %vm1187_vm3, 0.079589844, %v1123_v44  ;;  %vm1315_vm5 = vcmp.gt.f32.partialorder %v3133_v54, 0.12011719  ;;  %vm1317_vm6 = vcmp.gt.f32.partialorder %v3136_v45, 0.12011719  ;;  %v87_v43 = vld [vmem:[#allocation6 + $0xb8] sm:$0xff] }
  0xd9   :  { %v1253_v11 = vsel %vm1189_vm4, 0.079589844, %v1125_v7  ;;  %v1379_v12 = vsel %vm1315_vm5, 0.16113281, %v1251_v8  ;;  %vm1443_vm7 = vcmp.gt.f32.partialorder %v3133_v54, 0.203125  ;;  %vm1445_vm11 = vcmp.gt.f32.partialorder %v3136_v45, 0.203125 }
  0xda   :  { %v1381_v13 = vsel %vm1317_vm6, 0.16113281, %v1253_v11  ;;  %v1507_v14 = vsel %vm1443_vm7, 0.24609375, %v1379_v12  ;;  %vm1571_vm12 = vcmp.gt.f32.partialorder %v3133_v54, 0.29296875  ;;  %vm1573_vm8 = vcmp.gt.f32.partialorder %v3136_v45, 0.29296875 }
  0xdb   :  { %v1509_v15 = vsel %vm1445_vm11, 0.24609375, %v1381_v13  ;;  %v1635_v16 = vsel %vm1571_vm12, 0.33789063, %v1507_v14  ;;  %vm1699_vm15 = vcmp.gt.f32.partialorder %v3133_v54, 0.390625  ;;  %vm1701_vm0 = vcmp.gt.f32.partialorder %v3136_v45, 0.390625 }
  0xdc   :  { %v1637_v17 = vsel %vm1573_vm8, 0.33789063, %v1509_v15  ;;  %v1763_v37 = vsel %vm1699_vm15, 0.44140625, %v1635_v16  ;;  %vm1827_vm9 = vcmp.gt.f32.partialorder %v3133_v54, 0.5  ;;  %vm1829_vm10 = vcmp.gt.f32.partialorder %v3136_v45, 0.5 }
  0xdd   :  { %v1765_v41 = vsel %vm1701_vm0, 0.44140625, %v1637_v17  ;;  %v1891_v42 = vsel %vm1827_vm9, 0.5625, %v1763_v37  ;;  %vm1955_vm13 = vcmp.gt.f32.partialorder %v3133_v54, 0.640625  ;;  %vm1957_vm14 = vcmp.gt.f32.partialorder %v3136_v45, 0.640625 }
  0xde   :  { %v1893_v22 = vsel %vm1829_vm10, 0.5625, %v1765_v41  ;;  %v2019_v55 = vsel %vm1955_vm13, 0.72265625, %v1891_v42  ;;  %vm2083_vm1 = vcmp.gt.f32.partialorder %v3133_v54, 0.859375  ;;  %vm2085_vm2 = vcmp.gt.f32.partialorder %v3136_v45, 0.859375 }
  0xdf   :  { %v2021_v35 = vsel %vm1957_vm14, 0.72265625, %v1893_v22  ;;  %v2147_v26 = vsel %vm2083_vm1, 1.0, %v2019_v55  ;;  %v3180_v27 = vrot.slane %v3142_v46, %v2761_v10  ;;  %v3183_v28 = vmul.f32 %v2826_v50, %v80_v18 }
  0xe0   :  { %v2149_v31 = vsel %vm2085_vm2, 1.0, %v2021_v35  ;;  %v3186_v29 = vmul.f32 %v2826_v50, %v82_v19  ;;  %v3190_v30 = vrot.slane %v3142_v46, %v2759_v9  ;;  %v3193_v32 = vmul.f32 %v2830_v53, %v85_v21 }
  0xe1   :  { %v2276_v33 = vmul.f32 %v3180_v27, %v2147_v26  ;;  %v2278_v34 = vmul.f32 %v3180_v27, %v2149_v31  ;;  %vm290_vm3 = vcmp.gt.f32.partialorder %v3183_v28, -0.84765625  ;;  %vm418_vm4 = vcmp.gt.f32.partialorder %v3183_v28, -0.609375 }
  0xe2   :  { %vm292_vm5 = vcmp.gt.f32.partialorder %v3186_v29, -0.84765625  ;;  %v354_v39 = vsel %vm290_vm3, -0.6953125, %v2685_v47  ;;  %vm420_vm6 = vcmp.gt.f32.partialorder %v3186_v29, -0.609375  ;;  %vm546_vm7 = vcmp.gt.f32.partialorder %v3183_v28, -0.45898438 }
  0xe3   :  { %v2481_v40 = vpack.c.bf16 %v2278_v34, %v2276_v33  ;;  %v356_v48 = vsel %vm292_vm5, -0.6953125, %v2685_v47  ;;  %v482_v49 = vsel %vm418_vm4, -0.5234375, %v354_v39  ;;  %vm548_vm11 = vcmp.gt.f32.partialorder %v3186_v29, -0.45898438 }
  0xe4   :  { %v484_v51 = vsel %vm420_vm6, -0.5234375, %v356_v48  ;;  %v610_v52 = vsel %vm546_vm7, -0.39453125, %v482_v49  ;;  %vm674_vm12 = vcmp.gt.f32.partialorder %v3183_v28, -0.33984375  ;;  %vm676_vm8 = vcmp.gt.f32.partialorder %v3186_v29, -0.33984375 }
  0xe5   :  { %2533 = vmatprep.subr.bf16.mxu1 %v2481_v40  ;;  %v612_v54 = vsel %vm548_vm11, -0.39453125, %v484_v51  ;;  %v738_v57 = vsel %vm674_vm12, -0.28515625, %v610_v52  ;;  %vm802_vm15 = vcmp.gt.f32.partialorder %v3183_v28, -0.234375  ;;  %vm804_vm0 = vcmp.gt.f32.partialorder %v3186_v29, -0.234375  ;;  %2482 = vmatprep.subr.bf16.mxu0 %v2481_v40 }
  0xe6   :  { %v740_v58 = vsel %vm676_vm8, -0.28515625, %v612_v54  ;;  %v866_v45 = vsel %vm802_vm15, -0.18457031, %v738_v57  ;;  %vm930_vm9 = vcmp.gt.f32.partialorder %v3183_v28, -0.13769531  ;;  %vm932_vm10 = vcmp.gt.f32.partialorder %v3186_v29, -0.13769531 }
  0xe7   :  { %v868_v23 = vsel %vm804_vm0, -0.18457031, %v740_v58  ;;  %v994_v60 = vsel %vm930_vm9, -0.09082031, %v866_v45  ;;  %vm1058_vm13 = vcmp.gt.f32.partialorder %v3183_v28, -0.045410156  ;;  %vm1060_vm14 = vcmp.gt.f32.partialorder %v3186_v29, -0.045410156  ;;  %v84_v45 = vld [vmem:[#allocation6 + $0xa0] sm:$0xff] }
  0xe8   :  { %v996_v24 = vsel %vm932_vm10, -0.09082031, %v868_v23  ;;  %v1122_v61 = vsel %vm1058_vm13, 0.0, %v994_v60  ;;  %vm1186_vm1 = vcmp.gt.f32.partialorder %v3183_v28, 0.039794922  ;;  %vm1188_vm2 = vcmp.gt.f32.partialorder %v3186_v29, 0.039794922  ;;  %v86_v23 = vld [vmem:[#allocation6 + $0xb0] sm:$0xff] }
  0xe9   :  { %v1124_v5 = vsel %vm1060_vm14, 0.0, %v996_v24  ;;  %v1250_v20 = vsel %vm1186_vm1, 0.079589844, %v1122_v61  ;;  %vm1314_vm3 = vcmp.gt.f32.partialorder %v3183_v28, 0.12011719  ;;  %vm1316_vm4 = vcmp.gt.f32.partialorder %v3186_v29, 0.12011719  ;;  %v89_v61 = vld [vmem:[#allocation6 + $0xc8] sm:$0xff] }
  0xea   :  { %v1252_v36 = vsel %vm1188_vm2, 0.079589844, %v1124_v5  ;;  %v1378_v38 = vsel %vm1314_vm3, 0.16113281, %v1250_v20  ;;  %vm1442_vm5 = vcmp.gt.f32.partialorder %v3183_v28, 0.203125  ;;  %vm1444_vm6 = vcmp.gt.f32.partialorder %v3186_v29, 0.203125  ;;  %v91_v5 = vld [vmem:[#allocation6 + $0xd8] sm:$0xff] }
  0xeb   :  { %v1380_v63 = vsel %vm1316_vm4, 0.16113281, %v1252_v36  ;;  %v1506_v0 = vsel %vm1442_vm5, 0.24609375, %v1378_v38  ;;  %vm1570_vm7 = vcmp.gt.f32.partialorder %v3183_v28, 0.29296875  ;;  %vm1572_vm11 = vcmp.gt.f32.partialorder %v3186_v29, 0.29296875 }
  0xec   :  { %v1508_v2 = vsel %vm1444_vm6, 0.24609375, %v1380_v63  ;;  %v1634_v3 = vsel %vm1570_vm7, 0.33789063, %v1506_v0  ;;  %vm1698_vm12 = vcmp.gt.f32.partialorder %v3183_v28, 0.390625  ;;  %vm1700_vm8 = vcmp.gt.f32.partialorder %v3186_v29, 0.390625 }
  0xed   :  { %v1636_v4 = vsel %vm1572_vm11, 0.33789063, %v1508_v2  ;;  %v1762_v6 = vsel %vm1698_vm12, 0.44140625, %v1634_v3  ;;  %vm1826_vm15 = vcmp.gt.f32.partialorder %v3183_v28, 0.5  ;;  %vm1828_vm0 = vcmp.gt.f32.partialorder %v3186_v29, 0.5 }
  0xee   :  { %v1764_v44 = vsel %vm1700_vm8, 0.44140625, %v1636_v4  ;;  %v1890_v7 = vsel %vm1826_vm15, 0.5625, %v1762_v6  ;;  %vm1954_vm9 = vcmp.gt.f32.partialorder %v3183_v28, 0.640625  ;;  %vm1956_vm10 = vcmp.gt.f32.partialorder %v3186_v29, 0.640625 }
  0xef   :  { %v1892_v8 = vsel %vm1828_vm0, 0.5625, %v1764_v44  ;;  %v2018_v11 = vsel %vm1954_vm9, 0.72265625, %v1890_v7  ;;  %vm2082_vm13 = vcmp.gt.f32.partialorder %v3183_v28, 0.859375  ;;  %vm2084_vm14 = vcmp.gt.f32.partialorder %v3186_v29, 0.859375 }
  0xf0   :  { %v2020_v12 = vsel %vm1956_vm10, 0.72265625, %v1892_v8  ;;  %v2146_v13 = vsel %vm2082_vm13, 1.0, %v2018_v11  ;;  %v3230_v14 = vmul.f32 %v2830_v53, %v87_v43  ;;  %vm295_vm1 = vcmp.gt.f32.partialorder %v3193_v32, -0.84765625 }
  0xf1   :  { %v2148_v15 = vsel %vm2084_vm14, 1.0, %v2020_v12  ;;  %v2275_v16 = vmul.f32 %v3190_v30, %v2146_v13  ;;  %v359_v17 = vsel %vm295_vm1, -0.6953125, %v2685_v47  ;;  %vm423_vm2 = vcmp.gt.f32.partialorder %v3193_v32, -0.609375 }
  0xf2   :  { %v2277_v37 = vmul.f32 %v3190_v30, %v2148_v15  ;;  %vm297_vm3 = vcmp.gt.f32.partialorder %v3230_v14, -0.84765625  ;;  %vm425_vm4 = vcmp.gt.f32.partialorder %v3230_v14, -0.609375  ;;  %v487_v18 = vsel %vm423_vm2, -0.5234375, %v359_v17 }
  0xf3   :  { %v361_v41 = vsel %vm297_vm3, -0.6953125, %v2685_v47  ;;  %vm551_vm5 = vcmp.gt.f32.partialorder %v3193_v32, -0.45898438  ;;  %vm553_vm6 = vcmp.gt.f32.partialorder %v3230_v14, -0.45898438  ;;  %vm679_vm7 = vcmp.gt.f32.partialorder %v3193_v32, -0.33984375 }
  0xf4   :  { %v2483_v42 = vpack.c.bf16 %v2277_v37, %v2275_v16  ;;  %v489_v19 = vsel %vm425_vm4, -0.5234375, %v361_v41  ;;  %v615_v21 = vsel %vm551_vm5, -0.39453125, %v487_v18  ;;  %vm681_vm11 = vcmp.gt.f32.partialorder %v3230_v14, -0.33984375 }
  0xf5   :  { %v617_v22 = vsel %vm553_vm6, -0.39453125, %v489_v19  ;;  %v743_v55 = vsel %vm679_vm7, -0.28515625, %v615_v21  ;;  %vm807_vm12 = vcmp.gt.f32.partialorder %v3193_v32, -0.234375  ;;  %vm809_vm8 = vcmp.gt.f32.partialorder %v3230_v14, -0.234375 }
  0xf6   :  { %2549 = vmatpush1.bf16.msra.mxu1 %v2483_v42  ;;  %2484 = vmatpush1.bf16.msra.mxu0 %v2483_v42  ;;  %v745_v35 = vsel %vm681_vm11, -0.28515625, %v617_v22  ;;  %v871_v26 = vsel %vm807_vm12, -0.18457031, %v743_v55  ;;  %vm935_vm15 = vcmp.gt.f32.partialorder %v3193_v32, -0.13769531  ;;  %vm937_vm0 = vcmp.gt.f32.partialorder %v3230_v14, -0.13769531 }
  0xf7   :  { %v873_v28 = vsel %vm809_vm8, -0.18457031, %v745_v35  ;;  %v999_v31 = vsel %vm935_vm15, -0.09082031, %v871_v26  ;;  %vm1063_vm9 = vcmp.gt.f32.partialorder %v3193_v32, -0.045410156  ;;  %vm1065_vm10 = vcmp.gt.f32.partialorder %v3230_v14, -0.045410156 }
  0xf8   :  { %v1001_v29 = vsel %vm937_vm0, -0.09082031, %v873_v28  ;;  %v1127_v33 = vsel %vm1063_vm9, 0.0, %v999_v31  ;;  %vm1191_vm13 = vcmp.gt.f32.partialorder %v3193_v32, 0.039794922  ;;  %vm1193_vm14 = vcmp.gt.f32.partialorder %v3230_v14, 0.039794922 }
  0xf9   :  { %v1129_v34 = vsel %vm1065_vm10, 0.0, %v1001_v29  ;;  %v1255_v39 = vsel %vm1191_vm13, 0.079589844, %v1127_v33  ;;  %vm1319_vm1 = vcmp.gt.f32.partialorder %v3193_v32, 0.12011719  ;;  %vm1321_vm2 = vcmp.gt.f32.partialorder %v3230_v14, 0.12011719 }
  0xfa   :  { %v1257_v40 = vsel %vm1193_vm14, 0.079589844, %v1129_v34  ;;  %v1383_v48 = vsel %vm1319_vm1, 0.16113281, %v1255_v39  ;;  %vm1447_vm3 = vcmp.gt.f32.partialorder %v3193_v32, 0.203125  ;;  %vm1449_vm4 = vcmp.gt.f32.partialorder %v3230_v14, 0.203125 }
  0xfb   :  { %v1385_v49 = vsel %vm1321_vm2, 0.16113281, %v1257_v40  ;;  %v1511_v51 = vsel %vm1447_vm3, 0.24609375, %v1383_v48  ;;  %vm1575_vm5 = vcmp.gt.f32.partialorder %v3193_v32, 0.29296875  ;;  %vm1577_vm6 = vcmp.gt.f32.partialorder %v3230_v14, 0.29296875 }
  0xfc   :  { %v1513_v52 = vsel %vm1449_vm4, 0.24609375, %v1385_v49  ;;  %v1639_v54 = vsel %vm1575_vm5, 0.33789063, %v1511_v51  ;;  %vm1703_vm7 = vcmp.gt.f32.partialorder %v3193_v32, 0.390625  ;;  %vm1705_vm11 = vcmp.gt.f32.partialorder %v3230_v14, 0.390625 }
  0xfd   :  { %v1641_v57 = vsel %vm1577_vm6, 0.33789063, %v1513_v52  ;;  %v1767_v58 = vsel %vm1703_vm7, 0.44140625, %v1639_v54  ;;  %vm1831_vm12 = vcmp.gt.f32.partialorder %v3193_v32, 0.5  ;;  %vm1833_vm8 = vcmp.gt.f32.partialorder %v3230_v14, 0.5 }
  0xfe   :  { %v1769_v60 = vsel %vm1705_vm11, 0.44140625, %v1641_v57  ;;  %v1895_v24 = vsel %vm1831_vm12, 0.5625, %v1767_v58  ;;  %vm1959_vm15 = vcmp.gt.f32.partialorder %v3193_v32, 0.640625  ;;  %vm1961_vm0 = vcmp.gt.f32.partialorder %v3230_v14, 0.640625 }
  0xff   :  { %v1897_v20 = vsel %vm1833_vm8, 0.5625, %v1769_v60  ;;  %v2023_v36 = vsel %vm1959_vm15, 0.72265625, %v1895_v24  ;;  %vm2087_vm9 = vcmp.gt.f32.partialorder %v3193_v32, 0.859375  ;;  %vm2089_vm10 = vcmp.gt.f32.partialorder %v3230_v14, 0.859375 }
 0x100   :  { %v2025_v38 = vsel %vm1961_vm0, 0.72265625, %v1897_v20  ;;  %v2151_v63 = vsel %vm2087_vm9, 1.0, %v2023_v36  ;;  %v3267_v0 = vmul.f32 %v2826_v50, %v84_v45  ;;  %v3270_v2 = vmul.f32 %v2826_v50, %v86_v23 }
 0x101   :  { %v2153_v3 = vsel %vm2089_vm10, 1.0, %v2025_v38  ;;  %v2280_v4 = vmul.f32 %v3180_v27, %v2151_v63  ;;  %v3274_v6 = vmul.f32 %v2830_v53, %v89_v61  ;;  %v3277_v43 = vmul.f32 %v2830_v53, %v91_v5 }
 0x102   :  { %v2282_v32 = vmul.f32 %v3180_v27, %v2153_v3  ;;  %vm294_vm13 = vcmp.gt.f32.partialorder %v3267_v0, -0.84765625  ;;  %vm296_vm14 = vcmp.gt.f32.partialorder %v3270_v2, -0.84765625  ;;  %vm422_vm1 = vcmp.gt.f32.partialorder %v3267_v0, -0.609375 }
 0x103   :  { %v358_v44 = vsel %vm294_vm13, -0.6953125, %v2685_v47  ;;  %v360_v7 = vsel %vm296_vm14, -0.6953125, %v2685_v47  ;;  %vm424_vm2 = vcmp.gt.f32.partialorder %v3270_v2, -0.609375  ;;  %vm550_vm3 = vcmp.gt.f32.partialorder %v3267_v0, -0.45898438 }
 0x104   :  { %v2485_v8 = vpack.c.bf16 %v2282_v32, %v2280_v4  ;;  %v486_v11 = vsel %vm422_vm1, -0.5234375, %v358_v44  ;;  %v488_v12 = vsel %vm424_vm2, -0.5234375, %v360_v7  ;;  %vm552_vm4 = vcmp.gt.f32.partialorder %v3270_v2, -0.45898438 }
 0x105   :  { %v614_v13 = vsel %vm550_vm3, -0.39453125, %v486_v11  ;;  %v616_v14 = vsel %vm552_vm4, -0.39453125, %v488_v12  ;;  %vm678_vm5 = vcmp.gt.f32.partialorder %v3267_v0, -0.33984375  ;;  %vm680_vm6 = vcmp.gt.f32.partialorder %v3270_v2, -0.33984375 }
 0x106   :  { %2534 = vmatprep.subr.bf16.mxu1 %v2485_v8  ;;  %v742_v15 = vsel %vm678_vm5, -0.28515625, %v614_v13  ;;  %v744_v16 = vsel %vm680_vm6, -0.28515625, %v616_v14  ;;  %vm806_vm7 = vcmp.gt.f32.partialorder %v3267_v0, -0.234375  ;;  %vm808_vm11 = vcmp.gt.f32.partialorder %v3270_v2, -0.234375  ;;  %2486 = vmatprep.subr.bf16.mxu0 %v2485_v8 }
 0x107   :  { %v870_v17 = vsel %vm806_vm7, -0.18457031, %v742_v15  ;;  %v872_v37 = vsel %vm808_vm11, -0.18457031, %v744_v16  ;;  %vm934_vm12 = vcmp.gt.f32.partialorder %v3267_v0, -0.13769531  ;;  %vm936_vm8 = vcmp.gt.f32.partialorder %v3270_v2, -0.13769531  ;;  %v88_v15 = vld [vmem:[#allocation6 + $0xc0] sm:$0xff] }
 0x108   :  { %v998_v18 = vsel %vm934_vm12, -0.09082031, %v870_v17  ;;  %v1000_v41 = vsel %vm936_vm8, -0.09082031, %v872_v37  ;;  %vm1062_vm15 = vcmp.gt.f32.partialorder %v3267_v0, -0.045410156  ;;  %vm1064_vm0 = vcmp.gt.f32.partialorder %v3270_v2, -0.045410156  ;;  %v90_v37 = vld [vmem:[#allocation6 + $0xd0] sm:$0xff] }
 0x109   :  { %v1126_v42 = vsel %vm1062_vm15, 0.0, %v998_v18  ;;  %v1128_v19 = vsel %vm1064_vm0, 0.0, %v1000_v41  ;;  %vm1190_vm9 = vcmp.gt.f32.partialorder %v3267_v0, 0.039794922  ;;  %vm1192_vm10 = vcmp.gt.f32.partialorder %v3270_v2, 0.039794922  ;;  %v93_v18 = vld [vmem:[#allocation6 + $0xe8] sm:$0xff] }
 0x10a   :  { %v1254_v21 = vsel %vm1190_vm9, 0.079589844, %v1126_v42  ;;  %v1256_v22 = vsel %vm1192_vm10, 0.079589844, %v1128_v19  ;;  %vm1318_vm13 = vcmp.gt.f32.partialorder %v3267_v0, 0.12011719  ;;  %vm1320_vm14 = vcmp.gt.f32.partialorder %v3270_v2, 0.12011719 }
 0x10b   :  { %v1382_v55 = vsel %vm1318_vm13, 0.16113281, %v1254_v21  ;;  %v1384_v35 = vsel %vm1320_vm14, 0.16113281, %v1256_v22  ;;  %vm1446_vm1 = vcmp.gt.f32.partialorder %v3267_v0, 0.203125  ;;  %vm1448_vm2 = vcmp.gt.f32.partialorder %v3270_v2, 0.203125 }
 0x10c   :  { %v1510_v26 = vsel %vm1446_vm1, 0.24609375, %v1382_v55  ;;  %v1512_v28 = vsel %vm1448_vm2, 0.24609375, %v1384_v35  ;;  %vm1574_vm3 = vcmp.gt.f32.partialorder %v3267_v0, 0.29296875  ;;  %vm1576_vm4 = vcmp.gt.f32.partialorder %v3270_v2, 0.29296875 }
 0x10d   :  { %v1638_v31 = vsel %vm1574_vm3, 0.33789063, %v1510_v26  ;;  %v1640_v29 = vsel %vm1576_vm4, 0.33789063, %v1512_v28  ;;  %vm1702_vm5 = vcmp.gt.f32.partialorder %v3267_v0, 0.390625  ;;  %vm1704_vm6 = vcmp.gt.f32.partialorder %v3270_v2, 0.390625 }
 0x10e   :  { %v1766_v33 = vsel %vm1702_vm5, 0.44140625, %v1638_v31  ;;  %v1768_v34 = vsel %vm1704_vm6, 0.44140625, %v1640_v29  ;;  %vm1830_vm7 = vcmp.gt.f32.partialorder %v3267_v0, 0.5  ;;  %vm1832_vm11 = vcmp.gt.f32.partialorder %v3270_v2, 0.5 }
 0x10f   :  { %v1894_v39 = vsel %vm1830_vm7, 0.5625, %v1766_v33  ;;  %v1896_v40 = vsel %vm1832_vm11, 0.5625, %v1768_v34  ;;  %vm1958_vm12 = vcmp.gt.f32.partialorder %v3267_v0, 0.640625  ;;  %vm1960_vm8 = vcmp.gt.f32.partialorder %v3270_v2, 0.640625 }
 0x110   :  { %v2022_v48 = vsel %vm1958_vm12, 0.72265625, %v1894_v39  ;;  %v2024_v49 = vsel %vm1960_vm8, 0.72265625, %v1896_v40  ;;  %vm2086_vm15 = vcmp.gt.f32.partialorder %v3267_v0, 0.859375  ;;  %vm2088_vm0 = vcmp.gt.f32.partialorder %v3270_v2, 0.859375 }
 0x111   :  { %v2150_v51 = vsel %vm2086_vm15, 1.0, %v2022_v48  ;;  %v2152_v52 = vsel %vm2088_vm0, 1.0, %v2024_v49  ;;  %vm299_vm9 = vcmp.gt.f32.partialorder %v3274_v6, -0.84765625  ;;  %vm301_vm10 = vcmp.gt.f32.partialorder %v3277_v43, -0.84765625 }
 0x112   :  { %v2279_v54 = vmul.f32 %v3190_v30, %v2150_v51  ;;  %v2281_v57 = vmul.f32 %v3190_v30, %v2152_v52  ;;  %v363_v58 = vsel %vm299_vm9, -0.6953125, %v2685_v47  ;;  %v365_v45 = vsel %vm301_vm10, -0.6953125, %v2685_v47 }
 0x113   :  { %vm427_vm13 = vcmp.gt.f32.partialorder %v3274_v6, -0.609375  ;;  %vm429_vm14 = vcmp.gt.f32.partialorder %v3277_v43, -0.609375  ;;  %vm555_vm1 = vcmp.gt.f32.partialorder %v3274_v6, -0.45898438  ;;  %vm557_vm2 = vcmp.gt.f32.partialorder %v3277_v43, -0.45898438 }
 0x114   :  { %v2487_v23 = vpack.c.bf16 %v2281_v57, %v2279_v54  ;;  %v491_v60 = vsel %vm427_vm13, -0.5234375, %v363_v58  ;;  %v493_v24 = vsel %vm429_vm14, -0.5234375, %v365_v45  ;;  %vm683_vm3 = vcmp.gt.f32.partialorder %v3274_v6, -0.33984375 }
 0x115   :  { %v619_v61 = vsel %vm555_vm1, -0.39453125, %v491_v60  ;;  %v621_v5 = vsel %vm557_vm2, -0.39453125, %v493_v24  ;;  %vm685_vm4 = vcmp.gt.f32.partialorder %v3277_v43, -0.33984375  ;;  %vm811_vm5 = vcmp.gt.f32.partialorder %v3274_v6, -0.234375 }
 0x116   :  { %2550 = vmatpush1.bf16.msra.mxu1 %v2487_v23  ;;  %2488 = vmatpush1.bf16.msra.mxu0 %v2487_v23  ;;  %v747_v20 = vsel %vm683_vm3, -0.28515625, %v619_v61  ;;  %v749_v36 = vsel %vm685_vm4, -0.28515625, %v621_v5  ;;  %vm813_vm6 = vcmp.gt.f32.partialorder %v3277_v43, -0.234375  ;;  %vm939_vm7 = vcmp.gt.f32.partialorder %v3274_v6, -0.13769531 }
 0x117   :  { %v875_v38 = vsel %vm811_vm5, -0.18457031, %v747_v20  ;;  %v877_v63 = vsel %vm813_vm6, -0.18457031, %v749_v36  ;;  %vm941_vm11 = vcmp.gt.f32.partialorder %v3277_v43, -0.13769531  ;;  %vm1067_vm12 = vcmp.gt.f32.partialorder %v3274_v6, -0.045410156 }
 0x118   :  { %v1003_v0 = vsel %vm939_vm7, -0.09082031, %v875_v38  ;;  %v1005_v2 = vsel %vm941_vm11, -0.09082031, %v877_v63  ;;  %vm1069_vm8 = vcmp.gt.f32.partialorder %v3277_v43, -0.045410156  ;;  %vm1195_vm15 = vcmp.gt.f32.partialorder %v3274_v6, 0.039794922 }
 0x119   :  { %v1131_v3 = vsel %vm1067_vm12, 0.0, %v1003_v0  ;;  %v1133_v4 = vsel %vm1069_vm8, 0.0, %v1005_v2  ;;  %vm1197_vm0 = vcmp.gt.f32.partialorder %v3277_v43, 0.039794922  ;;  %vm1323_vm9 = vcmp.gt.f32.partialorder %v3274_v6, 0.12011719  ;;  %v95_v2 = vld [vmem:[#allocation6 + $0xf8] sm:$0xff] }
 0x11a   :  { %v1259_v32 = vsel %vm1195_vm15, 0.079589844, %v1131_v3  ;;  %v1261_v44 = vsel %vm1197_vm0, 0.079589844, %v1133_v4  ;;  %vm1325_vm10 = vcmp.gt.f32.partialorder %v3277_v43, 0.12011719  ;;  %vm1451_vm13 = vcmp.gt.f32.partialorder %v3274_v6, 0.203125 }
 0x11b   :  { %v1387_v7 = vsel %vm1323_vm9, 0.16113281, %v1259_v32  ;;  %v1389_v8 = vsel %vm1325_vm10, 0.16113281, %v1261_v44  ;;  %vm1453_vm14 = vcmp.gt.f32.partialorder %v3277_v43, 0.203125  ;;  %vm1579_vm1 = vcmp.gt.f32.partialorder %v3274_v6, 0.29296875 }
 0x11c   :  { %v1515_v11 = vsel %vm1451_vm13, 0.24609375, %v1387_v7  ;;  %v1517_v12 = vsel %vm1453_vm14, 0.24609375, %v1389_v8  ;;  %vm1581_vm2 = vcmp.gt.f32.partialorder %v3277_v43, 0.29296875  ;;  %vm1707_vm3 = vcmp.gt.f32.partialorder %v3274_v6, 0.390625 }
 0x11d   :  { %v1643_v13 = vsel %vm1579_vm1, 0.33789063, %v1515_v11  ;;  %v1645_v14 = vsel %vm1581_vm2, 0.33789063, %v1517_v12  ;;  %vm1709_vm4 = vcmp.gt.f32.partialorder %v3277_v43, 0.390625  ;;  %vm1835_vm5 = vcmp.gt.f32.partialorder %v3274_v6, 0.5 }
 0x11e   :  { %v1771_v16 = vsel %vm1707_vm3, 0.44140625, %v1643_v13  ;;  %v1773_v17 = vsel %vm1709_vm4, 0.44140625, %v1645_v14  ;;  %vm1837_vm6 = vcmp.gt.f32.partialorder %v3277_v43, 0.5  ;;  %vm1963_vm7 = vcmp.gt.f32.partialorder %v3274_v6, 0.640625 }
 0x11f   :  { %v1899_v41 = vsel %vm1835_vm5, 0.5625, %v1771_v16  ;;  %v1901_v42 = vsel %vm1837_vm6, 0.5625, %v1773_v17  ;;  %vm1965_vm11 = vcmp.gt.f32.partialorder %v3277_v43, 0.640625  ;;  %vm2091_vm12 = vcmp.gt.f32.partialorder %v3274_v6, 0.859375 }
 0x120   :  { %v2027_v19 = vsel %vm1963_vm7, 0.72265625, %v1899_v41  ;;  %v2029_v21 = vsel %vm1965_vm11, 0.72265625, %v1901_v42  ;;  %vm2093_vm8 = vcmp.gt.f32.partialorder %v3277_v43, 0.859375  ;;  %v3347_v22 = vmul.f32 %v2826_v50, %v88_v15 }
 0x121   :  { %v2155_v55 = vsel %vm2091_vm12, 1.0, %v2027_v19  ;;  %v2157_v35 = vsel %vm2093_vm8, 1.0, %v2029_v21  ;;  %v3350_v26 = vmul.f32 %v2826_v50, %v90_v37  ;;  %v3353_v28 = vmul.f32 %v2830_v53, %v93_v18 }
 0x122   :  { %v2284_v31 = vmul.f32 %v3180_v27, %v2155_v55  ;;  %v2286_v29 = vmul.f32 %v3180_v27, %v2157_v35  ;;  %vm298_vm15 = vcmp.gt.f32.partialorder %v3347_v22, -0.84765625  ;;  %vm426_vm0 = vcmp.gt.f32.partialorder %v3347_v22, -0.609375 }
 0x123   :  { %vm300_vm9 = vcmp.gt.f32.partialorder %v3350_v26, -0.84765625  ;;  %v362_v6 = vsel %vm298_vm15, -0.6953125, %v2685_v47  ;;  %vm428_vm10 = vcmp.gt.f32.partialorder %v3350_v26, -0.609375  ;;  %vm554_vm13 = vcmp.gt.f32.partialorder %v3347_v22, -0.45898438 }
 0x124   :  { %v2489_v43 = vpack.c.bf16 %v2286_v29, %v2284_v31  ;;  %v364_v33 = vsel %vm300_vm9, -0.6953125, %v2685_v47  ;;  %v490_v34 = vsel %vm426_vm0, -0.5234375, %v362_v6  ;;  %vm556_vm14 = vcmp.gt.f32.partialorder %v3350_v26, -0.45898438 }
 0x125   :  { %v492_v39 = vsel %vm428_vm10, -0.5234375, %v364_v33  ;;  %v618_v40 = vsel %vm554_vm13, -0.39453125, %v490_v34  ;;  %vm682_vm1 = vcmp.gt.f32.partialorder %v3347_v22, -0.33984375  ;;  %vm684_vm2 = vcmp.gt.f32.partialorder %v3350_v26, -0.33984375 }
 0x126   :  { %2535 = vmatprep.subr.bf16.mxu1 %v2489_v43  ;;  %v620_v48 = vsel %vm556_vm14, -0.39453125, %v492_v39  ;;  %v746_v49 = vsel %vm682_vm1, -0.28515625, %v618_v40  ;;  %vm810_vm3 = vcmp.gt.f32.partialorder %v3347_v22, -0.234375  ;;  %vm812_vm4 = vcmp.gt.f32.partialorder %v3350_v26, -0.234375  ;;  %2490 = vmatprep.subr.bf16.mxu0 %v2489_v43 }
 0x127   :  { %v748_v51 = vsel %vm684_vm2, -0.28515625, %v620_v48  ;;  %v874_v52 = vsel %vm810_vm3, -0.18457031, %v746_v49  ;;  %vm938_vm5 = vcmp.gt.f32.partialorder %v3347_v22, -0.13769531  ;;  %vm940_vm6 = vcmp.gt.f32.partialorder %v3350_v26, -0.13769531 }
 0x128   :  { %v876_v54 = vsel %vm812_vm4, -0.18457031, %v748_v51  ;;  %v1002_v57 = vsel %vm938_vm5, -0.09082031, %v874_v52  ;;  %vm1066_vm7 = vcmp.gt.f32.partialorder %v3347_v22, -0.045410156  ;;  %vm1068_vm11 = vcmp.gt.f32.partialorder %v3350_v26, -0.045410156  ;;  %v92_v51 = vld [vmem:[#allocation6 + $0xe0] sm:$0xff]  ;;  %v94_v52 = vld [vmem:[#allocation6 + $0xf0] sm:$0xff] }
 0x129   :  { %v1004_v58 = vsel %vm940_vm6, -0.09082031, %v876_v54  ;;  %v1130_v45 = vsel %vm1066_vm7, 0.0, %v1002_v57  ;;  %vm1194_vm12 = vcmp.gt.f32.partialorder %v3347_v22, 0.039794922  ;;  %vm1196_vm8 = vcmp.gt.f32.partialorder %v3350_v26, 0.039794922 }
 0x12a   :  { %v1132_v23 = vsel %vm1068_vm11, 0.0, %v1004_v58  ;;  %v1258_v60 = vsel %vm1194_vm12, 0.079589844, %v1130_v45  ;;  %vm1322_vm15 = vcmp.gt.f32.partialorder %v3347_v22, 0.12011719  ;;  %vm1324_vm0 = vcmp.gt.f32.partialorder %v3350_v26, 0.12011719  ;;  %v97_v58 = vld [vmem:[#allocation6 + $0x108] sm:$0xff]  ;;  %v99_v45 = vld [vmem:[#allocation6 + $0x118] sm:$0xff] }
 0x12b   :  { %v1260_v24 = vsel %vm1196_vm8, 0.079589844, %v1132_v23  ;;  %v1386_v61 = vsel %vm1322_vm15, 0.16113281, %v1258_v60  ;;  %vm1450_vm9 = vcmp.gt.f32.partialorder %v3347_v22, 0.203125  ;;  %vm1452_vm10 = vcmp.gt.f32.partialorder %v3350_v26, 0.203125 }
 0x12c   :  { %v1388_v5 = vsel %vm1324_vm0, 0.16113281, %v1260_v24  ;;  %v1514_v20 = vsel %vm1450_vm9, 0.24609375, %v1386_v61  ;;  %vm1578_vm13 = vcmp.gt.f32.partialorder %v3347_v22, 0.29296875  ;;  %vm1580_vm14 = vcmp.gt.f32.partialorder %v3350_v26, 0.29296875 }
 0x12d   :  { %v1516_v36 = vsel %vm1452_vm10, 0.24609375, %v1388_v5  ;;  %v1642_v38 = vsel %vm1578_vm13, 0.33789063, %v1514_v20  ;;  %vm1706_vm1 = vcmp.gt.f32.partialorder %v3347_v22, 0.390625  ;;  %vm1708_vm2 = vcmp.gt.f32.partialorder %v3350_v26, 0.390625 }
 0x12e   :  { %v1644_v63 = vsel %vm1580_vm14, 0.33789063, %v1516_v36  ;;  %v1770_v0 = vsel %vm1706_vm1, 0.44140625, %v1642_v38  ;;  %vm1834_vm3 = vcmp.gt.f32.partialorder %v3347_v22, 0.5  ;;  %vm1836_vm4 = vcmp.gt.f32.partialorder %v3350_v26, 0.5 }
 0x12f   :  { %v1772_v3 = vsel %vm1708_vm2, 0.44140625, %v1644_v63  ;;  %v1898_v4 = vsel %vm1834_vm3, 0.5625, %v1770_v0  ;;  %vm1962_vm5 = vcmp.gt.f32.partialorder %v3347_v22, 0.640625  ;;  %vm1964_vm6 = vcmp.gt.f32.partialorder %v3350_v26, 0.640625 }
 0x130   :  { %v1900_v32 = vsel %vm1836_vm4, 0.5625, %v1772_v3  ;;  %v2026_v44 = vsel %vm1962_vm5, 0.72265625, %v1898_v4  ;;  %vm2090_vm7 = vcmp.gt.f32.partialorder %v3347_v22, 0.859375  ;;  %vm2092_vm11 = vcmp.gt.f32.partialorder %v3350_v26, 0.859375 }
 0x131   :  { %v2028_v7 = vsel %vm1964_vm6, 0.72265625, %v1900_v32  ;;  %v2154_v8 = vsel %vm2090_vm7, 1.0, %v2026_v44  ;;  %v3390_v11 = vmul.f32 %v2830_v53, %v95_v2  ;;  %vm303_vm12 = vcmp.gt.f32.partialorder %v3353_v28, -0.84765625 }
 0x132   :  { %v2156_v12 = vsel %vm2092_vm11, 1.0, %v2028_v7  ;;  %v2283_v13 = vmul.f32 %v3190_v30, %v2154_v8  ;;  %v367_v14 = vsel %vm303_vm12, -0.6953125, %v2685_v47  ;;  %vm431_vm8 = vcmp.gt.f32.partialorder %v3353_v28, -0.609375 }
 0x133   :  { %v2285_v15 = vmul.f32 %v3190_v30, %v2156_v12  ;;  %vm305_vm15 = vcmp.gt.f32.partialorder %v3390_v11, -0.84765625  ;;  %vm433_vm0 = vcmp.gt.f32.partialorder %v3390_v11, -0.609375  ;;  %v495_v16 = vsel %vm431_vm8, -0.5234375, %v367_v14 }
 0x134   :  { %v369_v17 = vsel %vm305_vm15, -0.6953125, %v2685_v47  ;;  %vm559_vm9 = vcmp.gt.f32.partialorder %v3353_v28, -0.45898438  ;;  %vm561_vm10 = vcmp.gt.f32.partialorder %v3390_v11, -0.45898438  ;;  %vm687_vm13 = vcmp.gt.f32.partialorder %v3353_v28, -0.33984375 }
 0x135   :  { %v2491_v53 = vpack.c.bf16 %v2285_v15, %v2283_v13  ;;  %v497_v37 = vsel %vm433_vm0, -0.5234375, %v369_v17  ;;  %v623_v18 = vsel %vm559_vm9, -0.39453125, %v495_v16  ;;  %vm689_vm14 = vcmp.gt.f32.partialorder %v3390_v11, -0.33984375 }
 0x136   :  { %v625_v41 = vsel %vm561_vm10, -0.39453125, %v497_v37  ;;  %v751_v42 = vsel %vm687_vm13, -0.28515625, %v623_v18  ;;  %vm815_vm1 = vcmp.gt.f32.partialorder %v3353_v28, -0.234375  ;;  %vm817_vm2 = vcmp.gt.f32.partialorder %v3390_v11, -0.234375 }
 0x137   :  { %2551 = vmatpush1.bf16.msra.mxu1 %v2491_v53  ;;  %2492 = vmatpush1.bf16.msra.mxu0 %v2491_v53  ;;  %v753_v19 = vsel %vm689_vm14, -0.28515625, %v625_v41  ;;  %v879_v21 = vsel %vm815_vm1, -0.18457031, %v751_v42  ;;  %vm943_vm3 = vcmp.gt.f32.partialorder %v3353_v28, -0.13769531  ;;  %vm945_vm4 = vcmp.gt.f32.partialorder %v3390_v11, -0.13769531 }
 0x138   :  { %v881_v22 = vsel %vm817_vm2, -0.18457031, %v753_v19  ;;  %v1007_v55 = vsel %vm943_vm3, -0.09082031, %v879_v21  ;;  %vm1071_vm5 = vcmp.gt.f32.partialorder %v3353_v28, -0.045410156  ;;  %vm1073_vm6 = vcmp.gt.f32.partialorder %v3390_v11, -0.045410156 }
 0x139   :  { %v1009_v35 = vsel %vm945_vm4, -0.09082031, %v881_v22  ;;  %v1135_v26 = vsel %vm1071_vm5, 0.0, %v1007_v55  ;;  %vm1199_vm7 = vcmp.gt.f32.partialorder %v3353_v28, 0.039794922  ;;  %vm1201_vm11 = vcmp.gt.f32.partialorder %v3390_v11, 0.039794922 }
 0x13a   :  { %v1137_v31 = vsel %vm1073_vm6, 0.0, %v1009_v35  ;;  %v1263_v29 = vsel %vm1199_vm7, 0.079589844, %v1135_v26  ;;  %vm1327_vm12 = vcmp.gt.f32.partialorder %v3353_v28, 0.12011719  ;;  %vm1329_vm8 = vcmp.gt.f32.partialorder %v3390_v11, 0.12011719 }
 0x13b   :  { %v1265_v6 = vsel %vm1201_vm11, 0.079589844, %v1137_v31  ;;  %v1391_v43 = vsel %vm1327_vm12, 0.16113281, %v1263_v29  ;;  %vm1455_vm15 = vcmp.gt.f32.partialorder %v3353_v28, 0.203125  ;;  %vm1457_vm0 = vcmp.gt.f32.partialorder %v3390_v11, 0.203125 }
 0x13c   :  { %v1393_v33 = vsel %vm1329_vm8, 0.16113281, %v1265_v6  ;;  %v1519_v34 = vsel %vm1455_vm15, 0.24609375, %v1391_v43  ;;  %vm1583_vm9 = vcmp.gt.f32.partialorder %v3353_v28, 0.29296875  ;;  %vm1585_vm10 = vcmp.gt.f32.partialorder %v3390_v11, 0.29296875 }
 0x13d   :  { %v1521_v39 = vsel %vm1457_vm0, 0.24609375, %v1393_v33  ;;  %v1647_v40 = vsel %vm1583_vm9, 0.33789063, %v1519_v34  ;;  %vm1711_vm13 = vcmp.gt.f32.partialorder %v3353_v28, 0.390625  ;;  %vm1713_vm14 = vcmp.gt.f32.partialorder %v3390_v11, 0.390625 }
 0x13e   :  { %v1649_v48 = vsel %vm1585_vm10, 0.33789063, %v1521_v39  ;;  %v1775_v49 = vsel %vm1711_vm13, 0.44140625, %v1647_v40  ;;  %vm1839_vm1 = vcmp.gt.f32.partialorder %v3353_v28, 0.5  ;;  %vm1841_vm2 = vcmp.gt.f32.partialorder %v3390_v11, 0.5 }
 0x13f   :  { %v1777_v54 = vsel %vm1713_vm14, 0.44140625, %v1649_v48  ;;  %v1903_v57 = vsel %vm1839_vm1, 0.5625, %v1775_v49  ;;  %vm1967_vm3 = vcmp.gt.f32.partialorder %v3353_v28, 0.640625  ;;  %vm1969_vm4 = vcmp.gt.f32.partialorder %v3390_v11, 0.640625 }
 0x140   :  { %v1905_v23 = vsel %vm1841_vm2, 0.5625, %v1777_v54  ;;  %v2031_v60 = vsel %vm1967_vm3, 0.72265625, %v1903_v57  ;;  %vm2095_vm5 = vcmp.gt.f32.partialorder %v3353_v28, 0.859375  ;;  %vm2097_vm6 = vcmp.gt.f32.partialorder %v3390_v11, 0.859375 }
 0x141   :  { %v2033_v24 = vsel %vm1969_vm4, 0.72265625, %v1905_v23  ;;  %v2159_v61 = vsel %vm2095_vm5, 1.0, %v2031_v60  ;;  %v3427_v5 = vmul.f32 %v2826_v50, %v92_v51  ;;  %v3430_v20 = vmul.f32 %v2826_v50, %v94_v52 }
 0x142   :  { %v2161_v36 = vsel %vm2097_vm6, 1.0, %v2033_v24  ;;  %v2288_v38 = vmul.f32 %v3180_v27, %v2159_v61  ;;  %v3434_v63 = vmul.f32 %v2842_v59, %v97_v58  ;;  %v3437_v0 = vmul.f32 %v2842_v59, %v99_v45 }
 0x143   :  { %v2290_v28 = vmul.f32 %v3180_v27, %v2161_v36  ;;  %vm302_vm7 = vcmp.gt.f32.partialorder %v3427_v5, -0.84765625  ;;  %vm304_vm11 = vcmp.gt.f32.partialorder %v3430_v20, -0.84765625  ;;  %vm430_vm12 = vcmp.gt.f32.partialorder %v3427_v5, -0.609375 }
 0x144   :  { %v366_v50 = vsel %vm302_vm7, -0.6953125, %v2685_v47  ;;  %v368_v2 = vsel %vm304_vm11, -0.6953125, %v2685_v47  ;;  %vm432_vm8 = vcmp.gt.f32.partialorder %v3430_v20, -0.609375  ;;  %vm558_vm15 = vcmp.gt.f32.partialorder %v3427_v5, -0.45898438 }
 0x145   :  { %v2493_v3 = vpack.c.bf16 %v2290_v28, %v2288_v38  ;;  %v494_v4 = vsel %vm430_vm12, -0.5234375, %v366_v50  ;;  %v496_v32 = vsel %vm432_vm8, -0.5234375, %v368_v2  ;;  %vm560_vm0 = vcmp.gt.f32.partialorder %v3430_v20, -0.45898438 }
 0x146   :  { %v622_v27 = vsel %vm558_vm15, -0.39453125, %v494_v4  ;;  %v624_v44 = vsel %vm560_vm0, -0.39453125, %v496_v32  ;;  %vm686_vm9 = vcmp.gt.f32.partialorder %v3427_v5, -0.33984375  ;;  %vm688_vm10 = vcmp.gt.f32.partialorder %v3430_v20, -0.33984375 }
 0x147   :  { %2536 = vmatprep.subr.bf16.mxu1 %v2493_v3  ;;  %v750_v7 = vsel %vm686_vm9, -0.28515625, %v622_v27  ;;  %v752_v8 = vsel %vm688_vm10, -0.28515625, %v624_v44  ;;  %vm814_vm13 = vcmp.gt.f32.partialorder %v3427_v5, -0.234375  ;;  %vm816_vm14 = vcmp.gt.f32.partialorder %v3430_v20, -0.234375  ;;  %2494 = vmatprep.subr.bf16.mxu0 %v2493_v3  ;;  %v96_v27 = vld [vmem:[#allocation6 + $0x100] sm:$0xff]  ;;  %v98_v44 = vld [vmem:[#allocation6 + $0x110] sm:$0xff] }
 0x148   :  { %v878_v11 = vsel %vm814_vm13, -0.18457031, %v750_v7  ;;  %v880_v12 = vsel %vm816_vm14, -0.18457031, %v752_v8  ;;  %vm942_vm1 = vcmp.gt.f32.partialorder %v3427_v5, -0.13769531  ;;  %vm944_vm2 = vcmp.gt.f32.partialorder %v3430_v20, -0.13769531 }
 0x149   :  { %v1006_v13 = vsel %vm942_vm1, -0.09082031, %v878_v11  ;;  %v1008_v14 = vsel %vm944_vm2, -0.09082031, %v880_v12  ;;  %vm1070_vm3 = vcmp.gt.f32.partialorder %v3427_v5, -0.045410156  ;;  %vm1072_vm4 = vcmp.gt.f32.partialorder %v3430_v20, -0.045410156  ;;  %v101_v11 = vld [vmem:[#allocation6 + $0x128] sm:$0xff]  ;;  %v103_v12 = vld [vmem:[#allocation6 + $0x138] sm:$0xff] }
 0x14a   :  { %v1134_v15 = vsel %vm1070_vm3, 0.0, %v1006_v13  ;;  %v1136_v16 = vsel %vm1072_vm4, 0.0, %v1008_v14  ;;  %vm1198_vm5 = vcmp.gt.f32.partialorder %v3427_v5, 0.039794922  ;;  %vm1200_vm6 = vcmp.gt.f32.partialorder %v3430_v20, 0.039794922 }
 0x14b   :  { %v1262_v17 = vsel %vm1198_vm5, 0.079589844, %v1134_v15  ;;  %v1264_v53 = vsel %vm1200_vm6, 0.079589844, %v1136_v16  ;;  %vm1326_vm7 = vcmp.gt.f32.partialorder %v3427_v5, 0.12011719  ;;  %vm1328_vm11 = vcmp.gt.f32.partialorder %v3430_v20, 0.12011719 }
 0x14c   :  { %v1390_v37 = vsel %vm1326_vm7, 0.16113281, %v1262_v17  ;;  %v1392_v18 = vsel %vm1328_vm11, 0.16113281, %v1264_v53  ;;  %vm1454_vm12 = vcmp.gt.f32.partialorder %v3427_v5, 0.203125  ;;  %vm1456_vm8 = vcmp.gt.f32.partialorder %v3430_v20, 0.203125 }
 0x14d   :  { %v1518_v41 = vsel %vm1454_vm12, 0.24609375, %v1390_v37  ;;  %v1520_v42 = vsel %vm1456_vm8, 0.24609375, %v1392_v18  ;;  %vm1582_vm15 = vcmp.gt.f32.partialorder %v3427_v5, 0.29296875  ;;  %vm1584_vm0 = vcmp.gt.f32.partialorder %v3430_v20, 0.29296875 }
 0x14e   :  { %v1646_v19 = vsel %vm1582_vm15, 0.33789063, %v1518_v41  ;;  %v1648_v21 = vsel %vm1584_vm0, 0.33789063, %v1520_v42  ;;  %vm1710_vm9 = vcmp.gt.f32.partialorder %v3427_v5, 0.390625  ;;  %vm1712_vm10 = vcmp.gt.f32.partialorder %v3430_v20, 0.390625 }
 0x14f   :  { %v1774_v22 = vsel %vm1710_vm9, 0.44140625, %v1646_v19  ;;  %v1776_v55 = vsel %vm1712_vm10, 0.44140625, %v1648_v21  ;;  %vm1838_vm13 = vcmp.gt.f32.partialorder %v3427_v5, 0.5  ;;  %vm1840_vm14 = vcmp.gt.f32.partialorder %v3430_v20, 0.5 }
 0x150   :  { %v1902_v35 = vsel %vm1838_vm13, 0.5625, %v1774_v22  ;;  %v1904_v26 = vsel %vm1840_vm14, 0.5625, %v1776_v55  ;;  %vm1966_vm1 = vcmp.gt.f32.partialorder %v3427_v5, 0.640625  ;;  %vm1968_vm2 = vcmp.gt.f32.partialorder %v3430_v20, 0.640625 }
 0x151   :  { %v2030_v31 = vsel %vm1966_vm1, 0.72265625, %v1902_v35  ;;  %v2032_v29 = vsel %vm1968_vm2, 0.72265625, %v1904_v26  ;;  %vm2094_vm3 = vcmp.gt.f32.partialorder %v3427_v5, 0.859375  ;;  %vm2096_vm4 = vcmp.gt.f32.partialorder %v3430_v20, 0.859375 }
 0x152   :  { %v2158_v6 = vsel %vm2094_vm3, 1.0, %v2030_v31  ;;  %v2160_v43 = vsel %vm2096_vm4, 1.0, %v2032_v29  ;;  %vm307_vm5 = vcmp.gt.f32.partialorder %v3434_v63, -0.84765625  ;;  %vm309_vm6 = vcmp.gt.f32.partialorder %v3437_v0, -0.84765625 }
 0x153   :  { %v2287_v33 = vmul.f32 %v3190_v30, %v2158_v6  ;;  %v2289_v34 = vmul.f32 %v3190_v30, %v2160_v43  ;;  %v371_v39 = vsel %vm307_vm5, -0.6953125, %v2685_v47  ;;  %v373_v40 = vsel %vm309_vm6, -0.6953125, %v2685_v47 }
 0x154   :  { %vm435_vm7 = vcmp.gt.f32.partialorder %v3434_v63, -0.609375  ;;  %vm437_vm11 = vcmp.gt.f32.partialorder %v3437_v0, -0.609375  ;;  %vm563_vm12 = vcmp.gt.f32.partialorder %v3434_v63, -0.45898438  ;;  %vm565_vm8 = vcmp.gt.f32.partialorder %v3437_v0, -0.45898438 }
 0x155   :  { %v2495_v48 = vpack.c.bf16 %v2289_v34, %v2287_v33  ;;  %v499_v49 = vsel %vm435_vm7, -0.5234375, %v371_v39  ;;  %v501_v51 = vsel %vm437_vm11, -0.5234375, %v373_v40  ;;  %vm691_vm15 = vcmp.gt.f32.partialorder %v3434_v63, -0.33984375 }
 0x156   :  { %v627_v52 = vsel %vm563_vm12, -0.39453125, %v499_v49  ;;  %v629_v54 = vsel %vm565_vm8, -0.39453125, %v501_v51  ;;  %vm693_vm0 = vcmp.gt.f32.partialorder %v3437_v0, -0.33984375  ;;  %vm819_vm9 = vcmp.gt.f32.partialorder %v3434_v63, -0.234375 }
 0x157   :  { %2552 = vmatpush1.bf16.msra.mxu1 %v2495_v48  ;;  %2496 = vmatpush1.bf16.msra.mxu0 %v2495_v48  ;;  %v755_v30 = vsel %vm691_vm15, -0.28515625, %v627_v52  ;;  %v757_v57 = vsel %vm693_vm0, -0.28515625, %v629_v54  ;;  %vm821_vm10 = vcmp.gt.f32.partialorder %v3437_v0, -0.234375  ;;  %vm947_vm13 = vcmp.gt.f32.partialorder %v3434_v63, -0.13769531 }
 0x158   :  { %v883_v58 = vsel %vm819_vm9, -0.18457031, %v755_v30  ;;  %v885_v45 = vsel %vm821_vm10, -0.18457031, %v757_v57  ;;  %vm949_vm14 = vcmp.gt.f32.partialorder %v3437_v0, -0.13769531  ;;  %vm1075_vm1 = vcmp.gt.f32.partialorder %v3434_v63, -0.045410156 }
 0x159   :  { %v1011_v23 = vsel %vm947_vm13, -0.09082031, %v883_v58  ;;  %v1013_v60 = vsel %vm949_vm14, -0.09082031, %v885_v45  ;;  %vm1077_vm2 = vcmp.gt.f32.partialorder %v3437_v0, -0.045410156  ;;  %vm1203_vm3 = vcmp.gt.f32.partialorder %v3434_v63, 0.039794922 }
 0x15a   :  { %v1139_v24 = vsel %vm1075_vm1, 0.0, %v1011_v23  ;;  %v1141_v61 = vsel %vm1077_vm2, 0.0, %v1013_v60  ;;  %vm1205_vm4 = vcmp.gt.f32.partialorder %v3437_v0, 0.039794922  ;;  %vm1331_vm5 = vcmp.gt.f32.partialorder %v3434_v63, 0.12011719 }
 0x15b   :  { %v1267_v5 = vsel %vm1203_vm3, 0.079589844, %v1139_v24  ;;  %v1269_v20 = vsel %vm1205_vm4, 0.079589844, %v1141_v61  ;;  %vm1333_vm6 = vcmp.gt.f32.partialorder %v3437_v0, 0.12011719  ;;  %vm1459_vm7 = vcmp.gt.f32.partialorder %v3434_v63, 0.203125 }
 0x15c   :  { %v1395_v36 = vsel %vm1331_vm5, 0.16113281, %v1267_v5  ;;  %v1397_v38 = vsel %vm1333_vm6, 0.16113281, %v1269_v20  ;;  %vm1461_vm11 = vcmp.gt.f32.partialorder %v3437_v0, 0.203125  ;;  %vm1587_vm12 = vcmp.gt.f32.partialorder %v3434_v63, 0.29296875 }
 0x15d   :  { %v1523_v28 = vsel %vm1459_vm7, 0.24609375, %v1395_v36  ;;  %v1525_v50 = vsel %vm1461_vm11, 0.24609375, %v1397_v38  ;;  %vm1589_vm8 = vcmp.gt.f32.partialorder %v3437_v0, 0.29296875  ;;  %vm1715_vm15 = vcmp.gt.f32.partialorder %v3434_v63, 0.390625 }
 0x15e   :  { %v1651_v2 = vsel %vm1587_vm12, 0.33789063, %v1523_v28  ;;  %v1653_v3 = vsel %vm1589_vm8, 0.33789063, %v1525_v50  ;;  %vm1717_vm0 = vcmp.gt.f32.partialorder %v3437_v0, 0.390625  ;;  %vm1843_vm9 = vcmp.gt.f32.partialorder %v3434_v63, 0.5 }
 0x15f   :  { %v1779_v4 = vsel %vm1715_vm15, 0.44140625, %v1651_v2  ;;  %v1781_v32 = vsel %vm1717_vm0, 0.44140625, %v1653_v3  ;;  %vm1845_vm10 = vcmp.gt.f32.partialorder %v3437_v0, 0.5  ;;  %vm1971_vm13 = vcmp.gt.f32.partialorder %v3434_v63, 0.640625 }
 0x160   :  { %v1907_v7 = vsel %vm1843_vm9, 0.5625, %v1779_v4  ;;  %v1909_v8 = vsel %vm1845_vm10, 0.5625, %v1781_v32  ;;  %vm1973_vm14 = vcmp.gt.f32.partialorder %v3437_v0, 0.640625  ;;  %vm2099_vm1 = vcmp.gt.f32.partialorder %v3434_v63, 0.859375 }
 0x161   :  { %v2035_v13 = vsel %vm1971_vm13, 0.72265625, %v1907_v7  ;;  %v2037_v14 = vsel %vm1973_vm14, 0.72265625, %v1909_v8  ;;  %vm2101_vm2 = vcmp.gt.f32.partialorder %v3437_v0, 0.859375  ;;  %v2217_v15 = vcombine.high %v2778_v25, %v2778_v25 }
 0x162   :  { %v2163_v16 = vsel %vm2099_vm1, 1.0, %v2035_v13  ;;  %v2165_v17 = vsel %vm2101_vm2, 1.0, %v2037_v14  ;;  %v3509_v53 = vmul.f32 %v2836_v56, %v96_v27  ;;  %v3512_v37 = vmul.f32 %v2836_v56, %v98_v44 }
 0x163   :  { %v3515_v18 = vrot.slane %v2217_v15, %v2761_v10  ;;  %v3518_v63 = vrot.slane %v2217_v15, %v2759_v9  ;;  %v3521_v41 = vmul.f32 %v2842_v59, %v101_v11  ;;  %v3524_v0 = vmul.f32 %v2842_v59, %v103_v12 }
 0x164   :  { %vm306_vm3 = vcmp.gt.f32.partialorder %v3509_v53, -0.84765625  ;;  %vm308_vm4 = vcmp.gt.f32.partialorder %v3512_v37, -0.84765625  ;;  %vm434_vm5 = vcmp.gt.f32.partialorder %v3509_v53, -0.609375  ;;  %vm436_vm6 = vcmp.gt.f32.partialorder %v3512_v37, -0.609375 }
 0x165   :  { %v2292_v25 = vmul.f32 %v3515_v18, %v2163_v16  ;;  %v2294_v42 = vmul.f32 %v3515_v18, %v2165_v17  ;;  %v370_v19 = vsel %vm306_vm3, -0.6953125, %v2685_v47  ;;  %v372_v21 = vsel %vm308_vm4, -0.6953125, %v2685_v47 }
 0x166   :  { %v498_v22 = vsel %vm434_vm5, -0.5234375, %v370_v19  ;;  %v500_v55 = vsel %vm436_vm6, -0.5234375, %v372_v21  ;;  %vm562_vm7 = vcmp.gt.f32.partialorder %v3509_v53, -0.45898438  ;;  %vm564_vm11 = vcmp.gt.f32.partialorder %v3512_v37, -0.45898438 }
 0x167   :  { %v2497_v35 = vpack.c.bf16 %v2294_v42, %v2292_v25  ;;  %v626_v26 = vsel %vm562_vm7, -0.39453125, %v498_v22  ;;  %v628_v31 = vsel %vm564_vm11, -0.39453125, %v500_v55  ;;  %vm690_vm12 = vcmp.gt.f32.partialorder %v3509_v53, -0.33984375 }
 0x168   :  { %vm692_vm8 = vcmp.gt.f32.partialorder %v3512_v37, -0.33984375  ;;  %v754_v29 = vsel %vm690_vm12, -0.28515625, %v626_v26  ;;  %vm818_vm15 = vcmp.gt.f32.partialorder %v3509_v53, -0.234375  ;;  %vm820_vm0 = vcmp.gt.f32.partialorder %v3512_v37, -0.234375 }
 0x169   :  { %2537 = vmatprep.subr.bf16.mxu1 %v2497_v35  ;;  %v756_v6 = vsel %vm692_vm8, -0.28515625, %v628_v31  ;;  %v882_v43 = vsel %vm818_vm15, -0.18457031, %v754_v29  ;;  %vm946_vm9 = vcmp.gt.f32.partialorder %v3509_v53, -0.13769531  ;;  %vm948_vm10 = vcmp.gt.f32.partialorder %v3512_v37, -0.13769531  ;;  %2498 = vmatprep.subr.bf16.mxu0 %v2497_v35  ;;  %v100_v31 = vld [vmem:[#allocation6 + $0x120] sm:$0xff]  ;;  %v102_v29 = vld [vmem:[#allocation6 + $0x130] sm:$0xff] }
 0x16a   :  { %v884_v33 = vsel %vm820_vm0, -0.18457031, %v756_v6  ;;  %v1010_v34 = vsel %vm946_vm9, -0.09082031, %v882_v43  ;;  %vm1074_vm13 = vcmp.gt.f32.partialorder %v3509_v53, -0.045410156  ;;  %vm1076_vm14 = vcmp.gt.f32.partialorder %v3512_v37, -0.045410156 }
 0x16b   :  { %v1012_v39 = vsel %vm948_vm10, -0.09082031, %v884_v33  ;;  %v1138_v40 = vsel %vm1074_vm13, 0.0, %v1010_v34  ;;  %vm1202_vm1 = vcmp.gt.f32.partialorder %v3509_v53, 0.039794922  ;;  %vm1204_vm2 = vcmp.gt.f32.partialorder %v3512_v37, 0.039794922  ;;  %v105_v33 = vld [vmem:[#allocation6 + $0x148] sm:$0xff]  ;;  %v107_v34 = vld [vmem:[#allocation6 + $0x158] sm:$0xff] }
 0x16c   :  { %v1140_v48 = vsel %vm1076_vm14, 0.0, %v1012_v39  ;;  %v1266_v49 = vsel %vm1202_vm1, 0.079589844, %v1138_v40  ;;  %vm1330_vm3 = vcmp.gt.f32.partialorder %v3509_v53, 0.12011719  ;;  %vm1332_vm4 = vcmp.gt.f32.partialorder %v3512_v37, 0.12011719 }
 0x16d   :  { %v1268_v51 = vsel %vm1204_vm2, 0.079589844, %v1140_v48  ;;  %v1394_v52 = vsel %vm1330_vm3, 0.16113281, %v1266_v49  ;;  %vm1458_vm5 = vcmp.gt.f32.partialorder %v3509_v53, 0.203125  ;;  %vm1460_vm6 = vcmp.gt.f32.partialorder %v3512_v37, 0.203125 }
 0x16e   :  { %v1396_v54 = vsel %vm1332_vm4, 0.16113281, %v1268_v51  ;;  %v1522_v30 = vsel %vm1458_vm5, 0.24609375, %v1394_v52  ;;  %vm1586_vm7 = vcmp.gt.f32.partialorder %v3509_v53, 0.29296875  ;;  %vm1588_vm11 = vcmp.gt.f32.partialorder %v3512_v37, 0.29296875 }
 0x16f   :  { %v1524_v57 = vsel %vm1460_vm6, 0.24609375, %v1396_v54  ;;  %v1650_v58 = vsel %vm1586_vm7, 0.33789063, %v1522_v30  ;;  %vm1714_vm12 = vcmp.gt.f32.partialorder %v3509_v53, 0.390625  ;;  %vm1716_vm8 = vcmp.gt.f32.partialorder %v3512_v37, 0.390625 }
 0x170   :  { %v1652_v45 = vsel %vm1588_vm11, 0.33789063, %v1524_v57  ;;  %v1778_v23 = vsel %vm1714_vm12, 0.44140625, %v1650_v58  ;;  %vm1842_vm15 = vcmp.gt.f32.partialorder %v3509_v53, 0.5  ;;  %vm1844_vm0 = vcmp.gt.f32.partialorder %v3512_v37, 0.5 }
 0x171   :  { %v1780_v60 = vsel %vm1716_vm8, 0.44140625, %v1652_v45  ;;  %v1906_v24 = vsel %vm1842_vm15, 0.5625, %v1778_v23  ;;  %vm1970_vm9 = vcmp.gt.f32.partialorder %v3509_v53, 0.640625  ;;  %vm1972_vm10 = vcmp.gt.f32.partialorder %v3512_v37, 0.640625 }
 0x172   :  { %v1908_v61 = vsel %vm1844_vm0, 0.5625, %v1780_v60  ;;  %v2034_v5 = vsel %vm1970_vm9, 0.72265625, %v1906_v24  ;;  %vm2098_vm13 = vcmp.gt.f32.partialorder %v3509_v53, 0.859375  ;;  %vm2100_vm14 = vcmp.gt.f32.partialorder %v3512_v37, 0.859375 }
 0x173   :  { %v2036_v20 = vsel %vm1972_vm10, 0.72265625, %v1908_v61  ;;  %v2162_v36 = vsel %vm2098_vm13, 1.0, %v2034_v5  ;;  %vm311_vm1 = vcmp.gt.f32.partialorder %v3521_v41, -0.84765625  ;;  %vm313_vm2 = vcmp.gt.f32.partialorder %v3524_v0, -0.84765625 }
 0x174   :  { %v2164_v38 = vsel %vm2100_vm14, 1.0, %v2036_v20  ;;  %v2291_v28 = vmul.f32 %v3518_v63, %v2162_v36  ;;  %v375_v50 = vsel %vm311_vm1, -0.6953125, %v2685_v47  ;;  %v377_v2 = vsel %vm313_vm2, -0.6953125, %v2685_v47 }
 0x175   :  { %v2293_v3 = vmul.f32 %v3518_v63, %v2164_v38  ;;  %vm439_vm3 = vcmp.gt.f32.partialorder %v3521_v41, -0.609375  ;;  %vm441_vm4 = vcmp.gt.f32.partialorder %v3524_v0, -0.609375  ;;  %vm567_vm5 = vcmp.gt.f32.partialorder %v3521_v41, -0.45898438 }
 0x176   :  { %v503_v4 = vsel %vm439_vm3, -0.5234375, %v375_v50  ;;  %v505_v32 = vsel %vm441_vm4, -0.5234375, %v377_v2  ;;  %vm569_vm6 = vcmp.gt.f32.partialorder %v3524_v0, -0.45898438  ;;  %vm695_vm7 = vcmp.gt.f32.partialorder %v3521_v41, -0.33984375 }
 0x177   :  { %v2499_v27 = vpack.c.bf16 %v2293_v3, %v2291_v28  ;;  %v631_v44 = vsel %vm567_vm5, -0.39453125, %v503_v4  ;;  %v633_v7 = vsel %vm569_vm6, -0.39453125, %v505_v32  ;;  %vm697_vm11 = vcmp.gt.f32.partialorder %v3524_v0, -0.33984375 }
 0x178   :  { %v759_v8 = vsel %vm695_vm7, -0.28515625, %v631_v44  ;;  %v761_v11 = vsel %vm697_vm11, -0.28515625, %v633_v7  ;;  %vm823_vm12 = vcmp.gt.f32.partialorder %v3521_v41, -0.234375  ;;  %vm825_vm8 = vcmp.gt.f32.partialorder %v3524_v0, -0.234375 }
 0x179   :  { %2553 = vmatpush1.bf16.msra.mxu1 %v2499_v27  ;;  %2500 = vmatpush1.bf16.msra.mxu0 %v2499_v27  ;;  %v887_v12 = vsel %vm823_vm12, -0.18457031, %v759_v8  ;;  %v889_v13 = vsel %vm825_vm8, -0.18457031, %v761_v11  ;;  %vm951_vm15 = vcmp.gt.f32.partialorder %v3521_v41, -0.13769531  ;;  %vm953_vm0 = vcmp.gt.f32.partialorder %v3524_v0, -0.13769531 }
 0x17a   :  { %v1015_v14 = vsel %vm951_vm15, -0.09082031, %v887_v12  ;;  %v1017_v15 = vsel %vm953_vm0, -0.09082031, %v889_v13  ;;  %vm1079_vm9 = vcmp.gt.f32.partialorder %v3521_v41, -0.045410156  ;;  %vm1081_vm10 = vcmp.gt.f32.partialorder %v3524_v0, -0.045410156 }
 0x17b   :  { %v1143_v16 = vsel %vm1079_vm9, 0.0, %v1015_v14  ;;  %v1145_v17 = vsel %vm1081_vm10, 0.0, %v1017_v15  ;;  %vm1207_vm13 = vcmp.gt.f32.partialorder %v3521_v41, 0.039794922  ;;  %vm1209_vm14 = vcmp.gt.f32.partialorder %v3524_v0, 0.039794922 }
 0x17c   :  { %v1271_v53 = vsel %vm1207_vm13, 0.079589844, %v1143_v16  ;;  %v1273_v37 = vsel %vm1209_vm14, 0.079589844, %v1145_v17  ;;  %vm1335_vm1 = vcmp.gt.f32.partialorder %v3521_v41, 0.12011719  ;;  %vm1337_vm2 = vcmp.gt.f32.partialorder %v3524_v0, 0.12011719 }
 0x17d   :  { %v1399_v25 = vsel %vm1335_vm1, 0.16113281, %v1271_v53  ;;  %v1401_v42 = vsel %vm1337_vm2, 0.16113281, %v1273_v37  ;;  %vm1463_vm3 = vcmp.gt.f32.partialorder %v3521_v41, 0.203125  ;;  %vm1465_vm4 = vcmp.gt.f32.partialorder %v3524_v0, 0.203125 }
 0x17e   :  { %v1527_v19 = vsel %vm1463_vm3, 0.24609375, %v1399_v25  ;;  %v1529_v21 = vsel %vm1465_vm4, 0.24609375, %v1401_v42  ;;  %vm1591_vm5 = vcmp.gt.f32.partialorder %v3521_v41, 0.29296875  ;;  %vm1593_vm6 = vcmp.gt.f32.partialorder %v3524_v0, 0.29296875 }
 0x17f   :  { %v1655_v22 = vsel %vm1591_vm5, 0.33789063, %v1527_v19  ;;  %v1657_v55 = vsel %vm1593_vm6, 0.33789063, %v1529_v21  ;;  %vm1719_vm7 = vcmp.gt.f32.partialorder %v3521_v41, 0.390625  ;;  %vm1721_vm11 = vcmp.gt.f32.partialorder %v3524_v0, 0.390625 }
 0x180   :  { %v1783_v35 = vsel %vm1719_vm7, 0.44140625, %v1655_v22  ;;  %v1785_v26 = vsel %vm1721_vm11, 0.44140625, %v1657_v55  ;;  %vm1847_vm12 = vcmp.gt.f32.partialorder %v3521_v41, 0.5  ;;  %vm1849_vm8 = vcmp.gt.f32.partialorder %v3524_v0, 0.5 }
 0x181   :  { %v1911_v6 = vsel %vm1847_vm12, 0.5625, %v1783_v35  ;;  %v1913_v43 = vsel %vm1849_vm8, 0.5625, %v1785_v26  ;;  %vm1975_vm15 = vcmp.gt.f32.partialorder %v3521_v41, 0.640625  ;;  %vm1977_vm0 = vcmp.gt.f32.partialorder %v3524_v0, 0.640625 }
 0x182   :  { %v2039_v39 = vsel %vm1975_vm15, 0.72265625, %v1911_v6  ;;  %v2041_v40 = vsel %vm1977_vm0, 0.72265625, %v1913_v43  ;;  %vm2103_vm9 = vcmp.gt.f32.partialorder %v3521_v41, 0.859375  ;;  %vm2105_vm10 = vcmp.gt.f32.partialorder %v3524_v0, 0.859375 }
 0x183   :  { %v2167_v48 = vsel %vm2103_vm9, 1.0, %v2039_v39  ;;  %v2169_v49 = vsel %vm2105_vm10, 1.0, %v2041_v40  ;;  %v3595_v51 = vmul.f32 %v2836_v56, %v100_v31  ;;  %v3598_v52 = vmul.f32 %v2836_v56, %v102_v29 }
 0x184   :  { %v2296_v54 = vmul.f32 %v3515_v18, %v2167_v48  ;;  %v2298_v30 = vmul.f32 %v3515_v18, %v2169_v49  ;;  %v3603_v57 = vmul.f32 %v2842_v59, %v105_v33  ;;  %v3606_v58 = vmul.f32 %v2842_v59, %v107_v34 }
 0x185   :  { %vm310_vm13 = vcmp.gt.f32.partialorder %v3595_v51, -0.84765625  ;;  %vm312_vm14 = vcmp.gt.f32.partialorder %v3598_v52, -0.84765625  ;;  %vm438_vm1 = vcmp.gt.f32.partialorder %v3595_v51, -0.609375  ;;  %vm440_vm2 = vcmp.gt.f32.partialorder %v3598_v52, -0.609375 }
 0x186   :  { %v2501_v41 = vpack.c.bf16 %v2298_v30, %v2296_v54  ;;  %v374_v0 = vsel %vm310_vm13, -0.6953125, %v2685_v47  ;;  %v376_v45 = vsel %vm312_vm14, -0.6953125, %v2685_v47  ;;  %vm566_vm3 = vcmp.gt.f32.partialorder %v3595_v51, -0.45898438 }
 0x187   :  { %v502_v23 = vsel %vm438_vm1, -0.5234375, %v374_v0  ;;  %v504_v60 = vsel %vm440_vm2, -0.5234375, %v376_v45  ;;  %vm568_vm4 = vcmp.gt.f32.partialorder %v3598_v52, -0.45898438  ;;  %vm694_vm5 = vcmp.gt.f32.partialorder %v3595_v51, -0.33984375 }
 0x188   :  { %2538 = vmatprep.subr.bf16.mxu1 %v2501_v41  ;;  %v630_v24 = vsel %vm566_vm3, -0.39453125, %v502_v23  ;;  %v632_v61 = vsel %vm568_vm4, -0.39453125, %v504_v60  ;;  %vm696_vm6 = vcmp.gt.f32.partialorder %v3598_v52, -0.33984375  ;;  %vm822_vm7 = vcmp.gt.f32.partialorder %v3595_v51, -0.234375  ;;  %2502 = vmatprep.subr.bf16.mxu0 %v2501_v41 }
 0x189   :  { %v758_v5 = vsel %vm694_vm5, -0.28515625, %v630_v24  ;;  %v760_v20 = vsel %vm696_vm6, -0.28515625, %v632_v61  ;;  %vm824_vm11 = vcmp.gt.f32.partialorder %v3598_v52, -0.234375  ;;  %vm950_vm12 = vcmp.gt.f32.partialorder %v3595_v51, -0.13769531  ;;  %v104_v24 = vld [vmem:[#allocation6 + $0x140] sm:$0xff] }
 0x18a   :  { %v886_v36 = vsel %vm822_vm7, -0.18457031, %v758_v5  ;;  %v888_v38 = vsel %vm824_vm11, -0.18457031, %v760_v20  ;;  %vm952_vm8 = vcmp.gt.f32.partialorder %v3598_v52, -0.13769531  ;;  %vm1078_vm15 = vcmp.gt.f32.partialorder %v3595_v51, -0.045410156  ;;  %v106_v20 = vld [vmem:[#allocation6 + $0x150] sm:$0xff] }
 0x18b   :  { %v1014_v28 = vsel %vm950_vm12, -0.09082031, %v886_v36  ;;  %v1016_v50 = vsel %vm952_vm8, -0.09082031, %v888_v38  ;;  %vm1080_vm0 = vcmp.gt.f32.partialorder %v3598_v52, -0.045410156  ;;  %vm1206_vm9 = vcmp.gt.f32.partialorder %v3595_v51, 0.039794922  ;;  %v109_v36 = vld [vmem:[#allocation6 + $0x168] sm:$0xff] }
 0x18c   :  { %v1142_v2 = vsel %vm1078_vm15, 0.0, %v1014_v28  ;;  %v1144_v3 = vsel %vm1080_vm0, 0.0, %v1016_v50  ;;  %vm1208_vm10 = vcmp.gt.f32.partialorder %v3598_v52, 0.039794922  ;;  %vm1334_vm13 = vcmp.gt.f32.partialorder %v3595_v51, 0.12011719 }
 0x18d   :  { %v1270_v4 = vsel %vm1206_vm9, 0.079589844, %v1142_v2  ;;  %v1272_v32 = vsel %vm1208_vm10, 0.079589844, %v1144_v3  ;;  %vm1336_vm14 = vcmp.gt.f32.partialorder %v3598_v52, 0.12011719  ;;  %vm1462_vm1 = vcmp.gt.f32.partialorder %v3595_v51, 0.203125 }
 0x18e   :  { %v1398_v27 = vsel %vm1334_vm13, 0.16113281, %v1270_v4  ;;  %v1400_v44 = vsel %vm1336_vm14, 0.16113281, %v1272_v32  ;;  %vm1464_vm2 = vcmp.gt.f32.partialorder %v3598_v52, 0.203125  ;;  %vm1590_vm3 = vcmp.gt.f32.partialorder %v3595_v51, 0.29296875 }
 0x18f   :  { %v1526_v7 = vsel %vm1462_vm1, 0.24609375, %v1398_v27  ;;  %v1528_v8 = vsel %vm1464_vm2, 0.24609375, %v1400_v44  ;;  %vm1592_vm4 = vcmp.gt.f32.partialorder %v3598_v52, 0.29296875  ;;  %vm1718_vm5 = vcmp.gt.f32.partialorder %v3595_v51, 0.390625 }
 0x190   :  { %v1654_v11 = vsel %vm1590_vm3, 0.33789063, %v1526_v7  ;;  %v1656_v12 = vsel %vm1592_vm4, 0.33789063, %v1528_v8  ;;  %vm1720_vm6 = vcmp.gt.f32.partialorder %v3598_v52, 0.390625  ;;  %vm1846_vm7 = vcmp.gt.f32.partialorder %v3595_v51, 0.5 }
 0x191   :  { %v1782_v13 = vsel %vm1718_vm5, 0.44140625, %v1654_v11  ;;  %v1784_v14 = vsel %vm1720_vm6, 0.44140625, %v1656_v12  ;;  %vm1848_vm11 = vcmp.gt.f32.partialorder %v3598_v52, 0.5  ;;  %vm1974_vm12 = vcmp.gt.f32.partialorder %v3595_v51, 0.640625 }
 0x192   :  { %v1910_v15 = vsel %vm1846_vm7, 0.5625, %v1782_v13  ;;  %v1912_v16 = vsel %vm1848_vm11, 0.5625, %v1784_v14  ;;  %vm1976_vm8 = vcmp.gt.f32.partialorder %v3598_v52, 0.640625  ;;  %vm2102_vm15 = vcmp.gt.f32.partialorder %v3595_v51, 0.859375 }
 0x193   :  { %v2038_v17 = vsel %vm1974_vm12, 0.72265625, %v1910_v15  ;;  %v2040_v53 = vsel %vm1976_vm8, 0.72265625, %v1912_v16  ;;  %vm2104_vm0 = vcmp.gt.f32.partialorder %v3598_v52, 0.859375  ;;  %vm315_vm9 = vcmp.gt.f32.partialorder %v3603_v57, -0.84765625 }
 0x194   :  { %v2166_v37 = vsel %vm2102_vm15, 1.0, %v2038_v17  ;;  %v2168_v25 = vsel %vm2104_vm0, 1.0, %v2040_v53  ;;  %vm317_vm10 = vcmp.gt.f32.partialorder %v3606_v58, -0.84765625  ;;  %v379_v42 = vsel %vm315_vm9, -0.6953125, %v2685_v47 }
 0x195   :  { %v2295_v19 = vmul.f32 %v3518_v63, %v2166_v37  ;;  %v2297_v21 = vmul.f32 %v3518_v63, %v2168_v25  ;;  %v381_v22 = vsel %vm317_vm10, -0.6953125, %v2685_v47  ;;  %vm443_vm13 = vcmp.gt.f32.partialorder %v3603_v57, -0.609375 }
 0x196   :  { %vm445_vm14 = vcmp.gt.f32.partialorder %v3606_v58, -0.609375  ;;  %v507_v55 = vsel %vm443_vm13, -0.5234375, %v379_v42  ;;  %vm571_vm1 = vcmp.gt.f32.partialorder %v3603_v57, -0.45898438  ;;  %vm573_vm2 = vcmp.gt.f32.partialorder %v3606_v58, -0.45898438 }
 0x197   :  { %v2503_v35 = vpack.c.bf16 %v2297_v21, %v2295_v19  ;;  %v509_v26 = vsel %vm445_vm14, -0.5234375, %v381_v22  ;;  %v635_v31 = vsel %vm571_vm1, -0.39453125, %v507_v55  ;;  %vm699_vm3 = vcmp.gt.f32.partialorder %v3603_v57, -0.33984375 }
 0x198   :  { %v637_v29 = vsel %vm573_vm2, -0.39453125, %v509_v26  ;;  %vm701_vm4 = vcmp.gt.f32.partialorder %v3606_v58, -0.33984375  ;;  %v763_v6 = vsel %vm699_vm3, -0.28515625, %v635_v31  ;;  %vm827_vm5 = vcmp.gt.f32.partialorder %v3603_v57, -0.234375 }
 0x199   :  { %2554 = vmatpush1.bf16.msra.mxu1 %v2503_v35  ;;  %2504 = vmatpush1.bf16.msra.mxu0 %v2503_v35  ;;  %v765_v43 = vsel %vm701_vm4, -0.28515625, %v637_v29  ;;  %vm829_vm6 = vcmp.gt.f32.partialorder %v3606_v58, -0.234375  ;;  %v891_v33 = vsel %vm827_vm5, -0.18457031, %v763_v6  ;;  %vm955_vm7 = vcmp.gt.f32.partialorder %v3603_v57, -0.13769531  ;;  %v111_v6 = vld [vmem:[#allocation6 + $0x178] sm:$0xff] }
 0x19a   :  { %v893_v34 = vsel %vm829_vm6, -0.18457031, %v765_v43  ;;  %vm957_vm11 = vcmp.gt.f32.partialorder %v3606_v58, -0.13769531  ;;  %v1019_v39 = vsel %vm955_vm7, -0.09082031, %v891_v33  ;;  %vm1083_vm12 = vcmp.gt.f32.partialorder %v3603_v57, -0.045410156 }
 0x19b   :  { %v1021_v40 = vsel %vm957_vm11, -0.09082031, %v893_v34  ;;  %vm1085_vm8 = vcmp.gt.f32.partialorder %v3606_v58, -0.045410156  ;;  %v1147_v48 = vsel %vm1083_vm12, 0.0, %v1019_v39  ;;  %vm1211_vm15 = vcmp.gt.f32.partialorder %v3603_v57, 0.039794922 }
 0x19c   :  { %v1149_v49 = vsel %vm1085_vm8, 0.0, %v1021_v40  ;;  %vm1213_vm0 = vcmp.gt.f32.partialorder %v3606_v58, 0.039794922  ;;  %v1275_v51 = vsel %vm1211_vm15, 0.079589844, %v1147_v48  ;;  %vm1339_vm9 = vcmp.gt.f32.partialorder %v3603_v57, 0.12011719 }
 0x19d   :  { %v1277_v52 = vsel %vm1213_vm0, 0.079589844, %v1149_v49  ;;  %vm1341_vm10 = vcmp.gt.f32.partialorder %v3606_v58, 0.12011719  ;;  %v1403_v54 = vsel %vm1339_vm9, 0.16113281, %v1275_v51  ;;  %vm1467_vm13 = vcmp.gt.f32.partialorder %v3603_v57, 0.203125 }
 0x19e   :  { %v1405_v30 = vsel %vm1341_vm10, 0.16113281, %v1277_v52  ;;  %vm1469_vm14 = vcmp.gt.f32.partialorder %v3606_v58, 0.203125  ;;  %v1531_v41 = vsel %vm1467_vm13, 0.24609375, %v1403_v54  ;;  %vm1595_vm1 = vcmp.gt.f32.partialorder %v3603_v57, 0.29296875 }
 0x19f   :  { %v1533_v0 = vsel %vm1469_vm14, 0.24609375, %v1405_v30  ;;  %vm1597_vm2 = vcmp.gt.f32.partialorder %v3606_v58, 0.29296875  ;;  %v1659_v45 = vsel %vm1595_vm1, 0.33789063, %v1531_v41  ;;  %vm1723_vm3 = vcmp.gt.f32.partialorder %v3603_v57, 0.390625 }
 0x1a0   :  { %v1661_v23 = vsel %vm1597_vm2, 0.33789063, %v1533_v0  ;;  %vm1725_vm4 = vcmp.gt.f32.partialorder %v3606_v58, 0.390625  ;;  %v1787_v60 = vsel %vm1723_vm3, 0.44140625, %v1659_v45  ;;  %vm1851_vm5 = vcmp.gt.f32.partialorder %v3603_v57, 0.5 }
 0x1a1   :  { %v1789_v61 = vsel %vm1725_vm4, 0.44140625, %v1661_v23  ;;  %vm1853_vm6 = vcmp.gt.f32.partialorder %v3606_v58, 0.5  ;;  %v1915_v5 = vsel %vm1851_vm5, 0.5625, %v1787_v60  ;;  %vm1979_vm7 = vcmp.gt.f32.partialorder %v3603_v57, 0.640625 }
 0x1a2   :  { %v1917_v38 = vsel %vm1853_vm6, 0.5625, %v1789_v61  ;;  %vm1981_vm11 = vcmp.gt.f32.partialorder %v3606_v58, 0.640625  ;;  %v2043_v28 = vsel %vm1979_vm7, 0.72265625, %v1915_v5  ;;  %vm2107_vm12 = vcmp.gt.f32.partialorder %v3603_v57, 0.859375 }
 0x1a3   :  { %v2045_v50 = vsel %vm1981_vm11, 0.72265625, %v1917_v38  ;;  %vm2109_vm8 = vcmp.gt.f32.partialorder %v3606_v58, 0.859375  ;;  %v2171_v2 = vsel %vm2107_vm12, 1.0, %v2043_v28  ;;  %v3675_v3 = vmul.f32 %v2836_v56, %v104_v24 }
 0x1a4   :  { %v2173_v4 = vsel %vm2109_vm8, 1.0, %v2045_v50  ;;  %v2300_v32 = vmul.f32 %v3515_v18, %v2171_v2  ;;  %v3679_v27 = vmul.f32 %v2836_v56, %v106_v20  ;;  %v3682_v44 = vmul.f32 %v2842_v59, %v109_v36 }
 0x1a5   :  { %v2302_v7 = vmul.f32 %v3515_v18, %v2173_v4  ;;  %vm314_vm15 = vcmp.gt.f32.partialorder %v3675_v3, -0.84765625  ;;  %vm442_vm0 = vcmp.gt.f32.partialorder %v3675_v3, -0.609375  ;;  %vm570_vm9 = vcmp.gt.f32.partialorder %v3675_v3, -0.45898438 }
 0x1a6   :  { %vm316_vm10 = vcmp.gt.f32.partialorder %v3679_v27, -0.84765625  ;;  %v378_v57 = vsel %vm314_vm15, -0.6953125, %v2685_v47  ;;  %vm444_vm13 = vcmp.gt.f32.partialorder %v3679_v27, -0.609375  ;;  %vm572_vm14 = vcmp.gt.f32.partialorder %v3679_v27, -0.45898438 }
 0x1a7   :  { %v2505_v58 = vpack.c.bf16 %v2302_v7, %v2300_v32  ;;  %v380_v8 = vsel %vm316_vm10, -0.6953125, %v2685_v47  ;;  %v506_v11 = vsel %vm442_vm0, -0.5234375, %v378_v57  ;;  %vm698_vm1 = vcmp.gt.f32.partialorder %v3675_v3, -0.33984375 }
 0x1a8   :  { %v508_v12 = vsel %vm444_vm13, -0.5234375, %v380_v8  ;;  %v634_v13 = vsel %vm570_vm9, -0.39453125, %v506_v11  ;;  %vm700_vm2 = vcmp.gt.f32.partialorder %v3679_v27, -0.33984375  ;;  %vm826_vm3 = vcmp.gt.f32.partialorder %v3675_v3, -0.234375 }
 0x1a9   :  { %2539 = vmatprep.subr.bf16.mxu1 %v2505_v58  ;;  %v636_v14 = vsel %vm572_vm14, -0.39453125, %v508_v12  ;;  %v762_v15 = vsel %vm698_vm1, -0.28515625, %v634_v13  ;;  %vm828_vm4 = vcmp.gt.f32.partialorder %v3679_v27, -0.234375  ;;  %vm954_vm5 = vcmp.gt.f32.partialorder %v3675_v3, -0.13769531  ;;  %2506 = vmatprep.subr.bf16.mxu0 %v2505_v58 }
 0x1aa   :  { %v764_v16 = vsel %vm700_vm2, -0.28515625, %v636_v14  ;;  %v890_v17 = vsel %vm826_vm3, -0.18457031, %v762_v15  ;;  %vm956_vm6 = vcmp.gt.f32.partialorder %v3679_v27, -0.13769531  ;;  %vm1082_vm7 = vcmp.gt.f32.partialorder %v3675_v3, -0.045410156  ;;  %v108_v14 = vld [vmem:[#allocation6 + $0x160] sm:$0xff]  ;;  %v110_v15 = vld [vmem:[#allocation6 + $0x170] sm:$0xff] }
 0x1ab   :  { %v892_v53 = vsel %vm828_vm4, -0.18457031, %v764_v16  ;;  %v1018_v37 = vsel %vm954_vm5, -0.09082031, %v890_v17  ;;  %vm1084_vm11 = vcmp.gt.f32.partialorder %v3679_v27, -0.045410156  ;;  %vm1210_vm12 = vcmp.gt.f32.partialorder %v3675_v3, 0.039794922 }
 0x1ac   :  { %v1020_v25 = vsel %vm956_vm6, -0.09082031, %v892_v53  ;;  %v1146_v42 = vsel %vm1082_vm7, 0.0, %v1018_v37  ;;  %vm1212_vm8 = vcmp.gt.f32.partialorder %v3679_v27, 0.039794922  ;;  %vm1338_vm15 = vcmp.gt.f32.partialorder %v3675_v3, 0.12011719  ;;  %v113_v53 = vld [vmem:[#allocation6 + $0x188] sm:$0xff]  ;;  %v115_v37 = vld [vmem:[#allocation6 + $0x198] sm:$0xff] }
 0x1ad   :  { %v1148_v19 = vsel %vm1084_vm11, 0.0, %v1020_v25  ;;  %v1274_v21 = vsel %vm1210_vm12, 0.079589844, %v1146_v42  ;;  %vm1340_vm0 = vcmp.gt.f32.partialorder %v3679_v27, 0.12011719  ;;  %vm1466_vm9 = vcmp.gt.f32.partialorder %v3675_v3, 0.203125 }
 0x1ae   :  { %v1276_v22 = vsel %vm1212_vm8, 0.079589844, %v1148_v19  ;;  %v1402_v55 = vsel %vm1338_vm15, 0.16113281, %v1274_v21  ;;  %vm1468_vm10 = vcmp.gt.f32.partialorder %v3679_v27, 0.203125  ;;  %vm1594_vm13 = vcmp.gt.f32.partialorder %v3675_v3, 0.29296875 }
 0x1af   :  { %v1404_v35 = vsel %vm1340_vm0, 0.16113281, %v1276_v22  ;;  %v1530_v26 = vsel %vm1466_vm9, 0.24609375, %v1402_v55  ;;  %vm1596_vm14 = vcmp.gt.f32.partialorder %v3679_v27, 0.29296875  ;;  %vm1722_vm1 = vcmp.gt.f32.partialorder %v3675_v3, 0.390625 }
 0x1b0   :  { %v1532_v31 = vsel %vm1468_vm10, 0.24609375, %v1404_v35  ;;  %v1658_v29 = vsel %vm1594_vm13, 0.33789063, %v1530_v26  ;;  %vm1724_vm2 = vcmp.gt.f32.partialorder %v3679_v27, 0.390625  ;;  %vm1850_vm3 = vcmp.gt.f32.partialorder %v3675_v3, 0.5 }
 0x1b1   :  { %v1660_v43 = vsel %vm1596_vm14, 0.33789063, %v1532_v31  ;;  %v1786_v33 = vsel %vm1722_vm1, 0.44140625, %v1658_v29  ;;  %vm1852_vm4 = vcmp.gt.f32.partialorder %v3679_v27, 0.5  ;;  %vm1978_vm5 = vcmp.gt.f32.partialorder %v3675_v3, 0.640625 }
 0x1b2   :  { %v1788_v34 = vsel %vm1724_vm2, 0.44140625, %v1660_v43  ;;  %v1914_v39 = vsel %vm1850_vm3, 0.5625, %v1786_v33  ;;  %vm1980_vm6 = vcmp.gt.f32.partialorder %v3679_v27, 0.640625  ;;  %vm2106_vm7 = vcmp.gt.f32.partialorder %v3675_v3, 0.859375 }
 0x1b3   :  { %v1916_v40 = vsel %vm1852_vm4, 0.5625, %v1788_v34  ;;  %v2042_v48 = vsel %vm1978_vm5, 0.72265625, %v1914_v39  ;;  %vm2108_vm11 = vcmp.gt.f32.partialorder %v3679_v27, 0.859375  ;;  %v3718_v49 = vmul.f32 %v2842_v59, %v111_v6 }
 0x1b4   :  { %v2044_v51 = vsel %vm1980_vm6, 0.72265625, %v1916_v40  ;;  %v2170_v52 = vsel %vm2106_vm7, 1.0, %v2042_v48  ;;  %vm319_vm12 = vcmp.gt.f32.partialorder %v3682_v44, -0.84765625  ;;  %vm447_vm8 = vcmp.gt.f32.partialorder %v3682_v44, -0.609375 }
 0x1b5   :  { %v2172_v54 = vsel %vm2108_vm11, 1.0, %v2044_v51  ;;  %v2299_v30 = vmul.f32 %v3518_v63, %v2170_v52  ;;  %vm321_vm15 = vcmp.gt.f32.partialorder %v3718_v49, -0.84765625  ;;  %v383_v41 = vsel %vm319_vm12, -0.6953125, %v2685_v47 }
 0x1b6   :  { %v2301_v0 = vmul.f32 %v3518_v63, %v2172_v54  ;;  %v385_v45 = vsel %vm321_vm15, -0.6953125, %v2685_v47  ;;  %vm449_vm0 = vcmp.gt.f32.partialorder %v3718_v49, -0.609375  ;;  %v511_v59 = vsel %vm447_vm8, -0.5234375, %v383_v41 }
 0x1b7   :  { %v513_v23 = vsel %vm449_vm0, -0.5234375, %v385_v45  ;;  %vm575_vm9 = vcmp.gt.f32.partialorder %v3682_v44, -0.45898438  ;;  %vm577_vm10 = vcmp.gt.f32.partialorder %v3718_v49, -0.45898438  ;;  %vm703_vm13 = vcmp.gt.f32.partialorder %v3682_v44, -0.33984375 }
 0x1b8   :  { %v2507_v60 = vpack.c.bf16 %v2301_v0, %v2299_v30  ;;  %v639_v24 = vsel %vm575_vm9, -0.39453125, %v511_v59  ;;  %v641_v61 = vsel %vm577_vm10, -0.39453125, %v513_v23  ;;  %vm705_vm14 = vcmp.gt.f32.partialorder %v3718_v49, -0.33984375 }
 0x1b9   :  { %v767_v5 = vsel %vm703_vm13, -0.28515625, %v639_v24  ;;  %v769_v20 = vsel %vm705_vm14, -0.28515625, %v641_v61  ;;  %vm831_vm1 = vcmp.gt.f32.partialorder %v3682_v44, -0.234375  ;;  %vm833_vm2 = vcmp.gt.f32.partialorder %v3718_v49, -0.234375 }
 0x1ba   :  { %2555 = vmatpush1.bf16.msra.mxu1 %v2507_v60  ;;  %2508 = vmatpush1.bf16.msra.mxu0 %v2507_v60  ;;  %v895_v36 = vsel %vm831_vm1, -0.18457031, %v767_v5  ;;  %v897_v38 = vsel %vm833_vm2, -0.18457031, %v769_v20  ;;  %vm959_vm3 = vcmp.gt.f32.partialorder %v3682_v44, -0.13769531  ;;  %vm961_vm4 = vcmp.gt.f32.partialorder %v3718_v49, -0.13769531 }
 0x1bb   :  { %v1023_v28 = vsel %vm959_vm3, -0.09082031, %v895_v36  ;;  %v1025_v50 = vsel %vm961_vm4, -0.09082031, %v897_v38  ;;  %vm1087_vm5 = vcmp.gt.f32.partialorder %v3682_v44, -0.045410156  ;;  %vm1089_vm6 = vcmp.gt.f32.partialorder %v3718_v49, -0.045410156 }
 0x1bc   :  { %v1151_v2 = vsel %vm1087_vm5, 0.0, %v1023_v28  ;;  %v1153_v3 = vsel %vm1089_vm6, 0.0, %v1025_v50  ;;  %vm1215_vm7 = vcmp.gt.f32.partialorder %v3682_v44, 0.039794922  ;;  %vm1217_vm11 = vcmp.gt.f32.partialorder %v3718_v49, 0.039794922 }
 0x1bd   :  { %v1279_v4 = vsel %vm1215_vm7, 0.079589844, %v1151_v2  ;;  %v1281_v32 = vsel %vm1217_vm11, 0.079589844, %v1153_v3  ;;  %vm1343_vm12 = vcmp.gt.f32.partialorder %v3682_v44, 0.12011719  ;;  %vm1345_vm8 = vcmp.gt.f32.partialorder %v3718_v49, 0.12011719 }
 0x1be   :  { %v1407_v27 = vsel %vm1343_vm12, 0.16113281, %v1279_v4  ;;  %v1409_v7 = vsel %vm1345_vm8, 0.16113281, %v1281_v32  ;;  %vm1471_vm15 = vcmp.gt.f32.partialorder %v3682_v44, 0.203125  ;;  %vm1473_vm0 = vcmp.gt.f32.partialorder %v3718_v49, 0.203125 }
 0x1bf   :  { %v1535_v57 = vsel %vm1471_vm15, 0.24609375, %v1407_v27  ;;  %v1537_v58 = vsel %vm1473_vm0, 0.24609375, %v1409_v7  ;;  %vm1599_vm9 = vcmp.gt.f32.partialorder %v3682_v44, 0.29296875  ;;  %vm1601_vm10 = vcmp.gt.f32.partialorder %v3718_v49, 0.29296875 }
 0x1c0   :  { %v1663_v8 = vsel %vm1599_vm9, 0.33789063, %v1535_v57  ;;  %v1665_v11 = vsel %vm1601_vm10, 0.33789063, %v1537_v58  ;;  %vm1727_vm13 = vcmp.gt.f32.partialorder %v3682_v44, 0.390625  ;;  %vm1729_vm14 = vcmp.gt.f32.partialorder %v3718_v49, 0.390625 }
 0x1c1   :  { %v1791_v12 = vsel %vm1727_vm13, 0.44140625, %v1663_v8  ;;  %v1793_v13 = vsel %vm1729_vm14, 0.44140625, %v1665_v11  ;;  %vm1855_vm1 = vcmp.gt.f32.partialorder %v3682_v44, 0.5  ;;  %vm1857_vm2 = vcmp.gt.f32.partialorder %v3718_v49, 0.5 }
 0x1c2   :  { %v1919_v16 = vsel %vm1855_vm1, 0.5625, %v1791_v12  ;;  %v1921_v17 = vsel %vm1857_vm2, 0.5625, %v1793_v13  ;;  %vm1983_vm3 = vcmp.gt.f32.partialorder %v3682_v44, 0.640625  ;;  %vm1985_vm4 = vcmp.gt.f32.partialorder %v3718_v49, 0.640625 }
 0x1c3   :  { %v2047_v25 = vsel %vm1983_vm3, 0.72265625, %v1919_v16  ;;  %v2049_v42 = vsel %vm1985_vm4, 0.72265625, %v1921_v17  ;;  %vm2111_vm5 = vcmp.gt.f32.partialorder %v3682_v44, 0.859375  ;;  %vm2113_vm6 = vcmp.gt.f32.partialorder %v3718_v49, 0.859375 }
 0x1c4   :  { %v2175_v19 = vsel %vm2111_vm5, 1.0, %v2047_v25  ;;  %v2177_v21 = vsel %vm2113_vm6, 1.0, %v2049_v42  ;;  %v3755_v22 = vmul.f32 %v2836_v56, %v108_v14  ;;  %v3758_v55 = vmul.f32 %v2836_v56, %v110_v15 }
 0x1c5   :  { %v2304_v35 = vmul.f32 %v3515_v18, %v2175_v19  ;;  %v2306_v26 = vmul.f32 %v3515_v18, %v2177_v21  ;;  %v3763_v31 = vmul.f32 %v2850_v1, %v113_v53  ;;  %v3766_v29 = vmul.f32 %v2850_v1, %v115_v37  ;;  %v2332_v37 = vld [vmem:[#allocation3 + $0x18] sm:$0xff] }
 0x1c6   :  { %vm318_vm7 = vcmp.gt.f32.partialorder %v3755_v22, -0.84765625  ;;  %vm320_vm11 = vcmp.gt.f32.partialorder %v3758_v55, -0.84765625  ;;  %vm446_vm12 = vcmp.gt.f32.partialorder %v3755_v22, -0.609375  ;;  %vm448_vm8 = vcmp.gt.f32.partialorder %v3758_v55, -0.609375  ;;  %2405 = vmatprep.mubr.f32.mxu1 %v2332_v37 }
 0x1c7   :  { %v2509_v56 = vpack.c.bf16 %v2306_v26, %v2304_v35  ;;  %v382_v44 = vsel %vm318_vm7, -0.6953125, %v2685_v47  ;;  %v384_v6 = vsel %vm320_vm11, -0.6953125, %v2685_v47  ;;  %vm574_vm15 = vcmp.gt.f32.partialorder %v3755_v22, -0.45898438  ;;  %v2330_v35 = vld [vmem:[#allocation3 + $0x8] sm:$0xff] }
 0x1c8   :  { %v510_v18 = vsel %vm446_vm12, -0.5234375, %v382_v44  ;;  %v512_v43 = vsel %vm448_vm8, -0.5234375, %v384_v6  ;;  %vm576_vm0 = vcmp.gt.f32.partialorder %v3758_v55, -0.45898438  ;;  %vm702_vm9 = vcmp.gt.f32.partialorder %v3755_v22, -0.33984375  ;;  %2399 = vmatprep.mubr.f32.mxu0 %v2330_v35 }
 0x1c9   :  { %2540 = vmatprep.subr.bf16.mxu1 %v2509_v56  ;;  %v638_v33 = vsel %vm574_vm15, -0.39453125, %v510_v18  ;;  %v640_v34 = vsel %vm576_vm0, -0.39453125, %v512_v43  ;;  %vm704_vm10 = vcmp.gt.f32.partialorder %v3758_v55, -0.33984375  ;;  %vm830_vm13 = vcmp.gt.f32.partialorder %v3755_v22, -0.234375  ;;  %2510 = vmatprep.subr.bf16.mxu0 %v2509_v56  ;;  %v112_v18 = vld [vmem:[#allocation6 + $0x180] sm:$0xff] }
 0x1ca   :  { %v766_v39 = vsel %vm702_vm9, -0.28515625, %v638_v33  ;;  %v768_v40 = vsel %vm704_vm10, -0.28515625, %v640_v34  ;;  %vm832_vm14 = vcmp.gt.f32.partialorder %v3758_v55, -0.234375  ;;  %vm958_vm1 = vcmp.gt.f32.partialorder %v3755_v22, -0.13769531  ;;  %v114_v34 = vld [vmem:[#allocation6 + $0x190] sm:$0xff] }
 0x1cb   :  { %v894_v48 = vsel %vm830_vm13, -0.18457031, %v766_v39  ;;  %v896_v49 = vsel %vm832_vm14, -0.18457031, %v768_v40  ;;  %vm960_vm2 = vcmp.gt.f32.partialorder %v3758_v55, -0.13769531  ;;  %vm1086_vm3 = vcmp.gt.f32.partialorder %v3755_v22, -0.045410156  ;;  %v117_v39 = vld [vmem:[#allocation6 + $0x1a8] sm:$0xff] }
 0x1cc   :  { %v1022_v51 = vsel %vm958_vm1, -0.09082031, %v894_v48  ;;  %v1024_v52 = vsel %vm960_vm2, -0.09082031, %v896_v49  ;;  %vm1088_vm4 = vcmp.gt.f32.partialorder %v3758_v55, -0.045410156  ;;  %vm1214_vm5 = vcmp.gt.f32.partialorder %v3755_v22, 0.039794922  ;;  %v119_v49 = vld [vmem:[#allocation6 + $0x1b8] sm:$0xff] }
 0x1cd   :  { %v1150_v54 = vsel %vm1086_vm3, 0.0, %v1022_v51  ;;  %v1152_v30 = vsel %vm1088_vm4, 0.0, %v1024_v52  ;;  %vm1216_vm6 = vcmp.gt.f32.partialorder %v3758_v55, 0.039794922  ;;  %vm1342_vm7 = vcmp.gt.f32.partialorder %v3755_v22, 0.12011719  ;;  %v116_v51 = vld [vmem:[#allocation6 + $0x1a0] sm:$0xff] }
 0x1ce   :  { %v1278_v41 = vsel %vm1214_vm5, 0.079589844, %v1150_v54  ;;  %v1280_v0 = vsel %vm1216_vm6, 0.079589844, %v1152_v30  ;;  %vm1344_vm11 = vcmp.gt.f32.partialorder %v3758_v55, 0.12011719  ;;  %vm1470_vm12 = vcmp.gt.f32.partialorder %v3755_v22, 0.203125 }
 0x1cf   :  { %v1406_v45 = vsel %vm1342_vm7, 0.16113281, %v1278_v41  ;;  %v1408_v59 = vsel %vm1344_vm11, 0.16113281, %v1280_v0  ;;  %vm1472_vm8 = vcmp.gt.f32.partialorder %v3758_v55, 0.203125  ;;  %vm1598_vm15 = vcmp.gt.f32.partialorder %v3755_v22, 0.29296875 }
 0x1d0   :  { %v1534_v23 = vsel %vm1470_vm12, 0.24609375, %v1406_v45  ;;  %v1536_v60 = vsel %vm1472_vm8, 0.24609375, %v1408_v59  ;;  %vm1600_vm0 = vcmp.gt.f32.partialorder %v3758_v55, 0.29296875  ;;  %vm1726_vm9 = vcmp.gt.f32.partialorder %v3755_v22, 0.390625 }
 0x1d1   :  { %v1662_v24 = vsel %vm1598_vm15, 0.33789063, %v1534_v23  ;;  %v1664_v61 = vsel %vm1600_vm0, 0.33789063, %v1536_v60  ;;  %vm1728_vm10 = vcmp.gt.f32.partialorder %v3758_v55, 0.390625  ;;  %vm1854_vm13 = vcmp.gt.f32.partialorder %v3755_v22, 0.5 }
 0x1d2   :  { %v1790_v5 = vsel %vm1726_vm9, 0.44140625, %v1662_v24  ;;  %v1792_v20 = vsel %vm1728_vm10, 0.44140625, %v1664_v61  ;;  %vm1856_vm14 = vcmp.gt.f32.partialorder %v3758_v55, 0.5  ;;  %vm1982_vm1 = vcmp.gt.f32.partialorder %v3755_v22, 0.640625 }
 0x1d3   :  { %v1918_v36 = vsel %vm1854_vm13, 0.5625, %v1790_v5  ;;  %v1920_v38 = vsel %vm1856_vm14, 0.5625, %v1792_v20  ;;  %vm1984_vm2 = vcmp.gt.f32.partialorder %v3758_v55, 0.640625  ;;  %vm2110_vm3 = vcmp.gt.f32.partialorder %v3755_v22, 0.859375 }
 0x1d4   :  { %v2046_v28 = vsel %vm1982_vm1, 0.72265625, %v1918_v36  ;;  %v2048_v50 = vsel %vm1984_vm2, 0.72265625, %v1920_v38  ;;  %vm2112_vm4 = vcmp.gt.f32.partialorder %v3758_v55, 0.859375  ;;  %vm323_vm5 = vcmp.gt.f32.partialorder %v3763_v31, -0.84765625 }
 0x1d5   :  { %v2174_v2 = vsel %vm2110_vm3, 1.0, %v2046_v28  ;;  %v2176_v3 = vsel %vm2112_vm4, 1.0, %v2048_v50  ;;  %vm325_vm6 = vcmp.gt.f32.partialorder %v3766_v29, -0.84765625  ;;  %v387_v4 = vsel %vm323_vm5, -0.6953125, %v2685_v47 }
 0x1d6   :  { %v2303_v32 = vmul.f32 %v3518_v63, %v2174_v2  ;;  %v2305_v27 = vmul.f32 %v3518_v63, %v2176_v3  ;;  %v389_v7 = vsel %vm325_vm6, -0.6953125, %v2685_v47  ;;  %vm451_vm7 = vcmp.gt.f32.partialorder %v3763_v31, -0.609375 }
 0x1d7   :  { %vm453_vm11 = vcmp.gt.f32.partialorder %v3766_v29, -0.609375  ;;  %v515_v57 = vsel %vm451_vm7, -0.5234375, %v387_v4  ;;  %vm579_vm12 = vcmp.gt.f32.partialorder %v3763_v31, -0.45898438  ;;  %vm581_vm8 = vcmp.gt.f32.partialorder %v3766_v29, -0.45898438 }
 0x1d8   :  { %v2511_v58 = vpack.c.bf16 %v2305_v27, %v2303_v32  ;;  %v517_v8 = vsel %vm453_vm11, -0.5234375, %v389_v7  ;;  %v643_v11 = vsel %vm579_vm12, -0.39453125, %v515_v57  ;;  %vm707_vm15 = vcmp.gt.f32.partialorder %v3763_v31, -0.33984375 }
 0x1d9   :  { %v645_v12 = vsel %vm581_vm8, -0.39453125, %v517_v8  ;;  %vm709_vm0 = vcmp.gt.f32.partialorder %v3766_v29, -0.33984375  ;;  %v771_v63 = vsel %vm707_vm15, -0.28515625, %v643_v11  ;;  %vm835_vm9 = vcmp.gt.f32.partialorder %v3763_v31, -0.234375 }
 0x1da   :  { %2556 = vmatpush1.bf16.msra.mxu1 %v2511_v58  ;;  %2512 = vmatpush1.bf16.msra.mxu0 %v2511_v58  ;;  %v773_v13 = vsel %vm709_vm0, -0.28515625, %v645_v12  ;;  %vm837_vm10 = vcmp.gt.f32.partialorder %v3766_v29, -0.234375  ;;  %v899_v14 = vsel %vm835_vm9, -0.18457031, %v771_v63  ;;  %vm963_vm13 = vcmp.gt.f32.partialorder %v3763_v31, -0.13769531 }
 0x1db   :  { %v901_v15 = vsel %vm837_vm10, -0.18457031, %v773_v13  ;;  %vm965_vm14 = vcmp.gt.f32.partialorder %v3766_v29, -0.13769531  ;;  %v1027_v16 = vsel %vm963_vm13, -0.09082031, %v899_v14  ;;  %vm1091_vm1 = vcmp.gt.f32.partialorder %v3763_v31, -0.045410156 }
 0x1dc   :  { %v1029_v17 = vsel %vm965_vm14, -0.09082031, %v901_v15  ;;  %vm1093_vm2 = vcmp.gt.f32.partialorder %v3766_v29, -0.045410156  ;;  %v1155_v53 = vsel %vm1091_vm1, 0.0, %v1027_v16  ;;  %vm1219_vm3 = vcmp.gt.f32.partialorder %v3763_v31, 0.039794922 }
 0x1dd   :  { %v1157_v25 = vsel %vm1093_vm2, 0.0, %v1029_v17  ;;  %vm1221_vm4 = vcmp.gt.f32.partialorder %v3766_v29, 0.039794922  ;;  %v1283_v42 = vsel %vm1219_vm3, 0.079589844, %v1155_v53  ;;  %vm1347_vm5 = vcmp.gt.f32.partialorder %v3763_v31, 0.12011719 }
 0x1de   :  { %v1285_v19 = vsel %vm1221_vm4, 0.079589844, %v1157_v25  ;;  %vm1349_vm6 = vcmp.gt.f32.partialorder %v3766_v29, 0.12011719  ;;  %v1411_v21 = vsel %vm1347_vm5, 0.16113281, %v1283_v42  ;;  %vm1475_vm7 = vcmp.gt.f32.partialorder %v3763_v31, 0.203125 }
 0x1df   :  { %v1413_v22 = vsel %vm1349_vm6, 0.16113281, %v1285_v19  ;;  %vm1477_vm11 = vcmp.gt.f32.partialorder %v3766_v29, 0.203125  ;;  %v1539_v55 = vsel %vm1475_vm7, 0.24609375, %v1411_v21  ;;  %vm1603_vm12 = vcmp.gt.f32.partialorder %v3763_v31, 0.29296875 }
 0x1e0   :  { %v1541_v26 = vsel %vm1477_vm11, 0.24609375, %v1413_v22  ;;  %vm1605_vm8 = vcmp.gt.f32.partialorder %v3766_v29, 0.29296875  ;;  %v1667_v56 = vsel %vm1603_vm12, 0.33789063, %v1539_v55  ;;  %vm1731_vm15 = vcmp.gt.f32.partialorder %v3763_v31, 0.390625 }
 0x1e1   :  { %v1669_v44 = vsel %vm1605_vm8, 0.33789063, %v1541_v26  ;;  %vm1733_vm0 = vcmp.gt.f32.partialorder %v3766_v29, 0.390625  ;;  %v1795_v6 = vsel %vm1731_vm15, 0.44140625, %v1667_v56  ;;  %vm1859_vm9 = vcmp.gt.f32.partialorder %v3763_v31, 0.5 }
 0x1e2   :  { %v1797_v43 = vsel %vm1733_vm0, 0.44140625, %v1669_v44  ;;  %vm1861_vm10 = vcmp.gt.f32.partialorder %v3766_v29, 0.5  ;;  %v1923_v33 = vsel %vm1859_vm9, 0.5625, %v1795_v6  ;;  %vm1987_vm13 = vcmp.gt.f32.partialorder %v3763_v31, 0.640625 }
 0x1e3   :  { %v1925_v40 = vsel %vm1861_vm10, 0.5625, %v1797_v43  ;;  %vm1989_vm14 = vcmp.gt.f32.partialorder %v3766_v29, 0.640625  ;;  %v2051_v48 = vsel %vm1987_vm13, 0.72265625, %v1923_v33  ;;  %vm2115_vm1 = vcmp.gt.f32.partialorder %v3763_v31, 0.859375 }
 0x1e4   :  { %v2053_v52 = vsel %vm1989_vm14, 0.72265625, %v1925_v40  ;;  %vm2117_vm2 = vcmp.gt.f32.partialorder %v3766_v29, 0.859375  ;;  %v2179_v54 = vsel %vm2115_vm1, 1.0, %v2051_v48  ;;  %v2218_v30 = vcombine.high %v3142_v46, %v3142_v46 }
 0x1e5   :  { %v2181_v41 = vsel %vm2117_vm2, 1.0, %v2053_v52  ;;  %v3837_v0 = vmul.f32 %v2846_v62, %v112_v18  ;;  %v3840_v45 = vmul.f32 %v2846_v62, %v114_v34  ;;  %v3843_v59 = vmul.f32 %v2850_v1, %v117_v39 }
 0x1e6   :  { %v3846_v31 = vrot.slane %v2218_v30, %v2761_v10  ;;  %v3849_v23 = vrot.slane %v2218_v30, %v2759_v9  ;;  %v3852_v29 = vmul.f32 %v2850_v1, %v119_v49  ;;  %v3855_v46 = vmul.f32 %v2846_v62, %v116_v51 }
 0x1e7   :  { %vm322_vm3 = vcmp.gt.f32.partialorder %v3837_v0, -0.84765625  ;;  %vm324_vm4 = vcmp.gt.f32.partialorder %v3840_v45, -0.84765625  ;;  %vm450_vm5 = vcmp.gt.f32.partialorder %v3837_v0, -0.609375  ;;  %vm452_vm6 = vcmp.gt.f32.partialorder %v3840_v45, -0.609375 }
 0x1e8   :  { %v2308_v10 = vmul.f32 %v3846_v31, %v2179_v54  ;;  %v2310_v60 = vmul.f32 %v3846_v31, %v2181_v41  ;;  %v386_v9 = vsel %vm322_vm3, -0.6953125, %v2685_v47  ;;  %v388_v24 = vsel %vm324_vm4, -0.6953125, %v2685_v47 }
 0x1e9   :  { %v514_v61 = vsel %vm450_vm5, -0.5234375, %v386_v9  ;;  %v516_v5 = vsel %vm452_vm6, -0.5234375, %v388_v24  ;;  %vm578_vm7 = vcmp.gt.f32.partialorder %v3837_v0, -0.45898438  ;;  %vm580_vm11 = vcmp.gt.f32.partialorder %v3840_v45, -0.45898438 }
 0x1ea   :  { %v2513_v20 = vpack.c.bf16 %v2310_v60, %v2308_v10  ;;  %v642_v36 = vsel %vm578_vm7, -0.39453125, %v514_v61  ;;  %v644_v38 = vsel %vm580_vm11, -0.39453125, %v516_v5  ;;  %vm706_vm12 = vcmp.gt.f32.partialorder %v3837_v0, -0.33984375  ;;  %v118_v61 = vld [vmem:[#allocation6 + $0x1b0] sm:$0xff] }
 0x1eb   :  { %vm708_vm8 = vcmp.gt.f32.partialorder %v3840_v45, -0.33984375  ;;  %v770_v28 = vsel %vm706_vm12, -0.28515625, %v642_v36  ;;  %vm834_vm15 = vcmp.gt.f32.partialorder %v3837_v0, -0.234375  ;;  %vm836_vm0 = vcmp.gt.f32.partialorder %v3840_v45, -0.234375 }
 0x1ec   :  { %2541 = vmatprep.subr.bf16.mxu1 %v2513_v20  ;;  %v772_v50 = vsel %vm708_vm8, -0.28515625, %v644_v38  ;;  %v898_v2 = vsel %vm834_vm15, -0.18457031, %v770_v28  ;;  %vm962_vm9 = vcmp.gt.f32.partialorder %v3837_v0, -0.13769531  ;;  %vm964_vm10 = vcmp.gt.f32.partialorder %v3840_v45, -0.13769531  ;;  %2514 = vmatprep.subr.bf16.mxu0 %v2513_v20 }
 0x1ed   :  { %v900_v3 = vsel %vm836_vm0, -0.18457031, %v772_v50  ;;  %v1026_v4 = vsel %vm962_vm9, -0.09082031, %v898_v2  ;;  %vm1090_vm13 = vcmp.gt.f32.partialorder %v3837_v0, -0.045410156  ;;  %vm1092_vm14 = vcmp.gt.f32.partialorder %v3840_v45, -0.045410156 }
 0x1ee   :  { %v1028_v32 = vsel %vm964_vm10, -0.09082031, %v900_v3  ;;  %v1154_v27 = vsel %vm1090_vm13, 0.0, %v1026_v4  ;;  %vm1218_vm1 = vcmp.gt.f32.partialorder %v3837_v0, 0.039794922  ;;  %vm1220_vm2 = vcmp.gt.f32.partialorder %v3840_v45, 0.039794922 }
 0x1ef   :  { %v1156_v7 = vsel %vm1092_vm14, 0.0, %v1028_v32  ;;  %v1282_v57 = vsel %vm1218_vm1, 0.079589844, %v1154_v27  ;;  %vm1346_vm3 = vcmp.gt.f32.partialorder %v3837_v0, 0.12011719  ;;  %vm1348_vm4 = vcmp.gt.f32.partialorder %v3840_v45, 0.12011719 }
 0x1f0   :  { %v1284_v58 = vsel %vm1220_vm2, 0.079589844, %v1156_v7  ;;  %v1410_v8 = vsel %vm1346_vm3, 0.16113281, %v1282_v57  ;;  %vm1474_vm5 = vcmp.gt.f32.partialorder %v3837_v0, 0.203125  ;;  %vm1476_vm6 = vcmp.gt.f32.partialorder %v3840_v45, 0.203125 }
 0x1f1   :  { %v1412_v11 = vsel %vm1348_vm4, 0.16113281, %v1284_v58  ;;  %v1538_v12 = vsel %vm1474_vm5, 0.24609375, %v1410_v8  ;;  %vm1602_vm7 = vcmp.gt.f32.partialorder %v3837_v0, 0.29296875  ;;  %vm1604_vm11 = vcmp.gt.f32.partialorder %v3840_v45, 0.29296875 }
 0x1f2   :  { %v1540_v63 = vsel %vm1476_vm6, 0.24609375, %v1412_v11  ;;  %v1666_v13 = vsel %vm1602_vm7, 0.33789063, %v1538_v12  ;;  %vm1730_vm12 = vcmp.gt.f32.partialorder %v3837_v0, 0.390625  ;;  %vm1732_vm8 = vcmp.gt.f32.partialorder %v3840_v45, 0.390625 }
 0x1f3   :  { %v1668_v14 = vsel %vm1604_vm11, 0.33789063, %v1540_v63  ;;  %v1794_v15 = vsel %vm1730_vm12, 0.44140625, %v1666_v13  ;;  %vm1858_vm15 = vcmp.gt.f32.partialorder %v3837_v0, 0.5  ;;  %vm1860_vm0 = vcmp.gt.f32.partialorder %v3840_v45, 0.5 }
 0x1f4   :  { %v1796_v16 = vsel %vm1732_vm8, 0.44140625, %v1668_v14  ;;  %v1922_v17 = vsel %vm1858_vm15, 0.5625, %v1794_v15  ;;  %vm1986_vm9 = vcmp.gt.f32.partialorder %v3837_v0, 0.640625  ;;  %vm1988_vm10 = vcmp.gt.f32.partialorder %v3840_v45, 0.640625 }
 0x1f5   :  { %v1924_v53 = vsel %vm1860_vm0, 0.5625, %v1796_v16  ;;  %v2050_v37 = vsel %vm1986_vm9, 0.72265625, %v1922_v17  ;;  %vm2114_vm13 = vcmp.gt.f32.partialorder %v3837_v0, 0.859375  ;;  %vm2116_vm14 = vcmp.gt.f32.partialorder %v3840_v45, 0.859375 }
 0x1f6   :  { %v2052_v25 = vsel %vm1988_vm10, 0.72265625, %v1924_v53  ;;  %v2178_v42 = vsel %vm2114_vm13, 1.0, %v2050_v37  ;;  %vm327_vm1 = vcmp.gt.f32.partialorder %v3843_v59, -0.84765625  ;;  %vm329_vm2 = vcmp.gt.f32.partialorder %v3852_v29, -0.84765625 }
 0x1f7   :  { %v2180_v19 = vsel %vm2116_vm14, 1.0, %v2052_v25  ;;  %v2307_v21 = vmul.f32 %v3849_v23, %v2178_v42  ;;  %v391_v22 = vsel %vm327_vm1, -0.6953125, %v2685_v47  ;;  %v393_v55 = vsel %vm329_vm2, -0.6953125, %v2685_v47 }
 0x1f8   :  { %v2309_v35 = vmul.f32 %v3849_v23, %v2180_v19  ;;  %vm455_vm3 = vcmp.gt.f32.partialorder %v3843_v59, -0.609375  ;;  %vm457_vm4 = vcmp.gt.f32.partialorder %v3852_v29, -0.609375  ;;  %vm583_vm5 = vcmp.gt.f32.partialorder %v3843_v59, -0.45898438 }
 0x1f9   :  { %v519_v26 = vsel %vm455_vm3, -0.5234375, %v391_v22  ;;  %v521_v56 = vsel %vm457_vm4, -0.5234375, %v393_v55  ;;  %vm585_vm6 = vcmp.gt.f32.partialorder %v3852_v29, -0.45898438  ;;  %vm711_vm7 = vcmp.gt.f32.partialorder %v3843_v59, -0.33984375  ;;  %v121_v22 = vld [vmem:[#allocation6 + $0x1c8] sm:$0xff] }
 0x1fa   :  { %v2515_v44 = vpack.c.bf16 %v2309_v35, %v2307_v21  ;;  %v647_v6 = vsel %vm583_vm5, -0.39453125, %v519_v26  ;;  %v649_v18 = vsel %vm585_vm6, -0.39453125, %v521_v56  ;;  %vm713_vm11 = vcmp.gt.f32.partialorder %v3852_v29, -0.33984375  ;;  %v123_v26 = vld [vmem:[#allocation6 + $0x1d8] sm:$0xff]  ;;  %v120_v56 = vld [vmem:[#allocation6 + $0x1c0] sm:$0xff] }
 0x1fb   :  { %v775_v43 = vsel %vm711_vm7, -0.28515625, %v647_v6  ;;  %v777_v33 = vsel %vm713_vm11, -0.28515625, %v649_v18  ;;  %vm839_vm12 = vcmp.gt.f32.partialorder %v3843_v59, -0.234375  ;;  %vm841_vm8 = vcmp.gt.f32.partialorder %v3852_v29, -0.234375 }
 0x1fc   :  { %2557 = vmatpush1.bf16.msra.mxu1 %v2515_v44  ;;  %2516 = vmatpush1.bf16.msra.mxu0 %v2515_v44  ;;  %v903_v34 = vsel %vm839_vm12, -0.18457031, %v775_v43  ;;  %v905_v39 = vsel %vm841_vm8, -0.18457031, %v777_v33  ;;  %vm967_vm15 = vcmp.gt.f32.partialorder %v3843_v59, -0.13769531  ;;  %vm969_vm0 = vcmp.gt.f32.partialorder %v3852_v29, -0.13769531 }
 0x1fd   :  { %v1031_v40 = vsel %vm967_vm15, -0.09082031, %v903_v34  ;;  %v1033_v48 = vsel %vm969_vm0, -0.09082031, %v905_v39  ;;  %vm1095_vm9 = vcmp.gt.f32.partialorder %v3843_v59, -0.045410156  ;;  %vm1097_vm10 = vcmp.gt.f32.partialorder %v3852_v29, -0.045410156 }
 0x1fe   :  { %v1159_v49 = vsel %vm1095_vm9, 0.0, %v1031_v40  ;;  %v1161_v51 = vsel %vm1097_vm10, 0.0, %v1033_v48  ;;  %vm1223_vm13 = vcmp.gt.f32.partialorder %v3843_v59, 0.039794922  ;;  %vm1225_vm14 = vcmp.gt.f32.partialorder %v3852_v29, 0.039794922 }
 0x1ff   :  { %v1287_v52 = vsel %vm1223_vm13, 0.079589844, %v1159_v49  ;;  %v1289_v54 = vsel %vm1225_vm14, 0.079589844, %v1161_v51  ;;  %vm1351_vm1 = vcmp.gt.f32.partialorder %v3843_v59, 0.12011719  ;;  %vm1353_vm2 = vcmp.gt.f32.partialorder %v3852_v29, 0.12011719 }
 0x200   :  { %v1415_v30 = vsel %vm1351_vm1, 0.16113281, %v1287_v52  ;;  %v1417_v41 = vsel %vm1353_vm2, 0.16113281, %v1289_v54  ;;  %vm1479_vm3 = vcmp.gt.f32.partialorder %v3843_v59, 0.203125  ;;  %vm1481_vm4 = vcmp.gt.f32.partialorder %v3852_v29, 0.203125 }
 0x201   :  { %v1543_v0 = vsel %vm1479_vm3, 0.24609375, %v1415_v30  ;;  %v1545_v45 = vsel %vm1481_vm4, 0.24609375, %v1417_v41  ;;  %vm1607_vm5 = vcmp.gt.f32.partialorder %v3843_v59, 0.29296875  ;;  %vm1609_vm6 = vcmp.gt.f32.partialorder %v3852_v29, 0.29296875 }
 0x202   :  { %v1671_v10 = vsel %vm1607_vm5, 0.33789063, %v1543_v0  ;;  %v1673_v60 = vsel %vm1609_vm6, 0.33789063, %v1545_v45  ;;  %vm1735_vm7 = vcmp.gt.f32.partialorder %v3843_v59, 0.390625  ;;  %vm1737_vm11 = vcmp.gt.f32.partialorder %v3852_v29, 0.390625 }
 0x203   :  { %v1799_v9 = vsel %vm1735_vm7, 0.44140625, %v1671_v10  ;;  %v1801_v24 = vsel %vm1737_vm11, 0.44140625, %v1673_v60  ;;  %vm1863_vm12 = vcmp.gt.f32.partialorder %v3843_v59, 0.5  ;;  %vm1865_vm8 = vcmp.gt.f32.partialorder %v3852_v29, 0.5 }
 0x204   :  { %v1927_v5 = vsel %vm1863_vm12, 0.5625, %v1799_v9  ;;  %v1929_v20 = vsel %vm1865_vm8, 0.5625, %v1801_v24  ;;  %vm1991_vm15 = vcmp.gt.f32.partialorder %v3843_v59, 0.640625  ;;  %vm1993_vm0 = vcmp.gt.f32.partialorder %v3852_v29, 0.640625 }
 0x205   :  { %v2055_v36 = vsel %vm1991_vm15, 0.72265625, %v1927_v5  ;;  %v2057_v38 = vsel %vm1993_vm0, 0.72265625, %v1929_v20  ;;  %vm2119_vm9 = vcmp.gt.f32.partialorder %v3843_v59, 0.859375  ;;  %vm2121_vm10 = vcmp.gt.f32.partialorder %v3852_v29, 0.859375 }
 0x206   :  { %v2183_v28 = vsel %vm2119_vm9, 1.0, %v2055_v36  ;;  %v2185_v50 = vsel %vm2121_vm10, 1.0, %v2057_v38  ;;  %v3926_v2 = vmul.f32 %v2846_v62, %v118_v61  ;;  %vm326_vm13 = vcmp.gt.f32.partialorder %v3855_v46, -0.84765625 }
 0x207   :  { %v2312_v3 = vmul.f32 %v3846_v31, %v2183_v28  ;;  %v2314_v4 = vmul.f32 %v3846_v31, %v2185_v50  ;;  %v390_v32 = vsel %vm326_vm13, -0.6953125, %v2685_v47  ;;  %vm454_vm14 = vcmp.gt.f32.partialorder %v3855_v46, -0.609375 }
 0x208   :  { %vm328_vm1 = vcmp.gt.f32.partialorder %v3926_v2, -0.84765625  ;;  %vm456_vm2 = vcmp.gt.f32.partialorder %v3926_v2, -0.609375  ;;  %v518_v59 = vsel %vm454_vm14, -0.5234375, %v390_v32  ;;  %vm582_vm3 = vcmp.gt.f32.partialorder %v3855_v46, -0.45898438 }
 0x209   :  { %v2517_v29 = vpack.c.bf16 %v2314_v4, %v2312_v3  ;;  %v392_v27 = vsel %vm328_vm1, -0.6953125, %v2685_v47  ;;  %vm584_vm4 = vcmp.gt.f32.partialorder %v3926_v2, -0.45898438  ;;  %v646_v7 = vsel %vm582_vm3, -0.39453125, %v518_v59 }
 0x20a   :  { %v520_v57 = vsel %vm456_vm2, -0.5234375, %v392_v27  ;;  %vm710_vm5 = vcmp.gt.f32.partialorder %v3855_v46, -0.33984375  ;;  %vm712_vm6 = vcmp.gt.f32.partialorder %v3926_v2, -0.33984375  ;;  %vm838_vm7 = vcmp.gt.f32.partialorder %v3855_v46, -0.234375 }
 0x20b   :  { %2542 = vmatprep.subr.bf16.mxu1 %v2517_v29  ;;  %v648_v58 = vsel %vm584_vm4, -0.39453125, %v520_v57  ;;  %v774_v8 = vsel %vm710_vm5, -0.28515625, %v646_v7  ;;  %vm840_vm11 = vcmp.gt.f32.partialorder %v3926_v2, -0.234375  ;;  %vm966_vm12 = vcmp.gt.f32.partialorder %v3855_v46, -0.13769531  ;;  %2518 = vmatprep.subr.bf16.mxu0 %v2517_v29  ;;  %v122_v7 = vld [vmem:[#allocation6 + $0x1d0] sm:$0xff] }
 0x20c   :  { %v776_v11 = vsel %vm712_vm6, -0.28515625, %v648_v58  ;;  %v902_v12 = vsel %vm838_vm7, -0.18457031, %v774_v8  ;;  %vm968_vm8 = vcmp.gt.f32.partialorder %v3926_v2, -0.13769531  ;;  %vm1094_vm15 = vcmp.gt.f32.partialorder %v3855_v46, -0.045410156 }
 0x20d   :  { %v904_v63 = vsel %vm840_vm11, -0.18457031, %v776_v11  ;;  %v1030_v13 = vsel %vm966_vm12, -0.09082031, %v902_v12  ;;  %vm1096_vm0 = vcmp.gt.f32.partialorder %v3926_v2, -0.045410156  ;;  %vm1222_vm9 = vcmp.gt.f32.partialorder %v3855_v46, 0.039794922 }
 0x20e   :  { %v1032_v14 = vsel %vm968_vm8, -0.09082031, %v904_v63  ;;  %v1158_v15 = vsel %vm1094_vm15, 0.0, %v1030_v13  ;;  %vm1224_vm10 = vcmp.gt.f32.partialorder %v3926_v2, 0.039794922  ;;  %vm1350_vm13 = vcmp.gt.f32.partialorder %v3855_v46, 0.12011719 }
 0x20f   :  { %v1160_v16 = vsel %vm1096_vm0, 0.0, %v1032_v14  ;;  %v1286_v17 = vsel %vm1222_vm9, 0.079589844, %v1158_v15  ;;  %vm1352_vm14 = vcmp.gt.f32.partialorder %v3926_v2, 0.12011719  ;;  %vm1478_vm1 = vcmp.gt.f32.partialorder %v3855_v46, 0.203125 }
 0x210   :  { %v1288_v53 = vsel %vm1224_vm10, 0.079589844, %v1160_v16  ;;  %v1414_v37 = vsel %vm1350_vm13, 0.16113281, %v1286_v17  ;;  %vm1480_vm2 = vcmp.gt.f32.partialorder %v3926_v2, 0.203125  ;;  %vm1606_vm3 = vcmp.gt.f32.partialorder %v3855_v46, 0.29296875 }
 0x211   :  { %v1416_v25 = vsel %vm1352_vm14, 0.16113281, %v1288_v53  ;;  %v1542_v42 = vsel %vm1478_vm1, 0.24609375, %v1414_v37  ;;  %vm1608_vm4 = vcmp.gt.f32.partialorder %v3926_v2, 0.29296875  ;;  %vm1734_vm5 = vcmp.gt.f32.partialorder %v3855_v46, 0.390625 }
 0x212   :  { %v1544_v19 = vsel %vm1480_vm2, 0.24609375, %v1416_v25  ;;  %v1670_v21 = vsel %vm1606_vm3, 0.33789063, %v1542_v42  ;;  %vm1736_vm6 = vcmp.gt.f32.partialorder %v3926_v2, 0.390625  ;;  %vm1862_vm7 = vcmp.gt.f32.partialorder %v3855_v46, 0.5 }
 0x213   :  { %v1672_v55 = vsel %vm1608_vm4, 0.33789063, %v1544_v19  ;;  %v1798_v35 = vsel %vm1734_vm5, 0.44140625, %v1670_v21  ;;  %vm1864_vm11 = vcmp.gt.f32.partialorder %v3926_v2, 0.5  ;;  %vm1990_vm12 = vcmp.gt.f32.partialorder %v3855_v46, 0.640625 }
 0x214   :  { %v1800_v44 = vsel %vm1736_vm6, 0.44140625, %v1672_v55  ;;  %v1926_v6 = vsel %vm1862_vm7, 0.5625, %v1798_v35  ;;  %vm1992_vm8 = vcmp.gt.f32.partialorder %v3926_v2, 0.640625  ;;  %vm2118_vm15 = vcmp.gt.f32.partialorder %v3855_v46, 0.859375 }
 0x215   :  { %v1928_v18 = vsel %vm1864_vm11, 0.5625, %v1800_v44  ;;  %v2054_v43 = vsel %vm1990_vm12, 0.72265625, %v1926_v6  ;;  %vm2120_vm0 = vcmp.gt.f32.partialorder %v3926_v2, 0.859375  ;;  %v3963_v33 = vmul.f32 %v2850_v1, %v121_v22 }
 0x216   :  { %v2056_v34 = vsel %vm1992_vm8, 0.72265625, %v1928_v18  ;;  %v2182_v39 = vsel %vm2118_vm15, 1.0, %v2054_v43  ;;  %v3966_v40 = vmul.f32 %v2850_v1, %v123_v26  ;;  %v3969_v48 = vmul.f32 %v2846_v62, %v120_v56 }
 0x217   :  { %v2184_v49 = vsel %vm2120_vm0, 1.0, %v2056_v34  ;;  %v2311_v51 = vmul.f32 %v3849_v23, %v2182_v39  ;;  %vm331_vm9 = vcmp.gt.f32.partialorder %v3963_v33, -0.84765625  ;;  %vm459_vm10 = vcmp.gt.f32.partialorder %v3963_v33, -0.609375 }
 0x218   :  { %v2313_v46 = vmul.f32 %v3849_v23, %v2184_v49  ;;  %vm333_vm13 = vcmp.gt.f32.partialorder %v3966_v40, -0.84765625  ;;  %v395_v52 = vsel %vm331_vm9, -0.6953125, %v2685_v47  ;;  %vm461_vm14 = vcmp.gt.f32.partialorder %v3966_v40, -0.609375 }
 0x219   :  { %v397_v54 = vsel %vm333_vm13, -0.6953125, %v2685_v47  ;;  %v523_v30 = vsel %vm459_vm10, -0.5234375, %v395_v52  ;;  %vm587_vm1 = vcmp.gt.f32.partialorder %v3963_v33, -0.45898438  ;;  %vm589_vm2 = vcmp.gt.f32.partialorder %v3966_v40, -0.45898438 }
 0x21a   :  { %v2519_v41 = vpack.c.bf16 %v2313_v46, %v2311_v51  ;;  %v525_v0 = vsel %vm461_vm14, -0.5234375, %v397_v54  ;;  %v651_v45 = vsel %vm587_vm1, -0.39453125, %v523_v30  ;;  %vm715_vm3 = vcmp.gt.f32.partialorder %v3963_v33, -0.33984375  ;;  %v125_v54 = vld [vmem:[#allocation6 + $0x1e8] sm:$0xff] }
 0x21b   :  { %v653_v10 = vsel %vm589_vm2, -0.39453125, %v525_v0  ;;  %vm717_vm4 = vcmp.gt.f32.partialorder %v3966_v40, -0.33984375  ;;  %v779_v60 = vsel %vm715_vm3, -0.28515625, %v651_v45  ;;  %vm843_vm5 = vcmp.gt.f32.partialorder %v3963_v33, -0.234375  ;;  %v127_v0 = vld [vmem:[#allocation6 + $0x1f8] sm:$0xff]  ;;  %v124_v45 = vld [vmem:[#allocation6 + $0x1e0] sm:$0xff] }
 0x21c   :  { %2558 = vmatpush1.bf16.msra.mxu1 %v2519_v41  ;;  %2520 = vmatpush1.bf16.msra.mxu0 %v2519_v41  ;;  %v781_v9 = vsel %vm717_vm4, -0.28515625, %v653_v10  ;;  %vm845_vm6 = vcmp.gt.f32.partialorder %v3966_v40, -0.234375  ;;  %v907_v24 = vsel %vm843_vm5, -0.18457031, %v779_v60  ;;  %vm971_vm7 = vcmp.gt.f32.partialorder %v3963_v33, -0.13769531 }
 0x21d   :  { %v909_v61 = vsel %vm845_vm6, -0.18457031, %v781_v9  ;;  %vm973_vm11 = vcmp.gt.f32.partialorder %v3966_v40, -0.13769531  ;;  %v1035_v5 = vsel %vm971_vm7, -0.09082031, %v907_v24  ;;  %vm1099_vm12 = vcmp.gt.f32.partialorder %v3963_v33, -0.045410156 }
 0x21e   :  { %v1037_v20 = vsel %vm973_vm11, -0.09082031, %v909_v61  ;;  %vm1101_vm8 = vcmp.gt.f32.partialorder %v3966_v40, -0.045410156  ;;  %v1163_v36 = vsel %vm1099_vm12, 0.0, %v1035_v5  ;;  %vm1227_vm15 = vcmp.gt.f32.partialorder %v3963_v33, 0.039794922 }
 0x21f   :  { %v1165_v38 = vsel %vm1101_vm8, 0.0, %v1037_v20  ;;  %vm1229_vm0 = vcmp.gt.f32.partialorder %v3966_v40, 0.039794922  ;;  %v1291_v28 = vsel %vm1227_vm15, 0.079589844, %v1163_v36  ;;  %vm1355_vm9 = vcmp.gt.f32.partialorder %v3963_v33, 0.12011719 }
 0x220   :  { %v1293_v50 = vsel %vm1229_vm0, 0.079589844, %v1165_v38  ;;  %vm1357_vm10 = vcmp.gt.f32.partialorder %v3966_v40, 0.12011719  ;;  %v1419_v2 = vsel %vm1355_vm9, 0.16113281, %v1291_v28  ;;  %vm1483_vm13 = vcmp.gt.f32.partialorder %v3963_v33, 0.203125 }
 0x221   :  { %v1421_v3 = vsel %vm1357_vm10, 0.16113281, %v1293_v50  ;;  %vm1485_vm14 = vcmp.gt.f32.partialorder %v3966_v40, 0.203125  ;;  %v1547_v4 = vsel %vm1483_vm13, 0.24609375, %v1419_v2  ;;  %vm1611_vm1 = vcmp.gt.f32.partialorder %v3963_v33, 0.29296875 }
 0x222   :  { %v1549_v32 = vsel %vm1485_vm14, 0.24609375, %v1421_v3  ;;  %vm1613_vm2 = vcmp.gt.f32.partialorder %v3966_v40, 0.29296875  ;;  %v1675_v59 = vsel %vm1611_vm1, 0.33789063, %v1547_v4  ;;  %vm1739_vm3 = vcmp.gt.f32.partialorder %v3963_v33, 0.390625 }
 0x223   :  { %v1677_v29 = vsel %vm1613_vm2, 0.33789063, %v1549_v32  ;;  %vm1741_vm4 = vcmp.gt.f32.partialorder %v3966_v40, 0.390625  ;;  %v1803_v27 = vsel %vm1739_vm3, 0.44140625, %v1675_v59  ;;  %vm1867_vm5 = vcmp.gt.f32.partialorder %v3963_v33, 0.5 }
 0x224   :  { %v1805_v57 = vsel %vm1741_vm4, 0.44140625, %v1677_v29  ;;  %vm1869_vm6 = vcmp.gt.f32.partialorder %v3966_v40, 0.5  ;;  %v1931_v58 = vsel %vm1867_vm5, 0.5625, %v1803_v27  ;;  %vm1995_vm7 = vcmp.gt.f32.partialorder %v3963_v33, 0.640625 }
 0x225   :  { %v1933_v8 = vsel %vm1869_vm6, 0.5625, %v1805_v57  ;;  %vm1997_vm11 = vcmp.gt.f32.partialorder %v3966_v40, 0.640625  ;;  %v2059_v11 = vsel %vm1995_vm7, 0.72265625, %v1931_v58  ;;  %vm2123_vm12 = vcmp.gt.f32.partialorder %v3963_v33, 0.859375 }
 0x226   :  { %v2061_v12 = vsel %vm1997_vm11, 0.72265625, %v1933_v8  ;;  %vm2125_vm8 = vcmp.gt.f32.partialorder %v3966_v40, 0.859375  ;;  %v2187_v63 = vsel %vm2123_vm12, 1.0, %v2059_v11  ;;  %v4006_v13 = vmul.f32 %v2846_v62, %v122_v7 }
 0x227   :  { %v2189_v14 = vsel %vm2125_vm8, 1.0, %v2061_v12  ;;  %v2316_v15 = vmul.f32 %v3846_v31, %v2187_v63  ;;  %vm330_vm15 = vcmp.gt.f32.partialorder %v3969_v48, -0.84765625  ;;  %vm458_vm0 = vcmp.gt.f32.partialorder %v3969_v48, -0.609375 }
 0x228   :  { %v2318_v16 = vmul.f32 %v3846_v31, %v2189_v14  ;;  %vm332_vm9 = vcmp.gt.f32.partialorder %v4006_v13, -0.84765625  ;;  %v394_v17 = vsel %vm330_vm15, -0.6953125, %v2685_v47  ;;  %vm460_vm10 = vcmp.gt.f32.partialorder %v4006_v13, -0.609375 }
 0x229   :  { %v396_v53 = vsel %vm332_vm9, -0.6953125, %v2685_v47  ;;  %v522_v37 = vsel %vm458_vm0, -0.5234375, %v394_v17  ;;  %vm586_vm13 = vcmp.gt.f32.partialorder %v3969_v48, -0.45898438  ;;  %vm588_vm14 = vcmp.gt.f32.partialorder %v4006_v13, -0.45898438 }
 0x22a   :  { %v2521_v25 = vpack.c.bf16 %v2318_v16, %v2316_v15  ;;  %v524_v42 = vsel %vm460_vm10, -0.5234375, %v396_v53  ;;  %v650_v19 = vsel %vm586_vm13, -0.39453125, %v522_v37  ;;  %vm714_vm1 = vcmp.gt.f32.partialorder %v3969_v48, -0.33984375  ;;  %v126_v53 = vld [vmem:[#allocation6 + $0x1f0] sm:$0xff] }
 0x22b   :  { %v652_v21 = vsel %vm588_vm14, -0.39453125, %v524_v42  ;;  %vm716_vm2 = vcmp.gt.f32.partialorder %v4006_v13, -0.33984375  ;;  %v778_v22 = vsel %vm714_vm1, -0.28515625, %v650_v19  ;;  %vm842_vm3 = vcmp.gt.f32.partialorder %v3969_v48, -0.234375 }
 0x22c   :  { %2543 = vmatprep.subr.bf16.mxu1 %v2521_v25  ;;  %v780_v55 = vsel %vm716_vm2, -0.28515625, %v652_v21  ;;  %vm844_vm4 = vcmp.gt.f32.partialorder %v4006_v13, -0.234375  ;;  %v906_v35 = vsel %vm842_vm3, -0.18457031, %v778_v22  ;;  %vm970_vm5 = vcmp.gt.f32.partialorder %v3969_v48, -0.13769531  ;;  %2522 = vmatprep.subr.bf16.mxu0 %v2521_v25 }
 0x22d   :  { %v908_v26 = vsel %vm844_vm4, -0.18457031, %v780_v55  ;;  %vm972_vm6 = vcmp.gt.f32.partialorder %v4006_v13, -0.13769531  ;;  %v1034_v56 = vsel %vm970_vm5, -0.09082031, %v906_v35  ;;  %vm1098_vm7 = vcmp.gt.f32.partialorder %v3969_v48, -0.045410156 }
 0x22e   :  { %v1036_v44 = vsel %vm972_vm6, -0.09082031, %v908_v26  ;;  %vm1100_vm11 = vcmp.gt.f32.partialorder %v4006_v13, -0.045410156  ;;  %v1162_v6 = vsel %vm1098_vm7, 0.0, %v1034_v56  ;;  %vm1226_vm12 = vcmp.gt.f32.partialorder %v3969_v48, 0.039794922 }
 0x22f   :  { %v1164_v18 = vsel %vm1100_vm11, 0.0, %v1036_v44  ;;  %vm1228_vm8 = vcmp.gt.f32.partialorder %v4006_v13, 0.039794922  ;;  %v1290_v43 = vsel %vm1226_vm12, 0.079589844, %v1162_v6  ;;  %vm1354_vm15 = vcmp.gt.f32.partialorder %v3969_v48, 0.12011719 }
 0x230   :  { %v1292_v33 = vsel %vm1228_vm8, 0.079589844, %v1164_v18  ;;  %vm1356_vm0 = vcmp.gt.f32.partialorder %v4006_v13, 0.12011719  ;;  %v1418_v34 = vsel %vm1354_vm15, 0.16113281, %v1290_v43  ;;  %vm1482_vm9 = vcmp.gt.f32.partialorder %v3969_v48, 0.203125 }
 0x231   :  { %v1420_v39 = vsel %vm1356_vm0, 0.16113281, %v1292_v33  ;;  %vm1484_vm10 = vcmp.gt.f32.partialorder %v4006_v13, 0.203125  ;;  %v1546_v40 = vsel %vm1482_vm9, 0.24609375, %v1418_v34  ;;  %vm1610_vm13 = vcmp.gt.f32.partialorder %v3969_v48, 0.29296875 }
 0x232   :  { %v1548_v49 = vsel %vm1484_vm10, 0.24609375, %v1420_v39  ;;  %vm1612_vm14 = vcmp.gt.f32.partialorder %v4006_v13, 0.29296875  ;;  %v1674_v51 = vsel %vm1610_vm13, 0.33789063, %v1546_v40  ;;  %vm1738_vm1 = vcmp.gt.f32.partialorder %v3969_v48, 0.390625 }
 0x233   :  { %v1676_v46 = vsel %vm1612_vm14, 0.33789063, %v1548_v49  ;;  %vm1740_vm2 = vcmp.gt.f32.partialorder %v4006_v13, 0.390625  ;;  %v1802_v52 = vsel %vm1738_vm1, 0.44140625, %v1674_v51  ;;  %vm1866_vm3 = vcmp.gt.f32.partialorder %v3969_v48, 0.5 }
 0x234   :  { %v1804_v30 = vsel %vm1740_vm2, 0.44140625, %v1676_v46  ;;  %vm1868_vm4 = vcmp.gt.f32.partialorder %v4006_v13, 0.5  ;;  %v1930_v41 = vsel %vm1866_vm3, 0.5625, %v1802_v52  ;;  %vm1994_vm5 = vcmp.gt.f32.partialorder %v3969_v48, 0.640625 }
 0x235   :  { %v1932_v10 = vsel %vm1868_vm4, 0.5625, %v1804_v30  ;;  %vm1996_vm6 = vcmp.gt.f32.partialorder %v4006_v13, 0.640625  ;;  %v2058_v60 = vsel %vm1994_vm5, 0.72265625, %v1930_v41  ;;  %vm2122_vm7 = vcmp.gt.f32.partialorder %v3969_v48, 0.859375 }
 0x236   :  { %v2060_v9 = vsel %vm1996_vm6, 0.72265625, %v1932_v10  ;;  %vm2124_vm11 = vcmp.gt.f32.partialorder %v4006_v13, 0.859375  ;;  %v2186_v24 = vsel %vm2122_vm7, 1.0, %v2058_v60  ;;  %v4043_v61 = vmul.f32 %v2850_v1, %v125_v54 }
 0x237   :  { %v2188_v5 = vsel %vm2124_vm11, 1.0, %v2060_v9  ;;  %v2315_v20 = vmul.f32 %v3849_v23, %v2186_v24  ;;  %v4047_v36 = vmul.f32 %v2850_v1, %v127_v0  ;;  %v4050_v38 = vmul.f32 %v2846_v62, %v124_v45 }
 0x238   :  { %v2317_v28 = vmul.f32 %v3849_v23, %v2188_v5  ;;  %vm335_vm12 = vcmp.gt.f32.partialorder %v4043_v61, -0.84765625  ;;  %vm463_vm8 = vcmp.gt.f32.partialorder %v4043_v61, -0.609375  ;;  %vm591_vm15 = vcmp.gt.f32.partialorder %v4043_v61, -0.45898438 }
 0x239   :  { %vm337_vm0 = vcmp.gt.f32.partialorder %v4047_v36, -0.84765625  ;;  %v399_v48 = vsel %vm335_vm12, -0.6953125, %v2685_v47  ;;  %vm465_vm9 = vcmp.gt.f32.partialorder %v4047_v36, -0.609375  ;;  %vm593_vm10 = vcmp.gt.f32.partialorder %v4047_v36, -0.45898438 }
 0x23a   :  { %v2523_v1 = vpack.c.bf16 %v2317_v28, %v2315_v20  ;;  %v401_v50 = vsel %vm337_vm0, -0.6953125, %v2685_v47  ;;  %v527_v2 = vsel %vm463_vm8, -0.5234375, %v399_v48  ;;  %vm719_vm13 = vcmp.gt.f32.partialorder %v4043_v61, -0.33984375 }
 0x23b   :  { %v529_v3 = vsel %vm465_vm9, -0.5234375, %v401_v50  ;;  %v655_v4 = vsel %vm591_vm15, -0.39453125, %v527_v2  ;;  %vm721_vm14 = vcmp.gt.f32.partialorder %v4047_v36, -0.33984375  ;;  %vm847_vm1 = vcmp.gt.f32.partialorder %v4043_v61, -0.234375 }
 0x23c   :  { %2559 = vmatpush1.bf16.msra.mxu1 %v2523_v1  ;;  %2524 = vmatpush1.bf16.msra.mxu0 %v2523_v1  ;;  %v657_v32 = vsel %vm593_vm10, -0.39453125, %v529_v3  ;;  %v783_v59 = vsel %vm719_vm13, -0.28515625, %v655_v4  ;;  %vm849_vm2 = vcmp.gt.f32.partialorder %v4047_v36, -0.234375  ;;  %vm975_vm3 = vcmp.gt.f32.partialorder %v4043_v61, -0.13769531 }
 0x23d   :  { %v785_v29 = vsel %vm721_vm14, -0.28515625, %v657_v32  ;;  %v911_v27 = vsel %vm847_vm1, -0.18457031, %v783_v59  ;;  %vm977_vm4 = vcmp.gt.f32.partialorder %v4047_v36, -0.13769531  ;;  %vm1103_vm5 = vcmp.gt.f32.partialorder %v4043_v61, -0.045410156  ;;  %v2331_v59 = vld [vmem:[#allocation3 + $0x10] sm:$0xff] }
 0x23e   :  { %v913_v7 = vsel %vm849_vm2, -0.18457031, %v785_v29  ;;  %v1039_v57 = vsel %vm975_vm3, -0.09082031, %v911_v27  ;;  %vm1105_vm6 = vcmp.gt.f32.partialorder %v4047_v36, -0.045410156  ;;  %vm1231_vm7 = vcmp.gt.f32.partialorder %v4043_v61, 0.039794922  ;;  %v2329_v29 = vld [vmem:[#allocation3] sm:$0xff]  ;;  %v2334_v27 = vld [vmem:[#allocation3 + $0x28] sm:$0xff] }
 0x23f   :  { %v1041_v58 = vsel %vm977_vm4, -0.09082031, %v913_v7  ;;  %v1167_v8 = vsel %vm1103_vm5, 0.0, %v1039_v57  ;;  %vm1233_vm11 = vcmp.gt.f32.partialorder %v4047_v36, 0.039794922  ;;  %vm1359_vm12 = vcmp.gt.f32.partialorder %v4043_v61, 0.12011719  ;;  %v2333_v7 = vld [vmem:[#allocation3 + $0x20] sm:$0xff] }
 0x240   :  { %v1169_v11 = vsel %vm1105_vm6, 0.0, %v1041_v58  ;;  %v1295_v12 = vsel %vm1231_vm7, 0.079589844, %v1167_v8  ;;  %vm1361_vm8 = vcmp.gt.f32.partialorder %v4047_v36, 0.12011719  ;;  %vm1487_vm15 = vcmp.gt.f32.partialorder %v4043_v61, 0.203125 }
 0x241   :  { %v1297_v63 = vsel %vm1233_vm11, 0.079589844, %v1169_v11  ;;  %v1423_v13 = vsel %vm1359_vm12, 0.16113281, %v1295_v12  ;;  %vm1489_vm0 = vcmp.gt.f32.partialorder %v4047_v36, 0.203125  ;;  %vm1615_vm9 = vcmp.gt.f32.partialorder %v4043_v61, 0.29296875 }
 0x242   :  { %v1425_v14 = vsel %vm1361_vm8, 0.16113281, %v1297_v63  ;;  %v1551_v15 = vsel %vm1487_vm15, 0.24609375, %v1423_v13  ;;  %vm1617_vm10 = vcmp.gt.f32.partialorder %v4047_v36, 0.29296875  ;;  %vm1743_vm13 = vcmp.gt.f32.partialorder %v4043_v61, 0.390625 }
 0x243   :  { %v1553_v16 = vsel %vm1489_vm0, 0.24609375, %v1425_v14  ;;  %v1679_v17 = vsel %vm1615_vm9, 0.33789063, %v1551_v15  ;;  %vm1745_vm14 = vcmp.gt.f32.partialorder %v4047_v36, 0.390625  ;;  %vm1871_vm1 = vcmp.gt.f32.partialorder %v4043_v61, 0.5 }
 0x244   :  { %v1681_v37 = vsel %vm1617_vm10, 0.33789063, %v1553_v16  ;;  %v1807_v25 = vsel %vm1743_vm13, 0.44140625, %v1679_v17  ;;  %vm1873_vm2 = vcmp.gt.f32.partialorder %v4047_v36, 0.5  ;;  %vm1999_vm3 = vcmp.gt.f32.partialorder %v4043_v61, 0.640625 }
 0x245   :  { %v1809_v42 = vsel %vm1745_vm14, 0.44140625, %v1681_v37  ;;  %v1935_v19 = vsel %vm1871_vm1, 0.5625, %v1807_v25  ;;  %vm2001_vm4 = vcmp.gt.f32.partialorder %v4047_v36, 0.640625  ;;  %vm2127_vm5 = vcmp.gt.f32.partialorder %v4043_v61, 0.859375 }
 0x246   :  { %v1937_v21 = vsel %vm1873_vm2, 0.5625, %v1809_v42  ;;  %v2063_v22 = vsel %vm1999_vm3, 0.72265625, %v1935_v19  ;;  %vm2129_vm6 = vcmp.gt.f32.partialorder %v4047_v36, 0.859375  ;;  %v4086_v55 = vmul.f32 %v2846_v62, %v126_v53 }
 0x247   :  { %v2065_v35 = vsel %vm2001_vm4, 0.72265625, %v1937_v21  ;;  %v2191_v26 = vsel %vm2127_vm5, 1.0, %v2063_v22  ;;  %vm334_vm7 = vcmp.gt.f32.partialorder %v4050_v38, -0.84765625  ;;  %vm462_vm11 = vcmp.gt.f32.partialorder %v4050_v38, -0.609375 }
 0x248   :  { %v2193_v56 = vsel %vm2129_vm6, 1.0, %v2065_v35  ;;  %v2320_v44 = vmul.f32 %v3846_v31, %v2191_v26  ;;  %vm336_vm12 = vcmp.gt.f32.partialorder %v4086_v55, -0.84765625  ;;  %v398_v6 = vsel %vm334_vm7, -0.6953125, %v2685_v47 }
 0x249   :  { %v2322_v18 = vmul.f32 %v3846_v31, %v2193_v56  ;;  %v400_v43 = vsel %vm336_vm12, -0.6953125, %v2685_v47  ;;  %vm464_vm8 = vcmp.gt.f32.partialorder %v4086_v55, -0.609375  ;;  %v526_v62 = vsel %vm462_vm11, -0.5234375, %v398_v6 }
 0x24a   :  { %v528_v33 = vsel %vm464_vm8, -0.5234375, %v400_v43  ;;  %vm590_vm15 = vcmp.gt.f32.partialorder %v4050_v38, -0.45898438  ;;  %vm592_vm0 = vcmp.gt.f32.partialorder %v4086_v55, -0.45898438  ;;  %vm718_vm9 = vcmp.gt.f32.partialorder %v4050_v38, -0.33984375 }
 0x24b   :  { %v2525_v34 = vpack.c.bf16 %v2322_v18, %v2320_v44  ;;  %v654_v39 = vsel %vm590_vm15, -0.39453125, %v526_v62  ;;  %v656_v40 = vsel %vm592_vm0, -0.39453125, %v528_v33  ;;  %vm720_vm10 = vcmp.gt.f32.partialorder %v4086_v55, -0.33984375 }
 0x24c   :  { %v782_v49 = vsel %vm718_vm9, -0.28515625, %v654_v39  ;;  %v784_v51 = vsel %vm720_vm10, -0.28515625, %v656_v40  ;;  %vm846_vm13 = vcmp.gt.f32.partialorder %v4050_v38, -0.234375  ;;  %vm848_vm14 = vcmp.gt.f32.partialorder %v4086_v55, -0.234375 }
 0x24d   :  { %2544 = vmatprep.subr.bf16.mxu1 %v2525_v34  ;;  %v910_v47 = vsel %vm846_vm13, -0.18457031, %v782_v49  ;;  %v912_v31 = vsel %vm848_vm14, -0.18457031, %v784_v51  ;;  %vm974_vm1 = vcmp.gt.f32.partialorder %v4050_v38, -0.13769531  ;;  %vm976_vm2 = vcmp.gt.f32.partialorder %v4086_v55, -0.13769531  ;;  %2526 = vmatprep.subr.bf16.mxu0 %v2525_v34 }
 0x24e   :  { %v1038_v46 = vsel %vm974_vm1, -0.09082031, %v910_v47  ;;  %v1040_v52 = vsel %vm976_vm2, -0.09082031, %v912_v31  ;;  %vm1102_vm3 = vcmp.gt.f32.partialorder %v4050_v38, -0.045410156  ;;  %vm1104_vm4 = vcmp.gt.f32.partialorder %v4086_v55, -0.045410156 }
 0x24f   :  { %v1166_v54 = vsel %vm1102_vm3, 0.0, %v1038_v46  ;;  %v1168_v30 = vsel %vm1104_vm4, 0.0, %v1040_v52  ;;  %vm1230_vm5 = vcmp.gt.f32.partialorder %v4050_v38, 0.039794922  ;;  %vm1232_vm6 = vcmp.gt.f32.partialorder %v4086_v55, 0.039794922 }
 0x250   :  { %v1294_v41 = vsel %vm1230_vm5, 0.079589844, %v1166_v54  ;;  %v1296_v0 = vsel %vm1232_vm6, 0.079589844, %v1168_v30  ;;  %vm1358_vm7 = vcmp.gt.f32.partialorder %v4050_v38, 0.12011719  ;;  %vm1360_vm11 = vcmp.gt.f32.partialorder %v4086_v55, 0.12011719 }
 0x251   :  { %v1422_v45 = vsel %vm1358_vm7, 0.16113281, %v1294_v41  ;;  %v1424_v10 = vsel %vm1360_vm11, 0.16113281, %v1296_v0  ;;  %vm1486_vm12 = vcmp.gt.f32.partialorder %v4050_v38, 0.203125  ;;  %vm1488_vm8 = vcmp.gt.f32.partialorder %v4086_v55, 0.203125 }
 0x252   :  { %v1550_v60 = vsel %vm1486_vm12, 0.24609375, %v1422_v45  ;;  %v1552_v9 = vsel %vm1488_vm8, 0.24609375, %v1424_v10  ;;  %vm1614_vm15 = vcmp.gt.f32.partialorder %v4050_v38, 0.29296875  ;;  %vm1616_vm0 = vcmp.gt.f32.partialorder %v4086_v55, 0.29296875 }
 0x253   :  { %v1678_v24 = vsel %vm1614_vm15, 0.33789063, %v1550_v60  ;;  %v1680_v61 = vsel %vm1616_vm0, 0.33789063, %v1552_v9  ;;  %vm1742_vm9 = vcmp.gt.f32.partialorder %v4050_v38, 0.390625  ;;  %vm1744_vm10 = vcmp.gt.f32.partialorder %v4086_v55, 0.390625 }
 0x254   :  { %v1806_v5 = vsel %vm1742_vm9, 0.44140625, %v1678_v24  ;;  %v1808_v20 = vsel %vm1744_vm10, 0.44140625, %v1680_v61  ;;  %vm1870_vm13 = vcmp.gt.f32.partialorder %v4050_v38, 0.5  ;;  %vm1872_vm14 = vcmp.gt.f32.partialorder %v4086_v55, 0.5 }
 0x255   :  { %v1934_v36 = vsel %vm1870_vm13, 0.5625, %v1806_v5  ;;  %v1936_v28 = vsel %vm1872_vm14, 0.5625, %v1808_v20  ;;  %vm1998_vm1 = vcmp.gt.f32.partialorder %v4050_v38, 0.640625  ;;  %vm2000_vm2 = vcmp.gt.f32.partialorder %v4086_v55, 0.640625 }
 0x256   :  { %v2062_v48 = vsel %vm1998_vm1, 0.72265625, %v1934_v36  ;;  %v2064_v1 = vsel %vm2000_vm2, 0.72265625, %v1936_v28  ;;  %vm2126_vm3 = vcmp.gt.f32.partialorder %v4050_v38, 0.859375  ;;  %vm2128_vm4 = vcmp.gt.f32.partialorder %v4086_v55, 0.859375 }
 0x257   :  { %v2190_v50 = vsel %vm2126_vm3, 1.0, %v2062_v48  ;;  %v2192_v2 = vsel %vm2128_vm4, 1.0, %v2064_v1 }
 0x258   :  { %v2319_v3 = vmul.f32 %v3849_v23, %v2190_v50  ;;  %v2321_v4 = vmul.f32 %v3849_v23, %v2192_v2 }
 0x25a   :  { %v2527_v32 = vpack.c.bf16 %v2321_v4, %v2319_v3 }
 0x25c   :  { %2560 = vmatpush1.bf16.msra.mxu1 %v2527_v32  ;;  %2528 = vmatpush1.bf16.msra.mxu0 %v2527_v32 }
 0x25f   :  { %2406 = vmatmul.mubr.f32.vlgmr.msra.gmra.mrb[0].mxu1 %v2331_v59  ;;  %2400 = vmatmul.mubr.f32.vlgmr.msra.gmra.mrb[0].mxu0 %v2329_v29 }
 0x260   :  { %2411 = vmatprep.mubr.f32.mxu1 %v2334_v27 }
 0x263   :  { %2412 = vmatmul.mubr.f32.gmra.mrb[2].mxu1 %v2333_v7 }
 0x332   :  { %v2407_v38 = vpop.f32.mrb[0].mxu1  ;;  %v2401_v57 = vpop.f32.mrb[0].mxu0 }
 0x333   :  { %2441 = vst [vmem:[#allocation9 + $0x10] sm:$0xff] %v2407_v38  ;;  %v2409_v58 = vpop.f32.mrb[1].mxu1  ;;  %2439 = vst [vmem:[#allocation9] sm:$0xff] %v2401_v57  ;;  %v2403_v8 = vpop.f32.mrb[1].mxu0 }
 0x334   :  { %2442 = vst [vmem:[#allocation9 + $0x18] sm:$0xff] %v2409_v58  ;;  %2440 = vst [vmem:[#allocation9 + $0x8] sm:$0xff] %v2403_v8 }
 0x336   :  { %v2413_v23 = vpop.f32.mrb[2].mxu1 }
 0x337   :  { %2443 = vst [vmem:[#allocation9 + $0x20] sm:$0xff] %v2413_v23  ;;  %v2415_v11 = vpop.f32.mrb[3].mxu1 }
 0x338   :  { %2444 = vst [vmem:[#allocation9 + $0x28] sm:$0xff] %v2415_v11 }
 0x339   :  { %2662 = shalt.err (!%p2659_p0)
}
 0x33a   :  { %s2663_s27 = scalar_lea.hbm %s4142_s3, 768 }
 0x33b   :  { %p2664_p1 = scmp.ne.s32.totalorder %s4142_s3, %s2663_s27  ;;  %p2667_p2 = scmp.lt.u32.totalorder %s2663_s27, %s4142_s3 }
 0x33d   :  { %p2669_p3 = pnand %p2667_p2, %p2664_p1 }
 0x33f   :  { %2672 = shalt.err (!%p2669_p3)
}
 0x340   :  { %2456 = dma.vmem_to_hbm [thread:$0]  %s2451_s21, 768, %s4142_s3, [#allocation5], %s2681_s24, %s2681_s24, %s2682_s25  }
 0x341   :  { %2677 = dma.done.wait [#allocation5], 768  }
 0x342   :  { %2678 = vsyncadd [#allocation5], 4294966528 }
 0x343   :  { %2460 = vsyncpa [#allocation4], 1 }
 0x344   :  { %2461 = vsyncpa [#allocation7], 1 }
 0x345   :  { %2462 = vsyncpa [#allocation5], 1 }

</bundles_post_ra>
